<compile_context>
chip_gen: v7x
topology: tpu7x:2x2x1
jax: 0.10.0
libtpu: 0.0.40
codegen_flags: <defaults>
</compile_context>

<pallas_src>
import math
from functools import partial

import jax
import jax.numpy as jnp
from jax import lax
from jax.experimental import pallas as pl
from jax.experimental.pallas import tpu as pltpu


_INV_SQRT2 = 1.0 / math.sqrt(2.0)


def _default_compute_dtype():
    """bf16 matmul operands on v6e/v7x (fast MXU path), f32 elsewhere (v5e etc.)."""
    try:
        kind = jax.devices()[0].device_kind.lower()
    except Exception:
        return jnp.float32
    if "v6" in kind or "v7" in kind:
        return jnp.bfloat16
    return jnp.float32


# ----------------------------------------------------------------------------
# In-kernel math helpers (operate on values already loaded from refs)
# ----------------------------------------------------------------------------

def _layernorm(z, g, b):
    """LayerNorm over last dim, eps=1e-5.  z: (N, D) f32; g/b: (1, D)."""
    mean = jnp.mean(z, axis=-1, keepdims=True)
    c = z - mean
    var = jnp.mean(c * c, axis=-1, keepdims=True)
    return (c * lax.rsqrt(var + 1e-5)) * g + b


def _gelu(h):
    return 0.5 * h * (1.0 + lax.erf(h * _INV_SQRT2))


def _mlp(y, w1, b1, w2, b2, cdt):
    """Linear-GELU-Linear with f32 accumulate; y: (N, D)."""
    h = jnp.dot(y.astype(cdt), w1.astype(cdt),
                preferred_element_type=jnp.float32) + b1
    h = _gelu(h)
    return jnp.dot(h.astype(cdt), w2.astype(cdt),
                   preferred_element_type=jnp.float32) + b2


def _mha_heads(q, k, v, wq, bq, wk, bk, wv, bv, wo, bo, n_heads, cdt):
    """Batched multi-head attention with per-head-split weights.

    q: (Bb, Lq, D) f32; k/v: (Bb, S, D) f32.
    wq/wk/wv: (H, D, e); bq/bk/bv: (H, 1, e); wo: (H, e, D); bo: (1, D).
    Head outputs are accumulated through wo[h] (== concat(heads) @ W_out), so there are
    no sub-lane slices and no concatenate.
    """
    Bb, Lq, D = q.shape
    S = k.shape[1]
    e = D // n_heads
    scale = 1.0 / math.sqrt(e)
    q2 = q.reshape(Bb * Lq, D).astype(cdt)
    k2 = k.reshape(Bb * S, D).astype(cdt)
    v2 = v.reshape(Bb * S, D).astype(cdt)
    out = jnp.zeros((Bb * Lq, D), jnp.float32)
    for h in range(n_heads):  # static, tiny loop over heads
        qh = (jnp.dot(q2, wq[h].astype(cdt), preferred_element_type=jnp.float32)
              + bq[h]).reshape(Bb, Lq, e)
        kh = (jnp.dot(k2, wk[h].astype(cdt), preferred_element_type=jnp.float32)
              + bk[h]).reshape(Bb, S, e)
        vh = (jnp.dot(v2, wv[h].astype(cdt), preferred_element_type=jnp.float32)
              + bv[h]).reshape(Bb, S, e)
        # scores: contract last dims of both operands (no explicit transpose of K)
        s = jnp.einsum('ble,bse->bls', qh.astype(cdt), kh.astype(cdt),
                       preferred_element_type=jnp.float32) * scale
        s = s - jnp.max(s, axis=-1, keepdims=True)
        p = jnp.exp(s)
        a = p * pl.reciprocal(jnp.sum(p, axis=-1, keepdims=True), approx=True)
        oh = jnp.einsum('bls,bse->ble', a.astype(cdt), vh.astype(cdt),
                        preferred_element_type=jnp.float32)
        out = out + jnp.dot(oh.reshape(Bb * Lq, e).astype(cdt), wo[h].astype(cdt),
                            preferred_element_type=jnp.float32)
    out = out + bo
    return out.reshape(Bb, Lq, D)


# ----------------------------------------------------------------------------
# Pallas kernels
# ----------------------------------------------------------------------------

def _tsa_time_kernel(x_ref,
                     wq_ref, bq_ref, wk_ref, bk_ref, wv_ref, bv_ref, wo_ref, bo_ref,
                     g1_ref, be1_ref,
                     w1_ref, b1_ref, w2_ref, b2_ref,
                     g2_ref, be2_ref,
                     o_ref, *, n_heads, compute_dtype):
    """Cross-time stage: out = LN(y + MLP(y)), y = LN(x + MHA(x, x, x))."""
    x = x_ref[...]                                        # (TB, L, D) f32
    TB, L, D = x.shape
    attn = _mha_heads(x, x, x,
                      wq_ref[...], bq_ref[...], wk_ref[...], bk_ref[...],
                      wv_ref[...], bv_ref[...], wo_ref[...], bo_ref[...],
                      n_heads, compute_dtype)
    z = (x + attn).reshape(TB * L, D)
    y = _layernorm(z, g1_ref[...], be1_ref[...])
    y2 = y + _mlp(y, w1_ref[...], b1_ref[...], w2_ref[...], b2_ref[...], compute_dtype)
    out = _layernorm(y2, g2_ref[...], be2_ref[...])
    o_ref[...] = out.reshape(TB, L, D).astype(o_ref.dtype)


def _tsa_dim_kernel(send_ref, router_ref,
                    swq_ref, sbq_ref, swk_ref, sbk_ref, swv_ref, sbv_ref, swo_ref, sbo_ref,
                    rwq_ref, rbq_ref, rwk_ref, rbk_ref, rwv_ref, rbv_ref, rwo_ref, rbo_ref,
                    g3_ref, be3_ref,
                    w1_ref, b1_ref, w2_ref, b2_ref,
                    g4_ref, be4_ref,
                    o_ref, *, n_heads, compute_dtype):
    """Cross-dimension (router) stage; one original batch (all L router rows) per step."""
    send = send_ref[...]                                  # (L, ts_d, D) f32
    router = router_ref[...]                              # (L, factor, D) f32
    L, T, D = send.shape
    buf = _mha_heads(router, send, send,
                     swq_ref[...], sbq_ref[...], swk_ref[...], sbk_ref[...],
                     swv_ref[...], sbv_ref[...], swo_ref[...], sbo_ref[...],
                     n_heads, compute_dtype)
    recv = _mha_heads(send, buf, buf,
                      rwq_ref[...], rbq_ref[...], rwk_ref[...], rbk_ref[...],
                      rwv_ref[...], rbv_ref[...], rwo_ref[...], rbo_ref[...],
                      n_heads, compute_dtype)
    z = (send + recv).reshape(L * T, D)
    y = _layernorm(z, g3_ref[...], be3_ref[...])
    y2 = y + _mlp(y, w1_ref[...], b1_ref[...], w2_ref[...], b2_ref[...], compute_dtype)
    out = _layernorm(y2, g4_ref[...], be4_ref[...])
    o_ref[...] = out.reshape(L, T, D).astype(o_ref.dtype)


def _norm_linear_kernel(x_ref, g_ref, be_ref, w_ref, b_ref, o_ref, *, compute_dtype):
    """SegMerging tail: out = LayerNorm(x) @ W + b."""
    xn = _layernorm(x_ref[...], g_ref[...], be_ref[...])
    o_ref[...] = (jnp.dot(xn.astype(compute_dtype), w_ref[...].astype(compute_dtype),
                          preferred_element_type=jnp.float32)
                  + b_ref[...]).astype(o_ref.dtype)


# ----------------------------------------------------------------------------
# Pallas-call wrappers
# ----------------------------------------------------------------------------

def _const_spec(shape):
    return pl.BlockSpec(shape, lambda *_: (0,) * len(shape))


def _choose_batch_tile(bb, max_tile=64):
    """Largest divisor of bb (<= max_tile) keeping grid >= 2 (both v7x TensorCores busy)."""
    for t in range(min(bb, max_tile), 0, -1):
        if bb % t == 0 and bb // t >= 2:
            return t
    return bb


def _choose_row_tile(n, max_rows=1024):
    """Row tile for 2-D (rows, lanes) kernels: as large as possible, grid >= 2 if easy."""
    if n <= max_rows:
        if n % 16 == 0:
            return n // 2            # two grid steps
        return n                     # whole thing in one step
    for t in range(max_rows, 7, -8):
        if n % t == 0:
            return t
    return n if n % 8 else 8


def _attn_split_shapes(n_heads, D):
    e = D // n_heads
    return [(n_heads, D, e), (n_heads, 1, e),
            (n_heads, D, e), (n_heads, 1, e),
            (n_heads, D, e), (n_heads, 1, e),
            (n_heads, e, D), (1, D)]


def _split_attn_params(p, n_heads):
    """(D, D)/(1, D) Linear params -> per-head-split tensors for the fused kernels."""
    D = p["wq"].shape[0]
    e = D // n_heads

    def split_w(w):                  # column split: (D, D) -> (H, D, e)
        return w.reshape(D, n_heads, e).transpose(1, 0, 2)

    def split_b(b):                  # (1, D) -> (H, 1, e)
        return b.reshape(n_heads, e)[:, None, :]

    wo = p["wo"].reshape(n_heads, e, D)   # row split
    return (split_w(p["wq"]), split_b(p["bq"]),
            split_w(p["wk"]), split_b(p["bk"]),
            split_w(p["wv"]), split_b(p["bv"]),
            wo, p["bo"])


def tsa_time_stage(x, p, n_heads, compute_dtype):
    """x: (BB, L, D) -> (BB, L, D); fused MHA + add&LN + MLP + add&LN."""
    BB, L, D = x.shape
    d_ff = p["mlp1"]["w1"].shape[1]
    tb = _choose_batch_tile(BB)
    attn = _split_attn_params(p["time_attention"], n_heads)
    in_specs = [pl.BlockSpec((tb, L, D), lambda i: (i, 0, 0))]
    in_specs += [_const_spec(s) for s in _attn_split_shapes(n_heads, D)]
    in_specs += [_const_spec(s) for s in [(1, D), (1, D),
                                          (D, d_ff), (1, d_ff), (d_ff, D), (1, D),
                                          (1, D), (1, D)]]
    return pl.pallas_call(
        partial(_tsa_time_kernel, n_heads=n_heads, compute_dtype=compute_dtype),
        out_shape=jax.ShapeDtypeStruct((BB, L, D), x.dtype),
        grid=(BB // tb,),
        in_specs=in_specs,
        out_specs=pl.BlockSpec((tb, L, D), lambda i: (i, 0, 0)),
        compiler_params=pltpu.CompilerParams(dimension_semantics=("parallel",)),
    )(x, *attn,
      p["norm1_g"], p["norm1_b"],
      p["mlp1"]["w1"], p["mlp1"]["b1"], p["mlp1"]["w2"], p["mlp1"]["b2"],
      p["norm2_g"], p["norm2_b"])


def tsa_dim_stage(dim_send, router, p, n_heads, compute_dtype):
    """dim_send: (B*L, ts_d, D), router: (L, factor, D) -> (B*L, ts_d, D)."""
    BL, T, D = dim_send.shape
    L, F, _ = router.shape
    B = BL // L
    d_ff = p["mlp2"]["w1"].shape[1]
    sender = _split_attn_params(p["dim_sender"], n_heads)
    receiver = _split_attn_params(p["dim_receiver"], n_heads)
    in_specs = [pl.BlockSpec((L, T, D), lambda b: (b, 0, 0)),
                _const_spec((L, F, D))]
    in_specs += [_const_spec(s) for s in _attn_split_shapes(n_heads, D)]    # sender
    in_specs += [_const_spec(s) for s in _attn_split_shapes(n_heads, D)]    # receiver
    in_specs += [_const_spec(s) for s in [(1, D), (1, D),
                                          (D, d_ff), (1, d_ff), (d_ff, D), (1, D),
                                          (1, D), (1, D)]]
    return pl.pallas_call(
        partial(_tsa_dim_kernel, n_heads=n_heads, compute_dtype=compute_dtype),
        out_shape=jax.ShapeDtypeStruct((BL, T, D), dim_send.dtype),
        grid=(B,),
        in_specs=in_specs,
        out_specs=pl.BlockSpec((L, T, D), lambda b: (b, 0, 0)),
        compiler_params=pltpu.CompilerParams(dimension_semantics=("parallel",)),
    )(dim_send, router, *sender, *receiver,
      p["norm3_g"], p["norm3_b"],
      p["mlp2"]["w1"], p["mlp2"]["b1"], p["mlp2"]["w2"], p["mlp2"]["b2"],
      p["norm4_g"], p["norm4_b"])


def seg_merging(x, p, win_size, compute_dtype):
    """x: (B, ts_d, seg_num, D) -> (B, ts_d, ceil(seg_num/win), D)."""
    B, T, seg_num, D = x.shape
    pad = seg_num % win_size
    if pad != 0:
        pad = win_size - pad
        x = jnp.concatenate([x, x[:, :, -pad:, :]], axis=2)
        seg_num += pad
    # interleave win_size adjacent segments along the feature dim (matches torch.cat order)
    merged = jnp.concatenate([x[:, :, i::win_size, :] for i in range(win_size)], axis=-1)
    new_seg = seg_num // win_size
    N = B * T * new_seg
    Dw = win_size * D
    flat = merged.reshape(N, Dw)
    t = _choose_row_tile(N)
    out = pl.pallas_call(
        partial(_norm_linear_kernel, compute_dtype=compute_dtype),
        out_shape=jax.ShapeDtypeStruct((N, D), x.dtype),
        grid=(N // t,),
        in_specs=[pl.BlockSpec((t, Dw), lambda i: (i, 0)),
                  _const_spec((1, Dw)), _const_spec((1, Dw)),
                  _const_spec((Dw, D)), _const_spec((1, D))],
        out_specs=pl.BlockSpec((t, D), lambda i: (i, 0)),
        compiler_params=pltpu.CompilerParams(dimension_semantics=("parallel",)),
    )(flat, p["norm_g"], p["norm_b"], p["w"], p["b"])
    return out.reshape(B, T, new_seg, D)


# ----------------------------------------------------------------------------
# scale_block forward (composed from the fused kernels)
# ----------------------------------------------------------------------------

def two_stage_attention(x, p, n_heads, compute_dtype):
    """x: (B, ts_d, seg_num, d_model) -> same shape."""
    B, T, L, D = x.shape
    time_in = x.reshape(B * T, L, D)
    dim_in = tsa_time_stage(time_in, p, n_heads, compute_dtype)
    # (b ts_d) seg d -> (b seg) ts_d d   (tiny transpose stays in XLA glue)
    dim_send = dim_in.reshape(B, T, L, D).transpose(0, 2, 1, 3).reshape(B * L, T, D)
    dim_enc = tsa_dim_stage(dim_send, p["router"], p, n_heads, compute_dtype)
    return dim_enc.reshape(B, L, T, D).transpose(0, 2, 1, 3)


def scale_block_forward(x, params, n_heads, win_size, compute_dtype):
    if params["merge"] is not None:
        x = seg_merging(x, params["merge"], win_size, compute_dtype)
    for lp in params["layers"]:
        x = two_stage_attention(x, lp, n_heads, compute_dtype)
    return x


# ----------------------------------------------------------------------------
# Deterministic parameter init (shapes from the PyTorch __init__)
# ----------------------------------------------------------------------------

def _linear_params(key, d_in, d_out):
    kw, kb = jax.random.split(key)
    w = jax.random.normal(kw, (d_in, d_out), jnp.float32) * (1.0 / math.sqrt(d_in))
    b = jax.random.normal(kb, (1, d_out), jnp.float32) * 0.02
    return w, b


def init_attention_params(key, d_model):
    ks = jax.random.split(key, 4)
    wq, bq = _linear_params(ks[0], d_model, d_model)
    wk, bk = _linear_params(ks[1], d_model, d_model)
    wv, bv = _linear_params(ks[2], d_model, d_model)
    wo, bo = _linear_params(ks[3], d_model, d_model)
    return {"wq": wq, "bq": bq, "wk": wk, "bk": bk,
            "wv": wv, "bv": bv, "wo": wo, "bo": bo}


def init_mlp_params(key, d_model, d_ff):
    k1, k2 = jax.random.split(key)
    w1, b1 = _linear_params(k1, d_model, d_ff)
    w2, b2 = _linear_params(k2, d_ff, d_model)
    return {"w1": w1, "b1": b1, "w2": w2, "b2": b2}


def init_tsa_params(key, seg_num, factor, d_model, d_ff):
    ks = jax.random.split(key, 6)
    ones = jnp.ones((1, d_model), jnp.float32)
    zeros = jnp.zeros((1, d_model), jnp.float32)
    return {
        "time_attention": init_attention_params(ks[0], d_model),
        "dim_sender": init_attention_params(ks[1], d_model),
        "dim_receiver": init_attention_params(ks[2], d_model),
        "router": jax.random.normal(ks[3], (seg_num, factor, d_model), jnp.float32),
        "mlp1": init_mlp_params(ks[4], d_model, d_ff),
        "mlp2": init_mlp_params(ks[5], d_model, d_ff),
        "norm1_g": ones, "norm1_b": zeros,
        "norm2_g": ones, "norm2_b": zeros,
        "norm3_g": ones, "norm3_b": zeros,
        "norm4_g": ones, "norm4_b": zeros,
    }


def init_scale_block_params(key, win_size, d_model, n_heads, d_ff, depth, seg_num, factor):
    merge = None
    if win_size > 1:
        key, mkey = jax.random.split(key)
        w, b = _linear_params(mkey, win_size * d_model, d_model)
        merge = {"norm_g": jnp.ones((1, win_size * d_model), jnp.float32),
                 "norm_b": jnp.zeros((1, win_size * d_model), jnp.float32),
                 "w": w, "b": b}
    layers = []
    for _ in range(depth):
        key, lkey = jax.random.split(key)
        layers.append(init_tsa_params(lkey, seg_num, factor, d_model, d_ff))
    return {"merge": merge, "layers": layers}


# ----------------------------------------------------------------------------
# Pure-JAX f32 reference (for a tolerance check against the Pallas path)
# ----------------------------------------------------------------------------

def _ref_layernorm(x, g, b):
    mean = jnp.mean(x, axis=-1, keepdims=True)
    var = jnp.mean((x - mean) ** 2, axis=-1, keepdims=True)
    return (x - mean) / jnp.sqrt(var + 1e-5) * g + b


def _ref_mlp(x, p):
    h = x @ p["w1"] + p["b1"]
    h = 0.5 * h * (1.0 + lax.erf(h * _INV_SQRT2))
    return h @ p["w2"] + p["b2"]


def _ref_attention(q, k, v, p, n_heads):
    Bb, Lq, D = q.shape
    S = k.shape[1]
    e = D // n_heads
    qp = (q @ p["wq"] + p["bq"]).reshape(Bb, Lq, n_heads, e)
    kp = (k @ p["wk"] + p["bk"]).reshape(Bb, S, n_heads, e)
    vp = (v @ p["wv"] + p["bv"]).reshape(Bb, S, n_heads, e)
    s = jnp.einsum('blhe,bshe->bhls', qp, kp) / math.sqrt(e)
    a = jax.nn.softmax(s, axis=-1)
    o = jnp.einsum('bhls,bshe->blhe', a, vp).reshape(Bb, Lq, D)
    return o @ p["wo"] + p["bo"]


def _ref_tsa(x, p, n_heads):
    B, T, L, D = x.shape
    time_in = x.reshape(B * T, L, D)
    time_enc = _ref_attention(time_in, time_in, time_in, p["time_attention"], n_heads)
    dim_in = _ref_layernorm(time_in + time_enc, p["norm1_g"], p["norm1_b"])
    dim_in = _ref_layernorm(dim_in + _ref_mlp(dim_in, p["mlp1"]), p["norm2_g"], p["norm2_b"])
    dim_send = dim_in.reshape(B, T, L, D).transpose(0, 2, 1, 3).reshape(B * L, T, D)
    router = jnp.tile(p["router"], (B, 1, 1))
    dim_buffer = _ref_attention(router, dim_send, dim_send, p["dim_sender"], n_heads)
    dim_receive = _ref_attention(dim_send, dim_buffer, dim_buffer, p["dim_receiver"], n_heads)
    dim_enc = _ref_layernorm(dim_send + dim_receive, p["norm3_g"], p["norm3_b"])
    dim_enc = _ref_layernorm(dim_enc + _ref_mlp(dim_enc, p["mlp2"]), p["norm4_g"], p["norm4_b"])
    return dim_enc.reshape(B, L, T, D).transpose(0, 2, 1, 3)


def _ref_seg_merging(x, p, win_size):
    B, T, seg_num, D = x.shape
    pad = seg_num % win_size
    if pad != 0:
        pad = win_size - pad
        x = jnp.concatenate([x, x[:, :, -pad:, :]], axis=2)
    merged = jnp.concatenate([x[:, :, i::win_size, :] for i in range(win_size)], axis=-1)
    xn = _ref_layernorm(merged, p["norm_g"], p["norm_b"])
    return xn @ p["w"] + p["b"]


def reference_forward(x, params, n_heads, win_size):
    if params["merge"] is not None:
        x = _ref_seg_merging(x, params["merge"], win_size)
    for lp in params["layers"]:
        x = _ref_tsa(x, lp, n_heads)
    return x


# ----------------------------------------------------------------------------
# Main
# ----------------------------------------------------------------------------

if __name__ == "__main__":
    # small config consistent with the module
    B, ts_d = 2, 4
    d_model, n_heads, d_ff = 32, 2, 64
    win_size, depth = 2, 1
    in_seg_num, factor = 8, 4
    dropout = 0.0  # dropout is identity in this forward implementation
    out_seg = math.ceil(in_seg_num / win_size)   # seg count seen by the TSA layers

    compute_dtype = _default_compute_dtype()

    key = jax.random.PRNGKey(0)
    pkey, xkey = jax.random.split(key)
    params = init_scale_block_params(pkey, win_size, d_model, n_heads, d_ff,
                                     depth, out_seg, factor)
    x = jax.random.normal(xkey, (B, ts_d, in_seg_num, d_model), jnp.float32)

    fwd = jax.jit(partial(scale_block_forward, n_heads=n_heads, win_size=win_size,
                          compute_dtype=compute_dtype))
    out = jax.block_until_ready(fwd(x, params))

    assert out.shape == (B, ts_d, out_seg, d_model), out.shape
    assert bool(jnp.all(jnp.isfinite(out)))

    # tolerance check vs a pure-JAX f32 reference (looser when the MXU path runs bf16)
    ref = reference_forward(x, params, n_heads, win_size)
    tol = 2e-2 if compute_dtype == jnp.float32 else 1e-1
    max_err = float(jnp.max(jnp.abs(out - ref)))
    assert bool(jnp.allclose(out, ref, atol=tol, rtol=tol)), max_err

    print("KERNEL_OK")
</pallas_src>

<mosaic_0001>
module attributes {stable_mosaic.version = 11 : i64} {
  func.func @_norm_linear_kernel(%arg0: i32, %arg1: memref<16x64xf32, #tpu.memory_space<vmem>>, %arg2: memref<1x64xf32, #tpu.memory_space<vmem>>, %arg3: memref<1x64xf32, #tpu.memory_space<vmem>>, %arg4: memref<64x32xf32, #tpu.memory_space<vmem>>, %arg5: memref<1x32xf32, #tpu.memory_space<vmem>>, %arg6: memref<16x32xf32, #tpu.memory_space<vmem>>) attributes {dimension_semantics = [#tpu.dimension_semantics<parallel>], iteration_bounds = array<i64: 2>, scalar_prefetch = 0 : i64, scratch_operands = 0 : i64, tpu.core_type = #tpu.core_type<tc>, window_params = [{transform_indices = @transform_0, window_bounds = array<i64: 16, 64>}, {pipeline_mode = #tpu.pipeline_mode<synchronous>, transform_indices = @transform_1, window_bounds = array<i64: 1, 64>}, {pipeline_mode = #tpu.pipeline_mode<synchronous>, transform_indices = @transform_2, window_bounds = array<i64: 1, 64>}, {pipeline_mode = #tpu.pipeline_mode<synchronous>, transform_indices = @transform_3, window_bounds = array<i64: 64, 32>}, {pipeline_mode = #tpu.pipeline_mode<synchronous>, transform_indices = @transform_4, window_bounds = array<i64: 1, 32>}, {transform_indices = @transform_5, window_bounds = array<i64: 16, 32>}]} {
    %c0 = arith.constant 0 : index
    %c0_0 = arith.constant 0 : index
    %0 = vector.load %arg1[%c0, %c0_0] : memref<16x64xf32, #tpu.memory_space<vmem>>, vector<16x64xf32>
    %c0_1 = arith.constant 0 : index
    %c0_2 = arith.constant 0 : index
    %1 = vector.load %arg2[%c0_1, %c0_2] : memref<1x64xf32, #tpu.memory_space<vmem>>, vector<1x64xf32>
    %c0_3 = arith.constant 0 : index
    %c0_4 = arith.constant 0 : index
    %2 = vector.load %arg3[%c0_3, %c0_4] : memref<1x64xf32, #tpu.memory_space<vmem>>, vector<1x64xf32>
    %cst = arith.constant dense<0.000000e+00> : vector<16xf32>
    %3 = vector.multi_reduction <add>, %0, %cst [1] : vector<16x64xf32> to vector<16xf32>
    %4 = vector.shape_cast %3 : vector<16xf32> to vector<16x1xf32>
    %cst_5 = arith.constant 6.400000e+01 : f32
    %5 = vector.broadcast %cst_5 : f32 to vector<16x1xf32>
    %6 = arith.divf %4, %5 : vector<16x1xf32>
    %7 = vector.broadcast %6 : vector<16x1xf32> to vector<16x64xf32>
    %8 = arith.subf %0, %7 : vector<16x64xf32>
    %9 = arith.mulf %8, %8 : vector<16x64xf32>
    %cst_6 = arith.constant dense<0.000000e+00> : vector<16xf32>
    %10 = vector.multi_reduction <add>, %9, %cst_6 [1] : vector<16x64xf32> to vector<16xf32>
    %11 = vector.shape_cast %10 : vector<16xf32> to vector<16x1xf32>
    %cst_7 = arith.constant 6.400000e+01 : f32
    %12 = vector.broadcast %cst_7 : f32 to vector<16x1xf32>
    %13 = arith.divf %11, %12 : vector<16x1xf32>
    %cst_8 = arith.constant 9.99999974E-6 : f32
    %14 = vector.broadcast %cst_8 : f32 to vector<16x1xf32>
    %15 = arith.addf %13, %14 : vector<16x1xf32>
    %16 = math.rsqrt %15 : vector<16x1xf32>
    %17 = vector.broadcast %16 : vector<16x1xf32> to vector<16x64xf32>
    %18 = arith.mulf %8, %17 : vector<16x64xf32>
    %19 = vector.broadcast %1 : vector<1x64xf32> to vector<16x64xf32>
    %20 = arith.mulf %18, %19 : vector<16x64xf32>
    %21 = vector.broadcast %2 : vector<1x64xf32> to vector<16x64xf32>
    %22 = arith.addf %20, %21 : vector<16x64xf32>
    %c0_9 = arith.constant 0 : index
    %c0_10 = arith.constant 0 : index
    %23 = vector.load %arg4[%c0_9, %c0_10] : memref<64x32xf32, #tpu.memory_space<vmem>>, vector<64x32xf32>
    %cst_11 = arith.constant dense<0.000000e+00> : vector<16x32xf32>
    %24 = tpu.matmul %22, %23, %cst_11 {dimension_numbers = #tpu.dot_dimension_numbers<[1], [0], [0], [1], [0, 0, 1, 1], [], []>} : vector<16x64xf32>, vector<64x32xf32>, vector<16x32xf32> -> vector<16x32xf32>
    %c0_12 = arith.constant 0 : index
    %c0_13 = arith.constant 0 : index
    %25 = vector.load %arg5[%c0_12, %c0_13] : memref<1x32xf32, #tpu.memory_space<vmem>>, vector<1x32xf32>
    %26 = vector.broadcast %25 : vector<1x32xf32> to vector<16x32xf32>
    %27 = arith.addf %24, %26 : vector<16x32xf32>
    %c0_14 = arith.constant 0 : index
    %c0_15 = arith.constant 0 : index
    %28 = vector.load %arg6[%c0_14, %c0_15] : memref<16x32xf32, #tpu.memory_space<vmem>>, vector<16x32xf32>
    tpu.vector_store %arg6[%c0_14, %c0_15], %27 {strides = array<i32>} : memref<16x32xf32, #tpu.memory_space<vmem>>, vector<16x32xf32>,
    return
  }
  func.func @transform_0(%arg0: i32) -> (i32, i32) {
    %c0_i32 = arith.constant 0 : i32
    %c0_i32_0 = arith.constant 0 : i32
    return %arg0, %c0_i32 : i32, i32
  }
  func.func @transform_1(%arg0: i32) -> (i32, i32) {
    %c0_i32 = arith.constant 0 : i32
    %c0_i32_0 = arith.constant 0 : i32
    %c0_i32_1 = arith.constant 0 : i32
    return %c0_i32, %c0_i32_0 : i32, i32
  }
  func.func @transform_2(%arg0: i32) -> (i32, i32) {
    %c0_i32 = arith.constant 0 : i32
    %c0_i32_0 = arith.constant 0 : i32
    %c0_i32_1 = arith.constant 0 : i32
    return %c0_i32, %c0_i32_0 : i32, i32
  }
  func.func @transform_3(%arg0: i32) -> (i32, i32) {
    %c0_i32 = arith.constant 0 : i32
    %c0_i32_0 = arith.constant 0 : i32
    %c0_i32_1 = arith.constant 0 : i32
    return %c0_i32, %c0_i32_0 : i32, i32
  }
  func.func @transform_4(%arg0: i32) -> (i32, i32) {
    %c0_i32 = arith.constant 0 : i32
    %c0_i32_0 = arith.constant 0 : i32
    %c0_i32_1 = arith.constant 0 : i32
    return %c0_i32, %c0_i32_0 : i32, i32
  }
  func.func @transform_5(%arg0: i32) -> (i32, i32) {
    %c0_i32 = arith.constant 0 : i32
    %c0_i32_0 = arith.constant 0 : i32
    return %arg0, %c0_i32 : i32, i32
  }
}

module attributes {stable_mosaic.version = 11 : i64} {
  func.func @_tsa_dim_kernel(%arg0: i32, %arg1: memref<4x4x32xf32, #tpu.memory_space<vmem>>, %arg2: memref<4x4x32xf32, #tpu.memory_space<vmem>>, %arg3: memref<2x32x16xf32, #tpu.memory_space<vmem>>, %arg4: memref<2x1x16xf32, #tpu.memory_space<vmem>>, %arg5: memref<2x32x16xf32, #tpu.memory_space<vmem>>, %arg6: memref<2x1x16xf32, #tpu.memory_space<vmem>>, %arg7: memref<2x32x16xf32, #tpu.memory_space<vmem>>, %arg8: memref<2x1x16xf32, #tpu.memory_space<vmem>>, %arg9: memref<2x16x32xf32, #tpu.memory_space<vmem>>, %arg10: memref<1x32xf32, #tpu.memory_space<vmem>>, %arg11: memref<2x32x16xf32, #tpu.memory_space<vmem>>, %arg12: memref<2x1x16xf32, #tpu.memory_space<vmem>>, %arg13: memref<2x32x16xf32, #tpu.memory_space<vmem>>, %arg14: memref<2x1x16xf32, #tpu.memory_space<vmem>>, %arg15: memref<2x32x16xf32, #tpu.memory_space<vmem>>, %arg16: memref<2x1x16xf32, #tpu.memory_space<vmem>>, %arg17: memref<2x16x32xf32, #tpu.memory_space<vmem>>, %arg18: memref<1x32xf32, #tpu.memory_space<vmem>>, %arg19: memref<1x32xf32, #tpu.memory_space<vmem>>, %arg20: memref<1x32xf32, #tpu.memory_space<vmem>>, %arg21: memref<32x64xf32, #tpu.memory_space<vmem>>, %arg22: memref<1x64xf32, #tpu.memory_space<vmem>>, %arg23: memref<64x32xf32, #tpu.memory_space<vmem>>, %arg24: memref<1x32xf32, #tpu.memory_space<vmem>>, %arg25: memref<1x32xf32, #tpu.memory_space<vmem>>, %arg26: memref<1x32xf32, #tpu.memory_space<vmem>>, %arg27: memref<4x4x32xf32, #tpu.memory_space<vmem>>) attributes {dimension_semantics = [#tpu.dimension_semantics<parallel>], iteration_bounds = array<i64: 2>, scalar_prefetch = 0 : i64, scratch_operands = 0 : i64, tpu.core_type = #tpu.core_type<tc>, window_params = [{transform_indices = @transform_0, window_bounds = array<i64: 4, 4, 32>}, {pipeline_mode = #tpu.pipeline_mode<synchronous>, transform_indices = @transform_1, window_bounds = array<i64: 4, 4, 32>}, {pipeline_mode = #tpu.pipeline_mode<synchronous>, transform_indices = @transform_2, window_bounds = array<i64: 2, 32, 16>}, {pipeline_mode = #tpu.pipeline_mode<synchronous>, transform_indices = @transform_3, window_bounds = array<i64: 2, 1, 16>}, {pipeline_mode = #tpu.pipeline_mode<synchronous>, transform_indices = @transform_4, window_bounds = array<i64: 2, 32, 16>}, {pipeline_mode = #tpu.pipeline_mode<synchronous>, transform_indices = @transform_5, window_bounds = array<i64: 2, 1, 16>}, {pipeline_mode = #tpu.pipeline_mode<synchronous>, transform_indices = @transform_6, window_bounds = array<i64: 2, 32, 16>}, {pipeline_mode = #tpu.pipeline_mode<synchronous>, transform_indices = @transform_7, window_bounds = array<i64: 2, 1, 16>}, {pipeline_mode = #tpu.pipeline_mode<synchronous>, transform_indices = @transform_8, window_bounds = array<i64: 2, 16, 32>}, {pipeline_mode = #tpu.pipeline_mode<synchronous>, transform_indices = @transform_9, window_bounds = array<i64: 1, 32>}, {pipeline_mode = #tpu.pipeline_mode<synchronous>, transform_indices = @transform_10, window_bounds = array<i64: 2, 32, 16>}, {pipeline_mode = #tpu.pipeline_mode<synchronous>, transform_indices = @transform_11, window_bounds = array<i64: 2, 1, 16>}, {pipeline_mode = #tpu.pipeline_mode<synchronous>, transform_indices = @transform_12, window_bounds = array<i64: 2, 32, 16>}, {pipeline_mode = #tpu.pipeline_mode<synchronous>, transform_indices = @transform_13, window_bounds = array<i64: 2, 1, 16>}, {pipeline_mode = #tpu.pipeline_mode<synchronous>, transform_indices = @transform_14, window_bounds = array<i64: 2, 32, 16>}, {pipeline_mode = #tpu.pipeline_mode<synchronous>, transform_indices = @transform_15, window_bounds = array<i64: 2, 1, 16>}, {pipeline_mode = #tpu.pipeline_mode<synchronous>, transform_indices = @transform_16, window_bounds = array<i64: 2, 16, 32>}, {pipeline_mode = #tpu.pipeline_mode<synchronous>, transform_indices = @transform_17, window_bounds = array<i64: 1, 32>}, {pipeline_mode = #tpu.pipeline_mode<synchronous>, transform_indices = @transform_18, window_bounds = array<i64: 1, 32>}, {pipeline_mode = #tpu.pipeline_mode<synchronous>, transform_indices = @transform_19, window_bounds = array<i64: 1, 32>}, {pipeline_mode = #tpu.pipeline_mode<synchronous>, transform_indices = @transform_20, window_bounds = array<i64: 32, 64>}, {pipeline_mode = #tpu.pipeline_mode<synchronous>, transform_indices = @transform_21, window_bounds = array<i64: 1, 64>}, {pipeline_mode = #tpu.pipeline_mode<synchronous>, transform_indices = @transform_22, window_bounds = array<i64: 64, 32>}, {pipeline_mode = #tpu.pipeline_mode<synchronous>, transform_indices = @transform_23, window_bounds = array<i64: 1, 32>}, {pipeline_mode = #tpu.pipeline_mode<synchronous>, transform_indices = @transform_24, window_bounds = array<i64: 1, 32>}, {pipeline_mode = #tpu.pipeline_mode<synchronous>, transform_indices = @transform_25, window_bounds = array<i64: 1, 32>}, {transform_indices = @transform_26, window_bounds = array<i64: 4, 4, 32>}]} {
    %c0 = arith.constant 0 : index
    %c0_0 = arith.constant 0 : index
    %c0_1 = arith.constant 0 : index
    %0 = vector.load %arg1[%c0, %c0_0, %c0_1] : memref<4x4x32xf32, #tpu.memory_space<vmem>>, vector<4x4x32xf32>
    %c0_2 = arith.constant 0 : index
    %c0_3 = arith.constant 0 : index
    %c0_4 = arith.constant 0 : index
    %1 = vector.load %arg2[%c0_2, %c0_3, %c0_4] : memref<4x4x32xf32, #tpu.memory_space<vmem>>, vector<4x4x32xf32>
    %c0_5 = arith.constant 0 : index
    %c0_6 = arith.constant 0 : index
    %c0_7 = arith.constant 0 : index
    %2 = vector.load %arg3[%c0_5, %c0_6, %c0_7] : memref<2x32x16xf32, #tpu.memory_space<vmem>>, vector<2x32x16xf32>
    %c0_8 = arith.constant 0 : index
    %c0_9 = arith.constant 0 : index
    %c0_10 = arith.constant 0 : index
    %3 = vector.load %arg4[%c0_8, %c0_9, %c0_10] : memref<2x1x16xf32, #tpu.memory_space<vmem>>, vector<2x1x16xf32>
    %c0_11 = arith.constant 0 : index
    %c0_12 = arith.constant 0 : index
    %c0_13 = arith.constant 0 : index
    %4 = vector.load %arg5[%c0_11, %c0_12, %c0_13] : memref<2x32x16xf32, #tpu.memory_space<vmem>>, vector<2x32x16xf32>
    %c0_14 = arith.constant 0 : index
    %c0_15 = arith.constant 0 : index
    %c0_16 = arith.constant 0 : index
    %5 = vector.load %arg6[%c0_14, %c0_15, %c0_16] : memref<2x1x16xf32, #tpu.memory_space<vmem>>, vector<2x1x16xf32>
    %c0_17 = arith.constant 0 : index
    %c0_18 = arith.constant 0 : index
    %c0_19 = arith.constant 0 : index
    %6 = vector.load %arg7[%c0_17, %c0_18, %c0_19] : memref<2x32x16xf32, #tpu.memory_space<vmem>>, vector<2x32x16xf32>
    %c0_20 = arith.constant 0 : index
    %c0_21 = arith.constant 0 : index
    %c0_22 = arith.constant 0 : index
    %7 = vector.load %arg8[%c0_20, %c0_21, %c0_22] : memref<2x1x16xf32, #tpu.memory_space<vmem>>, vector<2x1x16xf32>
    %c0_23 = arith.constant 0 : index
    %c0_24 = arith.constant 0 : index
    %c0_25 = arith.constant 0 : index
    %8 = vector.load %arg9[%c0_23, %c0_24, %c0_25] : memref<2x16x32xf32, #tpu.memory_space<vmem>>, vector<2x16x32xf32>
    %c0_26 = arith.constant 0 : index
    %c0_27 = arith.constant 0 : index
    %9 = vector.load %arg10[%c0_26, %c0_27] : memref<1x32xf32, #tpu.memory_space<vmem>>, vector<1x32xf32>
    %10 = vector.shape_cast %1 : vector<4x4x32xf32> to vector<16x32xf32>
    %11 = vector.shape_cast %0 : vector<4x4x32xf32> to vector<16x32xf32>
    %12 = vector.shape_cast %0 : vector<4x4x32xf32> to vector<16x32xf32>
    %cst = arith.constant 0.000000e+00 : f32
    %13 = vector.broadcast %cst : f32 to vector<16x32xf32>
    %14 = vector.extract_strided_slice %2 {offsets = [0, 0, 0], sizes = [1, 32, 16], strides = [1, 1, 1]} : vector<2x32x16xf32> to vector<1x32x16xf32>
    %15 = vector.shape_cast %14 : vector<1x32x16xf32> to vector<32x16xf32>
    %cst_28 = arith.constant dense<0.000000e+00> : vector<16x16xf32>
    %16 = tpu.matmul %10, %15, %cst_28 {dimension_numbers = #tpu.dot_dimension_numbers<[1], [0], [0], [1], [0, 0, 1, 1], [], []>} : vector<16x32xf32>, vector<32x16xf32>, vector<16x16xf32> -> vector<16x16xf32>
    %17 = vector.extract_strided_slice %3 {offsets = [0, 0, 0], sizes = [1, 1, 16], strides = [1, 1, 1]} : vector<2x1x16xf32> to vector<1x1x16xf32>
    %18 = vector.shape_cast %17 : vector<1x1x16xf32> to vector<1x16xf32>
    %19 = vector.broadcast %18 : vector<1x16xf32> to vector<16x16xf32>
    %20 = arith.addf %16, %19 : vector<16x16xf32>
    %21 = vector.shape_cast %20 : vector<16x16xf32> to vector<4x4x16xf32>
    %22 = vector.extract_strided_slice %4 {offsets = [0, 0, 0], sizes = [1, 32, 16], strides = [1, 1, 1]} : vector<2x32x16xf32> to vector<1x32x16xf32>
    %23 = vector.shape_cast %22 : vector<1x32x16xf32> to vector<32x16xf32>
    %cst_29 = arith.constant dense<0.000000e+00> : vector<16x16xf32>
    %24 = tpu.matmul %11, %23, %cst_29 {dimension_numbers = #tpu.dot_dimension_numbers<[1], [0], [0], [1], [0, 0, 1, 1], [], []>} : vector<16x32xf32>, vector<32x16xf32>, vector<16x16xf32> -> vector<16x16xf32>
    %25 = vector.extract_strided_slice %5 {offsets = [0, 0, 0], sizes = [1, 1, 16], strides = [1, 1, 1]} : vector<2x1x16xf32> to vector<1x1x16xf32>
    %26 = vector.shape_cast %25 : vector<1x1x16xf32> to vector<1x16xf32>
    %27 = vector.broadcast %26 : vector<1x16xf32> to vector<16x16xf32>
    %28 = arith.addf %24, %27 : vector<16x16xf32>
    %29 = vector.shape_cast %28 : vector<16x16xf32> to vector<4x4x16xf32>
    %30 = vector.extract_strided_slice %6 {offsets = [0, 0, 0], sizes = [1, 32, 16], strides = [1, 1, 1]} : vector<2x32x16xf32> to vector<1x32x16xf32>
    %31 = vector.shape_cast %30 : vector<1x32x16xf32> to vector<32x16xf32>
    %cst_30 = arith.constant dense<0.000000e+00> : vector<16x16xf32>
    %32 = tpu.matmul %12, %31, %cst_30 {dimension_numbers = #tpu.dot_dimension_numbers<[1], [0], [0], [1], [0, 0, 1, 1], [], []>} : vector<16x32xf32>, vector<32x16xf32>, vector<16x16xf32> -> vector<16x16xf32>
    %33 = vector.extract_strided_slice %7 {offsets = [0, 0, 0], sizes = [1, 1, 16], strides = [1, 1, 1]} : vector<2x1x16xf32> to vector<1x1x16xf32>
    %34 = vector.shape_cast %33 : vector<1x1x16xf32> to vector<1x16xf32>
    %35 = vector.broadcast %34 : vector<1x16xf32> to vector<16x16xf32>
    %36 = arith.addf %32, %35 : vector<16x16xf32>
    %37 = vector.shape_cast %36 : vector<16x16xf32> to vector<4x4x16xf32>
    "tpu.trace_start"() <{level = 10 : i32, message = "ble,bse->bls"}> : () -> ()
    %cst_31 = arith.constant dense<0.000000e+00> : vector<4x4x4xf32>
    %38 = tpu.matmul %21, %29, %cst_31 {dimension_numbers = #tpu.dot_dimension_numbers<[2], [2], [1], [1], [0, 0, 0, 1, 1, 1], [0], [0]>} : vector<4x4x16xf32>, vector<4x4x16xf32>, vector<4x4x4xf32> -> vector<4x4x4xf32>
    "tpu.trace_stop"() : () -> ()
    %cst_32 = arith.constant 2.500000e-01 : f32
    %39 = vector.broadcast %cst_32 : f32 to vector<4x4x4xf32>
    %40 = arith.mulf %38, %39 : vector<4x4x4xf32>
    %cst_33 = arith.constant dense<0xFF800000> : vector<4x4xf32>
    %41 = vector.multi_reduction <maximumf>, %40, %cst_33 [2] : vector<4x4x4xf32> to vector<4x4xf32>
    %42 = vector.shape_cast %41 : vector<4x4xf32> to vector<4x4x1xf32>
    %43 = vector.broadcast %42 : vector<4x4x1xf32> to vector<4x4x4xf32>
    %44 = arith.subf %40, %43 : vector<4x4x4xf32>
    %45 = math.exp %44 : vector<4x4x4xf32>
    %cst_34 = arith.constant dense<0.000000e+00> : vector<4x4xf32>
    %46 = vector.multi_reduction <add>, %45, %cst_34 [2] : vector<4x4x4xf32> to vector<4x4xf32>
    %47 = vector.shape_cast %46 : vector<4x4xf32> to vector<4x4x1xf32>
    %48 = tpu.reciprocal %47 {approx = true} : vector<4x4x1xf32> -> vector<4x4x1xf32>
    %49 = vector.broadcast %48 : vector<4x4x1xf32> to vector<4x4x4xf32>
    %50 = arith.mulf %45, %49 : vector<4x4x4xf32>
    "tpu.trace_start"() <{level = 10 : i32, message = "bls,bse->ble"}> : () -> ()
    %cst_35 = arith.constant dense<0.000000e+00> : vector<4x4x16xf32>
    %51 = tpu.matmul %50, %37, %cst_35 {dimension_numbers = #tpu.dot_dimension_numbers<[2], [1], [1], [2], [0, 0, 0, 1, 1, 2], [0], [0]>} : vector<4x4x4xf32>, vector<4x4x16xf32>, vector<4x4x16xf32> -> vector<4x4x16xf32>
    "tpu.trace_stop"() : () -> ()
    %52 = vector.shape_cast %51 : vector<4x4x16xf32> to vector<16x16xf32>
    %53 = vector.extract_strided_slice %8 {offsets = [0, 0, 0], sizes = [1, 16, 32], strides = [1, 1, 1]} : vector<2x16x32xf32> to vector<1x16x32xf32>
    %54 = vector.shape_cast %53 : vector<1x16x32xf32> to vector<16x32xf32>
    %cst_36 = arith.constant dense<0.000000e+00> : vector<16x32xf32>
    %55 = tpu.matmul %52, %54, %cst_36 {dimension_numbers = #tpu.dot_dimension_numbers<[1], [0], [0], [1], [0, 0, 1, 1], [], []>} : vector<16x16xf32>, vector<16x32xf32>, vector<16x32xf32> -> vector<16x32xf32>
    %56 = arith.addf %13, %55 : vector<16x32xf32>
    %57 = vector.extract_strided_slice %2 {offsets = [1, 0, 0], sizes = [1, 32, 16], strides = [1, 1, 1]} : vector<2x32x16xf32> to vector<1x32x16xf32>
    %58 = vector.shape_cast %57 : vector<1x32x16xf32> to vector<32x16xf32>
    %cst_37 = arith.constant dense<0.000000e+00> : vector<16x16xf32>
    %59 = tpu.matmul %10, %58, %cst_37 {dimension_numbers = #tpu.dot_dimension_numbers<[1], [0], [0], [1], [0, 0, 1, 1], [], []>} : vector<16x32xf32>, vector<32x16xf32>, vector<16x16xf32> -> vector<16x16xf32>
    %60 = vector.extract_strided_slice %3 {offsets = [1, 0, 0], sizes = [1, 1, 16], strides = [1, 1, 1]} : vector<2x1x16xf32> to vector<1x1x16xf32>
    %61 = vector.shape_cast %60 : vector<1x1x16xf32> to vector<1x16xf32>
    %62 = vector.broadcast %61 : vector<1x16xf32> to vector<16x16xf32>
    %63 = arith.addf %59, %62 : vector<16x16xf32>
    %64 = vector.shape_cast %63 : vector<16x16xf32> to vector<4x4x16xf32>
    %65 = vector.extract_strided_slice %4 {offsets = [1, 0, 0], sizes = [1, 32, 16], strides = [1, 1, 1]} : vector<2x32x16xf32> to vector<1x32x16xf32>
    %66 = vector.shape_cast %65 : vector<1x32x16xf32> to vector<32x16xf32>
    %cst_38 = arith.constant dense<0.000000e+00> : vector<16x16xf32>
    %67 = tpu.matmul %11, %66, %cst_38 {dimension_numbers = #tpu.dot_dimension_numbers<[1], [0], [0], [1], [0, 0, 1, 1], [], []>} : vector<16x32xf32>, vector<32x16xf32>, vector<16x16xf32> -> vector<16x16xf32>
    %68 = vector.extract_strided_slice %5 {offsets = [1, 0, 0], sizes = [1, 1, 16], strides = [1, 1, 1]} : vector<2x1x16xf32> to vector<1x1x16xf32>
    %69 = vector.shape_cast %68 : vector<1x1x16xf32> to vector<1x16xf32>
    %70 = vector.broadcast %69 : vector<1x16xf32> to vector<16x16xf32>
    %71 = arith.addf %67, %70 : vector<16x16xf32>
    %72 = vector.shape_cast %71 : vector<16x16xf32> to vector<4x4x16xf32>
    %73 = vector.extract_strided_slice %6 {offsets = [1, 0, 0], sizes = [1, 32, 16], strides = [1, 1, 1]} : vector<2x32x16xf32> to vector<1x32x16xf32>
    %74 = vector.shape_cast %73 : vector<1x32x16xf32> to vector<32x16xf32>
    %cst_39 = arith.constant dense<0.000000e+00> : vector<16x16xf32>
    %75 = tpu.matmul %12, %74, %cst_39 {dimension_numbers = #tpu.dot_dimension_numbers<[1], [0], [0], [1], [0, 0, 1, 1], [], []>} : vector<16x32xf32>, vector<32x16xf32>, vector<16x16xf32> -> vector<16x16xf32>
    %76 = vector.extract_strided_slice %7 {offsets = [1, 0, 0], sizes = [1, 1, 16], strides = [1, 1, 1]} : vector<2x1x16xf32> to vector<1x1x16xf32>
    %77 = vector.shape_cast %76 : vector<1x1x16xf32> to vector<1x16xf32>
    %78 = vector.broadcast %77 : vector<1x16xf32> to vector<16x16xf32>
    %79 = arith.addf %75, %78 : vector<16x16xf32>
    %80 = vector.shape_cast %79 : vector<16x16xf32> to vector<4x4x16xf32>
    "tpu.trace_start"() <{level = 10 : i32, message = "ble,bse->bls"}> : () -> ()
    %cst_40 = arith.constant dense<0.000000e+00> : vector<4x4x4xf32>
    %81 = tpu.matmul %64, %72, %cst_40 {dimension_numbers = #tpu.dot_dimension_numbers<[2], [2], [1], [1], [0, 0, 0, 1, 1, 1], [0], [0]>} : vector<4x4x16xf32>, vector<4x4x16xf32>, vector<4x4x4xf32> -> vector<4x4x4xf32>
    "tpu.trace_stop"() : () -> ()
    %cst_41 = arith.constant 2.500000e-01 : f32
    %82 = vector.broadcast %cst_41 : f32 to vector<4x4x4xf32>
    %83 = arith.mulf %81, %82 : vector<4x4x4xf32>
    %cst_42 = arith.constant dense<0xFF800000> : vector<4x4xf32>
    %84 = vector.multi_reduction <maximumf>, %83, %cst_42 [2] : vector<4x4x4xf32> to vector<4x4xf32>
    %85 = vector.shape_cast %84 : vector<4x4xf32> to vector<4x4x1xf32>
    %86 = vector.broadcast %85 : vector<4x4x1xf32> to vector<4x4x4xf32>
    %87 = arith.subf %83, %86 : vector<4x4x4xf32>
    %88 = math.exp %87 : vector<4x4x4xf32>
    %cst_43 = arith.constant dense<0.000000e+00> : vector<4x4xf32>
    %89 = vector.multi_reduction <add>, %88, %cst_43 [2] : vector<4x4x4xf32> to vector<4x4xf32>
    %90 = vector.shape_cast %89 : vector<4x4xf32> to vector<4x4x1xf32>
    %91 = tpu.reciprocal %90 {approx = true} : vector<4x4x1xf32> -> vector<4x4x1xf32>
    %92 = vector.broadcast %91 : vector<4x4x1xf32> to vector<4x4x4xf32>
    %93 = arith.mulf %88, %92 : vector<4x4x4xf32>
    "tpu.trace_start"() <{level = 10 : i32, message = "bls,bse->ble"}> : () -> ()
    %cst_44 = arith.constant dense<0.000000e+00> : vector<4x4x16xf32>
    %94 = tpu.matmul %93, %80, %cst_44 {dimension_numbers = #tpu.dot_dimension_numbers<[2], [1], [1], [2], [0, 0, 0, 1, 1, 2], [0], [0]>} : vector<4x4x4xf32>, vector<4x4x16xf32>, vector<4x4x16xf32> -> vector<4x4x16xf32>
    "tpu.trace_stop"() : () -> ()
    %95 = vector.shape_cast %94 : vector<4x4x16xf32> to vector<16x16xf32>
    %96 = vector.extract_strided_slice %8 {offsets = [1, 0, 0], sizes = [1, 16, 32], strides = [1, 1, 1]} : vector<2x16x32xf32> to vector<1x16x32xf32>
    %97 = vector.shape_cast %96 : vector<1x16x32xf32> to vector<16x32xf32>
    %cst_45 = arith.constant dense<0.000000e+00> : vector<16x32xf32>
    %98 = tpu.matmul %95, %97, %cst_45 {dimension_numbers = #tpu.dot_dimension_numbers<[1], [0], [0], [1], [0, 0, 1, 1], [], []>} : vector<16x16xf32>, vector<16x32xf32>, vector<16x32xf32> -> vector<16x32xf32>
    %99 = arith.addf %56, %98 : vector<16x32xf32>
    %100 = vector.broadcast %9 : vector<1x32xf32> to vector<16x32xf32>
    %101 = arith.addf %99, %100 : vector<16x32xf32>
    %102 = vector.shape_cast %101 : vector<16x32xf32> to vector<4x4x32xf32>
    %c0_46 = arith.constant 0 : index
    %c0_47 = arith.constant 0 : index
    %c0_48 = arith.constant 0 : index
    %103 = vector.load %arg11[%c0_46, %c0_47, %c0_48] : memref<2x32x16xf32, #tpu.memory_space<vmem>>, vector<2x32x16xf32>
    %c0_49 = arith.constant 0 : index
    %c0_50 = arith.constant 0 : index
    %c0_51 = arith.constant 0 : index
    %104 = vector.load %arg12[%c0_49, %c0_50, %c0_51] : memref<2x1x16xf32, #tpu.memory_space<vmem>>, vector<2x1x16xf32>
    %c0_52 = arith.constant 0 : index
    %c0_53 = arith.constant 0 : index
    %c0_54 = arith.constant 0 : index
    %105 = vector.load %arg13[%c0_52, %c0_53, %c0_54] : memref<2x32x16xf32, #tpu.memory_space<vmem>>, vector<2x32x16xf32>
    %c0_55 = arith.constant 0 : index
    %c0_56 = arith.constant 0 : index
    %c0_57 = arith.constant 0 : index
    %106 = vector.load %arg14[%c0_55, %c0_56, %c0_57] : memref<2x1x16xf32, #tpu.memory_space<vmem>>, vector<2x1x16xf32>
    %c0_58 = arith.constant 0 : index
    %c0_59 = arith.constant 0 : index
    %c0_60 = arith.constant 0 : index
    %107 = vector.load %arg15[%c0_58, %c0_59, %c0_60] : memref<2x32x16xf32, #tpu.memory_space<vmem>>, vector<2x32x16xf32>
    %c0_61 = arith.constant 0 : index
    %c0_62 = arith.constant 0 : index
    %c0_63 = arith.constant 0 : index
    %108 = vector.load %arg16[%c0_61, %c0_62, %c0_63] : memref<2x1x16xf32, #tpu.memory_space<vmem>>, vector<2x1x16xf32>
    %c0_64 = arith.constant 0 : index
    %c0_65 = arith.constant 0 : index
    %c0_66 = arith.constant 0 : index
    %109 = vector.load %arg17[%c0_64, %c0_65, %c0_66] : memref<2x16x32xf32, #tpu.memory_space<vmem>>, vector<2x16x32xf32>
    %c0_67 = arith.constant 0 : index
    %c0_68 = arith.constant 0 : index
    %110 = vector.load %arg18[%c0_67, %c0_68] : memref<1x32xf32, #tpu.memory_space<vmem>>, vector<1x32xf32>
    %111 = vector.shape_cast %0 : vector<4x4x32xf32> to vector<16x32xf32>
    %112 = vector.shape_cast %102 : vector<4x4x32xf32> to vector<16x32xf32>
    %113 = vector.shape_cast %102 : vector<4x4x32xf32> to vector<16x32xf32>
    %cst_69 = arith.constant 0.000000e+00 : f32
    %114 = vector.broadcast %cst_69 : f32 to vector<16x32xf32>
    %115 = vector.extract_strided_slice %103 {offsets = [0, 0, 0], sizes = [1, 32, 16], strides = [1, 1, 1]} : vector<2x32x16xf32> to vector<1x32x16xf32>
    %116 = vector.shape_cast %115 : vector<1x32x16xf32> to vector<32x16xf32>
    %cst_70 = arith.constant dense<0.000000e+00> : vector<16x16xf32>
    %117 = tpu.matmul %111, %116, %cst_70 {dimension_numbers = #tpu.dot_dimension_numbers<[1], [0], [0], [1], [0, 0, 1, 1], [], []>} : vector<16x32xf32>, vector<32x16xf32>, vector<16x16xf32> -> vector<16x16xf32>
    %118 = vector.extract_strided_slice %104 {offsets = [0, 0, 0], sizes = [1, 1, 16], strides = [1, 1, 1]} : vector<2x1x16xf32> to vector<1x1x16xf32>
    %119 = vector.shape_cast %118 : vector<1x1x16xf32> to vector<1x16xf32>
    %120 = vector.broadcast %119 : vector<1x16xf32> to vector<16x16xf32>
    %121 = arith.addf %117, %120 : vector<16x16xf32>
    %122 = vector.shape_cast %121 : vector<16x16xf32> to vector<4x4x16xf32>
    %123 = vector.extract_strided_slice %105 {offsets = [0, 0, 0], sizes = [1, 32, 16], strides = [1, 1, 1]} : vector<2x32x16xf32> to vector<1x32x16xf32>
    %124 = vector.shape_cast %123 : vector<1x32x16xf32> to vector<32x16xf32>
    %cst_71 = arith.constant dense<0.000000e+00> : vector<16x16xf32>
    %125 = tpu.matmul %112, %124, %cst_71 {dimension_numbers = #tpu.dot_dimension_numbers<[1], [0], [0], [1], [0, 0, 1, 1], [], []>} : vector<16x32xf32>, vector<32x16xf32>, vector<16x16xf32> -> vector<16x16xf32>
    %126 = vector.extract_strided_slice %106 {offsets = [0, 0, 0], sizes = [1, 1, 16], strides = [1, 1, 1]} : vector<2x1x16xf32> to vector<1x1x16xf32>
    %127 = vector.shape_cast %126 : vector<1x1x16xf32> to vector<1x16xf32>
    %128 = vector.broadcast %127 : vector<1x16xf32> to vector<16x16xf32>
    %129 = arith.addf %125, %128 : vector<16x16xf32>
    %130 = vector.shape_cast %129 : vector<16x16xf32> to vector<4x4x16xf32>
    %131 = vector.extract_strided_slice %107 {offsets = [0, 0, 0], sizes = [1, 32, 16], strides = [1, 1, 1]} : vector<2x32x16xf32> to vector<1x32x16xf32>
    %132 = vector.shape_cast %131 : vector<1x32x16xf32> to vector<32x16xf32>
    %cst_72 = arith.constant dense<0.000000e+00> : vector<16x16xf32>
    %133 = tpu.matmul %113, %132, %cst_72 {dimension_numbers = #tpu.dot_dimension_numbers<[1], [0], [0], [1], [0, 0, 1, 1], [], []>} : vector<16x32xf32>, vector<32x16xf32>, vector<16x16xf32> -> vector<16x16xf32>
    %134 = vector.extract_strided_slice %108 {offsets = [0, 0, 0], sizes = [1, 1, 16], strides = [1, 1, 1]} : vector<2x1x16xf32> to vector<1x1x16xf32>
    %135 = vector.shape_cast %134 : vector<1x1x16xf32> to vector<1x16xf32>
    %136 = vector.broadcast %135 : vector<1x16xf32> to vector<16x16xf32>
    %137 = arith.addf %133, %136 : vector<16x16xf32>
    %138 = vector.shape_cast %137 : vector<16x16xf32> to vector<4x4x16xf32>
    "tpu.trace_start"() <{level = 10 : i32, message = "ble,bse->bls"}> : () -> ()
    %cst_73 = arith.constant dense<0.000000e+00> : vector<4x4x4xf32>
    %139 = tpu.matmul %122, %130, %cst_73 {dimension_numbers = #tpu.dot_dimension_numbers<[2], [2], [1], [1], [0, 0, 0, 1, 1, 1], [0], [0]>} : vector<4x4x16xf32>, vector<4x4x16xf32>, vector<4x4x4xf32> -> vector<4x4x4xf32>
    "tpu.trace_stop"() : () -> ()
    %cst_74 = arith.constant 2.500000e-01 : f32
    %140 = vector.broadcast %cst_74 : f32 to vector<4x4x4xf32>
    %141 = arith.mulf %139, %140 : vector<4x4x4xf32>
    %cst_75 = arith.constant dense<0xFF800000> : vector<4x4xf32>
    %142 = vector.multi_reduction <maximumf>, %141, %cst_75 [2] : vector<4x4x4xf32> to vector<4x4xf32>
    %143 = vector.shape_cast %142 : vector<4x4xf32> to vector<4x4x1xf32>
    %144 = vector.broadcast %143 : vector<4x4x1xf32> to vector<4x4x4xf32>
    %145 = arith.subf %141, %144 : vector<4x4x4xf32>
    %146 = math.exp %145 : vector<4x4x4xf32>
    %cst_76 = arith.constant dense<0.000000e+00> : vector<4x4xf32>
    %147 = vector.multi_reduction <add>, %146, %cst_76 [2] : vector<4x4x4xf32> to vector<4x4xf32>
    %148 = vector.shape_cast %147 : vector<4x4xf32> to vector<4x4x1xf32>
    %149 = tpu.reciprocal %148 {approx = true} : vector<4x4x1xf32> -> vector<4x4x1xf32>
    %150 = vector.broadcast %149 : vector<4x4x1xf32> to vector<4x4x4xf32>
    %151 = arith.mulf %146, %150 : vector<4x4x4xf32>
    "tpu.trace_start"() <{level = 10 : i32, message = "bls,bse->ble"}> : () -> ()
    %cst_77 = arith.constant dense<0.000000e+00> : vector<4x4x16xf32>
    %152 = tpu.matmul %151, %138, %cst_77 {dimension_numbers = #tpu.dot_dimension_numbers<[2], [1], [1], [2], [0, 0, 0, 1, 1, 2], [0], [0]>} : vector<4x4x4xf32>, vector<4x4x16xf32>, vector<4x4x16xf32> -> vector<4x4x16xf32>
    "tpu.trace_stop"() : () -> ()
    %153 = vector.shape_cast %152 : vector<4x4x16xf32> to vector<16x16xf32>
    %154 = vector.extract_strided_slice %109 {offsets = [0, 0, 0], sizes = [1, 16, 32], strides = [1, 1, 1]} : vector<2x16x32xf32> to vector<1x16x32xf32>
    %155 = vector.shape_cast %154 : vector<1x16x32xf32> to vector<16x32xf32>
    %cst_78 = arith.constant dense<0.000000e+00> : vector<16x32xf32>
    %156 = tpu.matmul %153, %155, %cst_78 {dimension_numbers = #tpu.dot_dimension_numbers<[1], [0], [0], [1], [0, 0, 1, 1], [], []>} : vector<16x16xf32>, vector<16x32xf32>, vector<16x32xf32> -> vector<16x32xf32>
    %157 = arith.addf %114, %156 : vector<16x32xf32>
    %158 = vector.extract_strided_slice %103 {offsets = [1, 0, 0], sizes = [1, 32, 16], strides = [1, 1, 1]} : vector<2x32x16xf32> to vector<1x32x16xf32>
    %159 = vector.shape_cast %158 : vector<1x32x16xf32> to vector<32x16xf32>
    %cst_79 = arith.constant dense<0.000000e+00> : vector<16x16xf32>
    %160 = tpu.matmul %111, %159, %cst_79 {dimension_numbers = #tpu.dot_dimension_numbers<[1], [0], [0], [1], [0, 0, 1, 1], [], []>} : vector<16x32xf32>, vector<32x16xf32>, vector<16x16xf32> -> vector<16x16xf32>
    %161 = vector.extract_strided_slice %104 {offsets = [1, 0, 0], sizes = [1, 1, 16], strides = [1, 1, 1]} : vector<2x1x16xf32> to vector<1x1x16xf32>
    %162 = vector.shape_cast %161 : vector<1x1x16xf32> to vector<1x16xf32>
    %163 = vector.broadcast %162 : vector<1x16xf32> to vector<16x16xf32>
    %164 = arith.addf %160, %163 : vector<16x16xf32>
    %165 = vector.shape_cast %164 : vector<16x16xf32> to vector<4x4x16xf32>
    %166 = vector.extract_strided_slice %105 {offsets = [1, 0, 0], sizes = [1, 32, 16], strides = [1, 1, 1]} : vector<2x32x16xf32> to vector<1x32x16xf32>
    %167 = vector.shape_cast %166 : vector<1x32x16xf32> to vector<32x16xf32>
    %cst_80 = arith.constant dense<0.000000e+00> : vector<16x16xf32>
    %168 = tpu.matmul %112, %167, %cst_80 {dimension_numbers = #tpu.dot_dimension_numbers<[1], [0], [0], [1], [0, 0, 1, 1], [], []>} : vector<16x32xf32>, vector<32x16xf32>, vector<16x16xf32> -> vector<16x16xf32>
    %169 = vector.extract_strided_slice %106 {offsets = [1, 0, 0], sizes = [1, 1, 16], strides = [1, 1, 1]} : vector<2x1x16xf32> to vector<1x1x16xf32>
    %170 = vector.shape_cast %169 : vector<1x1x16xf32> to vector<1x16xf32>
    %171 = vector.broadcast %170 : vector<1x16xf32> to vector<16x16xf32>
    %172 = arith.addf %168, %171 : vector<16x16xf32>
    %173 = vector.shape_cast %172 : vector<16x16xf32> to vector<4x4x16xf32>
    %174 = vector.extract_strided_slice %107 {offsets = [1, 0, 0], sizes = [1, 32, 16], strides = [1, 1, 1]} : vector<2x32x16xf32> to vector<1x32x16xf32>
    %175 = vector.shape_cast %174 : vector<1x32x16xf32> to vector<32x16xf32>
    %cst_81 = arith.constant dense<0.000000e+00> : vector<16x16xf32>
    %176 = tpu.matmul %113, %175, %cst_81 {dimension_numbers = #tpu.dot_dimension_numbers<[1], [0], [0], [1], [0, 0, 1, 1], [], []>} : vector<16x32xf32>, vector<32x16xf32>, vector<16x16xf32> -> vector<16x16xf32>
    %177 = vector.extract_strided_slice %108 {offsets = [1, 0, 0], sizes = [1, 1, 16], strides = [1, 1, 1]} : vector<2x1x16xf32> to vector<1x1x16xf32>
    %178 = vector.shape_cast %177 : vector<1x1x16xf32> to vector<1x16xf32>
    %179 = vector.broadcast %178 : vector<1x16xf32> to vector<16x16xf32>
    %180 = arith.addf %176, %179 : vector<16x16xf32>
    %181 = vector.shape_cast %180 : vector<16x16xf32> to vector<4x4x16xf32>
    "tpu.trace_start"() <{level = 10 : i32, message = "ble,bse->bls"}> : () -> ()
    %cst_82 = arith.constant dense<0.000000e+00> : vector<4x4x4xf32>
    %182 = tpu.matmul %165, %173, %cst_82 {dimension_numbers = #tpu.dot_dimension_numbers<[2], [2], [1], [1], [0, 0, 0, 1, 1, 1], [0], [0]>} : vector<4x4x16xf32>, vector<4x4x16xf32>, vector<4x4x4xf32> -> vector<4x4x4xf32>
    "tpu.trace_stop"() : () -> ()
    %cst_83 = arith.constant 2.500000e-01 : f32
    %183 = vector.broadcast %cst_83 : f32 to vector<4x4x4xf32>
    %184 = arith.mulf %182, %183 : vector<4x4x4xf32>
    %cst_84 = arith.constant dense<0xFF800000> : vector<4x4xf32>
    %185 = vector.multi_reduction <maximumf>, %184, %cst_84 [2] : vector<4x4x4xf32> to vector<4x4xf32>
    %186 = vector.shape_cast %185 : vector<4x4xf32> to vector<4x4x1xf32>
    %187 = vector.broadcast %186 : vector<4x4x1xf32> to vector<4x4x4xf32>
    %188 = arith.subf %184, %187 : vector<4x4x4xf32>
    %189 = math.exp %188 : vector<4x4x4xf32>
    %cst_85 = arith.constant dense<0.000000e+00> : vector<4x4xf32>
    %190 = vector.multi_reduction <add>, %189, %cst_85 [2] : vector<4x4x4xf32> to vector<4x4xf32>
    %191 = vector.shape_cast %190 : vector<4x4xf32> to vector<4x4x1xf32>
    %192 = tpu.reciprocal %191 {approx = true} : vector<4x4x1xf32> -> vector<4x4x1xf32>
    %193 = vector.broadcast %192 : vector<4x4x1xf32> to vector<4x4x4xf32>
    %194 = arith.mulf %189, %193 : vector<4x4x4xf32>
    "tpu.trace_start"() <{level = 10 : i32, message = "bls,bse->ble"}> : () -> ()
    %cst_86 = arith.constant dense<0.000000e+00> : vector<4x4x16xf32>
    %195 = tpu.matmul %194, %181, %cst_86 {dimension_numbers = #tpu.dot_dimension_numbers<[2], [1], [1], [2], [0, 0, 0, 1, 1, 2], [0], [0]>} : vector<4x4x4xf32>, vector<4x4x16xf32>, vector<4x4x16xf32> -> vector<4x4x16xf32>
    "tpu.trace_stop"() : () -> ()
    %196 = vector.shape_cast %195 : vector<4x4x16xf32> to vector<16x16xf32>
    %197 = vector.extract_strided_slice %109 {offsets = [1, 0, 0], sizes = [1, 16, 32], strides = [1, 1, 1]} : vector<2x16x32xf32> to vector<1x16x32xf32>
    %198 = vector.shape_cast %197 : vector<1x16x32xf32> to vector<16x32xf32>
    %cst_87 = arith.constant dense<0.000000e+00> : vector<16x32xf32>
    %199 = tpu.matmul %196, %198, %cst_87 {dimension_numbers = #tpu.dot_dimension_numbers<[1], [0], [0], [1], [0, 0, 1, 1], [], []>} : vector<16x16xf32>, vector<16x32xf32>, vector<16x32xf32> -> vector<16x32xf32>
    %200 = arith.addf %157, %199 : vector<16x32xf32>
    %201 = vector.broadcast %110 : vector<1x32xf32> to vector<16x32xf32>
    %202 = arith.addf %200, %201 : vector<16x32xf32>
    %203 = vector.shape_cast %202 : vector<16x32xf32> to vector<4x4x32xf32>
    %204 = arith.addf %0, %203 : vector<4x4x32xf32>
    %205 = vector.shape_cast %204 : vector<4x4x32xf32> to vector<16x32xf32>
    %c0_88 = arith.constant 0 : index
    %c0_89 = arith.constant 0 : index
    %206 = vector.load %arg19[%c0_88, %c0_89] : memref<1x32xf32, #tpu.memory_space<vmem>>, vector<1x32xf32>
    %c0_90 = arith.constant 0 : index
    %c0_91 = arith.constant 0 : index
    %207 = vector.load %arg20[%c0_90, %c0_91] : memref<1x32xf32, #tpu.memory_space<vmem>>, vector<1x32xf32>
    %cst_92 = arith.constant dense<0.000000e+00> : vector<16xf32>
    %208 = vector.multi_reduction <add>, %205, %cst_92 [1] : vector<16x32xf32> to vector<16xf32>
    %209 = vector.shape_cast %208 : vector<16xf32> to vector<16x1xf32>
    %cst_93 = arith.constant 3.200000e+01 : f32
    %210 = vector.broadcast %cst_93 : f32 to vector<16x1xf32>
    %211 = arith.divf %209, %210 : vector<16x1xf32>
    %212 = vector.broadcast %211 : vector<16x1xf32> to vector<16x32xf32>
    %213 = arith.subf %205, %212 : vector<16x32xf32>
    %214 = arith.mulf %213, %213 : vector<16x32xf32>
    %cst_94 = arith.constant dense<0.000000e+00> : vector<16xf32>
    %215 = vector.multi_reduction <add>, %214, %cst_94 [1] : vector<16x32xf32> to vector<16xf32>
    %216 = vector.shape_cast %215 : vector<16xf32> to vector<16x1xf32>
    %cst_95 = arith.constant 3.200000e+01 : f32
    %217 = vector.broadcast %cst_95 : f32 to vector<16x1xf32>
    %218 = arith.divf %216, %217 : vector<16x1xf32>
    %cst_96 = arith.constant 9.99999974E-6 : f32
    %219 = vector.broadcast %cst_96 : f32 to vector<16x1xf32>
    %220 = arith.addf %218, %219 : vector<16x1xf32>
    %221 = math.rsqrt %220 : vector<16x1xf32>
    %222 = vector.broadcast %221 : vector<16x1xf32> to vector<16x32xf32>
    %223 = arith.mulf %213, %222 : vector<16x32xf32>
    %224 = vector.broadcast %206 : vector<1x32xf32> to vector<16x32xf32>
    %225 = arith.mulf %223, %224 : vector<16x32xf32>
    %226 = vector.broadcast %207 : vector<1x32xf32> to vector<16x32xf32>
    %227 = arith.addf %225, %226 : vector<16x32xf32>
    %c0_97 = arith.constant 0 : index
    %c0_98 = arith.constant 0 : index
    %228 = vector.load %arg21[%c0_97, %c0_98] : memref<32x64xf32, #tpu.memory_space<vmem>>, vector<32x64xf32>
    %c0_99 = arith.constant 0 : index
    %c0_100 = arith.constant 0 : index
    %229 = vector.load %arg22[%c0_99, %c0_100] : memref<1x64xf32, #tpu.memory_space<vmem>>, vector<1x64xf32>
    %c0_101 = arith.constant 0 : index
    %c0_102 = arith.constant 0 : index
    %230 = vector.load %arg23[%c0_101, %c0_102] : memref<64x32xf32, #tpu.memory_space<vmem>>, vector<64x32xf32>
    %c0_103 = arith.constant 0 : index
    %c0_104 = arith.constant 0 : index
    %231 = vector.load %arg24[%c0_103, %c0_104] : memref<1x32xf32, #tpu.memory_space<vmem>>, vector<1x32xf32>
    %cst_105 = arith.constant dense<0.000000e+00> : vector<16x64xf32>
    %232 = tpu.matmul %227, %228, %cst_105 {dimension_numbers = #tpu.dot_dimension_numbers<[1], [0], [0], [1], [0, 0, 1, 1], [], []>} : vector<16x32xf32>, vector<32x64xf32>, vector<16x64xf32> -> vector<16x64xf32>
    %233 = vector.broadcast %229 : vector<1x64xf32> to vector<16x64xf32>
    %234 = arith.addf %232, %233 : vector<16x64xf32>
    %cst_106 = arith.constant 5.000000e-01 : f32
    %235 = vector.broadcast %cst_106 : f32 to vector<16x64xf32>
    %236 = arith.mulf %235, %234 : vector<16x64xf32>
    %cst_107 = arith.constant 0.707106769 : f32
    %237 = vector.broadcast %cst_107 : f32 to vector<16x64xf32>
    %238 = arith.mulf %234, %237 : vector<16x64xf32>
    %239 = math.erf %238 : vector<16x64xf32>
    %cst_108 = arith.constant 1.000000e+00 : f32
    %240 = vector.broadcast %cst_108 : f32 to vector<16x64xf32>
    %241 = arith.addf %240, %239 : vector<16x64xf32>
    %242 = arith.mulf %236, %241 : vector<16x64xf32>
    %cst_109 = arith.constant dense<0.000000e+00> : vector<16x32xf32>
    %243 = tpu.matmul %242, %230, %cst_109 {dimension_numbers = #tpu.dot_dimension_numbers<[1], [0], [0], [1], [0, 0, 1, 1], [], []>} : vector<16x64xf32>, vector<64x32xf32>, vector<16x32xf32> -> vector<16x32xf32>
    %244 = vector.broadcast %231 : vector<1x32xf32> to vector<16x32xf32>
    %245 = arith.addf %243, %244 : vector<16x32xf32>
    %246 = arith.addf %227, %245 : vector<16x32xf32>
    %c0_110 = arith.constant 0 : index
    %c0_111 = arith.constant 0 : index
    %247 = vector.load %arg25[%c0_110, %c0_111] : memref<1x32xf32, #tpu.memory_space<vmem>>, vector<1x32xf32>
    %c0_112 = arith.constant 0 : index
    %c0_113 = arith.constant 0 : index
    %248 = vector.load %arg26[%c0_112, %c0_113] : memref<1x32xf32, #tpu.memory_space<vmem>>, vector<1x32xf32>
    %cst_114 = arith.constant dense<0.000000e+00> : vector<16xf32>
    %249 = vector.multi_reduction <add>, %246, %cst_114 [1] : vector<16x32xf32> to vector<16xf32>
    %250 = vector.shape_cast %249 : vector<16xf32> to vector<16x1xf32>
    %cst_115 = arith.constant 3.200000e+01 : f32
    %251 = vector.broadcast %cst_115 : f32 to vector<16x1xf32>
    %252 = arith.divf %250, %251 : vector<16x1xf32>
    %253 = vector.broadcast %252 : vector<16x1xf32> to vector<16x32xf32>
    %254 = arith.subf %246, %253 : vector<16x32xf32>
    %255 = arith.mulf %254, %254 : vector<16x32xf32>
    %cst_116 = arith.constant dense<0.000000e+00> : vector<16xf32>
    %256 = vector.multi_reduction <add>, %255, %cst_116 [1] : vector<16x32xf32> to vector<16xf32>
    %257 = vector.shape_cast %256 : vector<16xf32> to vector<16x1xf32>
    %cst_117 = arith.constant 3.200000e+01 : f32
    %258 = vector.broadcast %cst_117 : f32 to vector<16x1xf32>
    %259 = arith.divf %257, %258 : vector<16x1xf32>
    %cst_118 = arith.constant 9.99999974E-6 : f32
    %260 = vector.broadcast %cst_118 : f32 to vector<16x1xf32>
    %261 = arith.addf %259, %260 : vector<16x1xf32>
    %262 = math.rsqrt %261 : vector<16x1xf32>
    %263 = vector.broadcast %262 : vector<16x1xf32> to vector<16x32xf32>
    %264 = arith.mulf %254, %263 : vector<16x32xf32>
    %265 = vector.broadcast %247 : vector<1x32xf32> to vector<16x32xf32>
    %266 = arith.mulf %264, %265 : vector<16x32xf32>
    %267 = vector.broadcast %248 : vector<1x32xf32> to vector<16x32xf32>
    %268 = arith.addf %266, %267 : vector<16x32xf32>
    %269 = vector.shape_cast %268 : vector<16x32xf32> to vector<4x4x32xf32>
    %c0_119 = arith.constant 0 : index
    %c0_120 = arith.constant 0 : index
    %c0_121 = arith.constant 0 : index
    %270 = vector.load %arg27[%c0_119, %c0_120, %c0_121] : memref<4x4x32xf32, #tpu.memory_space<vmem>>, vector<4x4x32xf32>
    tpu.vector_store %arg27[%c0_119, %c0_120, %c0_121], %269 {strides = array<i32>} : memref<4x4x32xf32, #tpu.memory_space<vmem>>, vector<4x4x32xf32>,
    return
  }
  func.func @transform_0(%arg0: i32) -> (i32, i32, i32) {
    %c0_i32 = arith.constant 0 : i32
    %c0_i32_0 = arith.constant 0 : i32
    %c0_i32_1 = arith.constant 0 : i32
    return %arg0, %c0_i32, %c0_i32_0 : i32, i32, i32
  }
  func.func @transform_1(%arg0: i32) -> (i32, i32, i32) {
    %c0_i32 = arith.constant 0 : i32
    %c0_i32_0 = arith.constant 0 : i32
    %c0_i32_1 = arith.constant 0 : i32
    %c0_i32_2 = arith.constant 0 : i32
    return %c0_i32, %c0_i32_0, %c0_i32_1 : i32, i32, i32
  }
  func.func @transform_2(%arg0: i32) -> (i32, i32, i32) {
    %c0_i32 = arith.constant 0 : i32
    %c0_i32_0 = arith.constant 0 : i32
    %c0_i32_1 = arith.constant 0 : i32
    %c0_i32_2 = arith.constant 0 : i32
    return %c0_i32, %c0_i32_0, %c0_i32_1 : i32, i32, i32
  }
  func.func @transform_3(%arg0: i32) -> (i32, i32, i32) {
    %c0_i32 = arith.constant 0 : i32
    %c0_i32_0 = arith.constant 0 : i32
    %c0_i32_1 = arith.constant 0 : i32
    %c0_i32_2 = arith.constant 0 : i32
    return %c0_i32, %c0_i32_0, %c0_i32_1 : i32, i32, i32
  }
  func.func @transform_4(%arg0: i32) -> (i32, i32, i32) {
    %c0_i32 = arith.constant 0 : i32
    %c0_i32_0 = arith.constant 0 : i32
    %c0_i32_1 = arith.constant 0 : i32
    %c0_i32_2 = arith.constant 0 : i32
    return %c0_i32, %c0_i32_0, %c0_i32_1 : i32, i32, i32
  }
  func.func @transform_5(%arg0: i32) -> (i32, i32, i32) {
    %c0_i32 = arith.constant 0 : i32
    %c0_i32_0 = arith.constant 0 : i32
    %c0_i32_1 = arith.constant 0 : i32
    %c0_i32_2 = arith.constant 0 : i32
    return %c0_i32, %c0_i32_0, %c0_i32_1 : i32, i32, i32
  }
  func.func @transform_6(%arg0: i32) -> (i32, i32, i32) {
    %c0_i32 = arith.constant 0 : i32
    %c0_i32_0 = arith.constant 0 : i32
    %c0_i32_1 = arith.constant 0 : i32
    %c0_i32_2 = arith.constant 0 : i32
    return %c0_i32, %c0_i32_0, %c0_i32_1 : i32, i32, i32
  }
  func.func @transform_7(%arg0: i32) -> (i32, i32, i32) {
    %c0_i32 = arith.constant 0 : i32
    %c0_i32_0 = arith.constant 0 : i32
    %c0_i32_1 = arith.constant 0 : i32
    %c0_i32_2 = arith.constant 0 : i32
    return %c0_i32, %c0_i32_0, %c0_i32_1 : i32, i32, i32
  }
  func.func @transform_8(%arg0: i32) -> (i32, i32, i32) {
    %c0_i32 = arith.constant 0 : i32
    %c0_i32_0 = arith.constant 0 : i32
    %c0_i32_1 = arith.constant 0 : i32
    %c0_i32_2 = arith.constant 0 : i32
    return %c0_i32, %c0_i32_0, %c0_i32_1 : i32, i32, i32
  }
  func.func @transform_9(%arg0: i32) -> (i32, i32) {
    %c0_i32 = arith.constant 0 : i32
    %c0_i32_0 = arith.constant 0 : i32
    %c0_i32_1 = arith.constant 0 : i32
    return %c0_i32, %c0_i32_0 : i32, i32
  }
  func.func @transform_10(%arg0: i32) -> (i32, i32, i32) {
    %c0_i32 = arith.constant 0 : i32
    %c0_i32_0 = arith.constant 0 : i32
    %c0_i32_1 = arith.constant 0 : i32
    %c0_i32_2 = arith.constant 0 : i32
    return %c0_i32, %c0_i32_0, %c0_i32_1 : i32, i32, i32
  }
  func.func @transform_11(%arg0: i32) -> (i32, i32, i32) {
    %c0_i32 = arith.constant 0 : i32
    %c0_i32_0 = arith.constant 0 : i32
    %c0_i32_1 = arith.constant 0 : i32
    %c0_i32_2 = arith.constant 0 : i32
    return %c0_i32, %c0_i32_0, %c0_i32_1 : i32, i32, i32
  }
  func.func @transform_12(%arg0: i32) -> (i32, i32, i32) {
    %c0_i32 = arith.constant 0 : i32
    %c0_i32_0 = arith.constant 0 : i32
    %c0_i32_1 = arith.constant 0 : i32
    %c0_i32_2 = arith.constant 0 : i32
    return %c0_i32, %c0_i32_0, %c0_i32_1 : i32, i32, i32
  }
  func.func @transform_13(%arg0: i32) -> (i32, i32, i32) {
    %c0_i32 = arith.constant 0 : i32
    %c0_i32_0 = arith.constant 0 : i32
    %c0_i32_1 = arith.constant 0 : i32
    %c0_i32_2 = arith.constant 0 : i32
    return %c0_i32, %c0_i32_0, %c0_i32_1 : i32, i32, i32
  }
  func.func @transform_14(%arg0: i32) -> (i32, i32, i32) {
    %c0_i32 = arith.constant 0 : i32
    %c0_i32_0 = arith.constant 0 : i32
    %c0_i32_1 = arith.constant 0 : i32
    %c0_i32_2 = arith.constant 0 : i32
    return %c0_i32, %c0_i32_0, %c0_i32_1 : i32, i32, i32
  }
  func.func @transform_15(%arg0: i32) -> (i32, i32, i32) {
    %c0_i32 = arith.constant 0 : i32
    %c0_i32_0 = arith.constant 0 : i32
    %c0_i32_1 = arith.constant 0 : i32
    %c0_i32_2 = arith.constant 0 : i32
    return %c0_i32, %c0_i32_0, %c0_i32_1 : i32, i32, i32
  }
  func.func @transform_16(%arg0: i32) -> (i32, i32, i32) {
    %c0_i32 = arith.constant 0 : i32
    %c0_i32_0 = arith.constant 0 : i32
    %c0_i32_1 = arith.constant 0 : i32
    %c0_i32_2 = arith.constant 0 : i32
    return %c0_i32, %c0_i32_0, %c0_i32_1 : i32, i32, i32
  }
  func.func @transform_17(%arg0: i32) -> (i32, i32) {
    %c0_i32 = arith.constant 0 : i32
    %c0_i32_0 = arith.constant 0 : i32
    %c0_i32_1 = arith.constant 0 : i32
    return %c0_i32, %c0_i32_0 : i32, i32
  }
  func.func @transform_18(%arg0: i32) -> (i32, i32) {
    %c0_i32 = arith.constant 0 : i32
    %c0_i32_0 = arith.constant 0 : i32
    %c0_i32_1 = arith.constant 0 : i32
    return %c0_i32, %c0_i32_0 : i32, i32
  }
  func.func @transform_19(%arg0: i32) -> (i32, i32) {
    %c0_i32 = arith.constant 0 : i32
    %c0_i32_0 = arith.constant 0 : i32
    %c0_i32_1 = arith.constant 0 : i32
    return %c0_i32, %c0_i32_0 : i32, i32
  }
  func.func @transform_20(%arg0: i32) -> (i32, i32) {
    %c0_i32 = arith.constant 0 : i32
    %c0_i32_0 = arith.constant 0 : i32
    %c0_i32_1 = arith.constant 0 : i32
    return %c0_i32, %c0_i32_0 : i32, i32
  }
  func.func @transform_21(%arg0: i32) -> (i32, i32) {
    %c0_i32 = arith.constant 0 : i32
    %c0_i32_0 = arith.constant 0 : i32
    %c0_i32_1 = arith.constant 0 : i32
    return %c0_i32, %c0_i32_0 : i32, i32
  }
  func.func @transform_22(%arg0: i32) -> (i32, i32) {
    %c0_i32 = arith.constant 0 : i32
    %c0_i32_0 = arith.constant 0 : i32
    %c0_i32_1 = arith.constant 0 : i32
    return %c0_i32, %c0_i32_0 : i32, i32
  }
  func.func @transform_23(%arg0: i32) -> (i32, i32) {
    %c0_i32 = arith.constant 0 : i32
    %c0_i32_0 = arith.constant 0 : i32
    %c0_i32_1 = arith.constant 0 : i32
    return %c0_i32, %c0_i32_0 : i32, i32
  }
  func.func @transform_24(%arg0: i32) -> (i32, i32) {
    %c0_i32 = arith.constant 0 : i32
    %c0_i32_0 = arith.constant 0 : i32
    %c0_i32_1 = arith.constant 0 : i32
    return %c0_i32, %c0_i32_0 : i32, i32
  }
  func.func @transform_25(%arg0: i32) -> (i32, i32) {
    %c0_i32 = arith.constant 0 : i32
    %c0_i32_0 = arith.constant 0 : i32
    %c0_i32_1 = arith.constant 0 : i32
    return %c0_i32, %c0_i32_0 : i32, i32
  }
  func.func @transform_26(%arg0: i32) -> (i32, i32, i32) {
    %c0_i32 = arith.constant 0 : i32
    %c0_i32_0 = arith.constant 0 : i32
    %c0_i32_1 = arith.constant 0 : i32
    return %arg0, %c0_i32, %c0_i32_0 : i32, i32, i32
  }
}

module attributes {stable_mosaic.version = 11 : i64} {
  func.func @_tsa_time_kernel(%arg0: i32, %arg1: memref<4x4x32xf32, #tpu.memory_space<vmem>>, %arg2: memref<2x32x16xf32, #tpu.memory_space<vmem>>, %arg3: memref<2x1x16xf32, #tpu.memory_space<vmem>>, %arg4: memref<2x32x16xf32, #tpu.memory_space<vmem>>, %arg5: memref<2x1x16xf32, #tpu.memory_space<vmem>>, %arg6: memref<2x32x16xf32, #tpu.memory_space<vmem>>, %arg7: memref<2x1x16xf32, #tpu.memory_space<vmem>>, %arg8: memref<2x16x32xf32, #tpu.memory_space<vmem>>, %arg9: memref<1x32xf32, #tpu.memory_space<vmem>>, %arg10: memref<1x32xf32, #tpu.memory_space<vmem>>, %arg11: memref<1x32xf32, #tpu.memory_space<vmem>>, %arg12: memref<32x64xf32, #tpu.memory_space<vmem>>, %arg13: memref<1x64xf32, #tpu.memory_space<vmem>>, %arg14: memref<64x32xf32, #tpu.memory_space<vmem>>, %arg15: memref<1x32xf32, #tpu.memory_space<vmem>>, %arg16: memref<1x32xf32, #tpu.memory_space<vmem>>, %arg17: memref<1x32xf32, #tpu.memory_space<vmem>>, %arg18: memref<4x4x32xf32, #tpu.memory_space<vmem>>) attributes {dimension_semantics = [#tpu.dimension_semantics<parallel>], iteration_bounds = array<i64: 2>, scalar_prefetch = 0 : i64, scratch_operands = 0 : i64, tpu.core_type = #tpu.core_type<tc>, window_params = [{transform_indices = @transform_0, window_bounds = array<i64: 4, 4, 32>}, {pipeline_mode = #tpu.pipeline_mode<synchronous>, transform_indices = @transform_1, window_bounds = array<i64: 2, 32, 16>}, {pipeline_mode = #tpu.pipeline_mode<synchronous>, transform_indices = @transform_2, window_bounds = array<i64: 2, 1, 16>}, {pipeline_mode = #tpu.pipeline_mode<synchronous>, transform_indices = @transform_3, window_bounds = array<i64: 2, 32, 16>}, {pipeline_mode = #tpu.pipeline_mode<synchronous>, transform_indices = @transform_4, window_bounds = array<i64: 2, 1, 16>}, {pipeline_mode = #tpu.pipeline_mode<synchronous>, transform_indices = @transform_5, window_bounds = array<i64: 2, 32, 16>}, {pipeline_mode = #tpu.pipeline_mode<synchronous>, transform_indices = @transform_6, window_bounds = array<i64: 2, 1, 16>}, {pipeline_mode = #tpu.pipeline_mode<synchronous>, transform_indices = @transform_7, window_bounds = array<i64: 2, 16, 32>}, {pipeline_mode = #tpu.pipeline_mode<synchronous>, transform_indices = @transform_8, window_bounds = array<i64: 1, 32>}, {pipeline_mode = #tpu.pipeline_mode<synchronous>, transform_indices = @transform_9, window_bounds = array<i64: 1, 32>}, {pipeline_mode = #tpu.pipeline_mode<synchronous>, transform_indices = @transform_10, window_bounds = array<i64: 1, 32>}, {pipeline_mode = #tpu.pipeline_mode<synchronous>, transform_indices = @transform_11, window_bounds = array<i64: 32, 64>}, {pipeline_mode = #tpu.pipeline_mode<synchronous>, transform_indices = @transform_12, window_bounds = array<i64: 1, 64>}, {pipeline_mode = #tpu.pipeline_mode<synchronous>, transform_indices = @transform_13, window_bounds = array<i64: 64, 32>}, {pipeline_mode = #tpu.pipeline_mode<synchronous>, transform_indices = @transform_14, window_bounds = array<i64: 1, 32>}, {pipeline_mode = #tpu.pipeline_mode<synchronous>, transform_indices = @transform_15, window_bounds = array<i64: 1, 32>}, {pipeline_mode = #tpu.pipeline_mode<synchronous>, transform_indices = @transform_16, window_bounds = array<i64: 1, 32>}, {transform_indices = @transform_17, window_bounds = array<i64: 4, 4, 32>}]} {
    %c0 = arith.constant 0 : index
    %c0_0 = arith.constant 0 : index
    %c0_1 = arith.constant 0 : index
    %0 = vector.load %arg1[%c0, %c0_0, %c0_1] : memref<4x4x32xf32, #tpu.memory_space<vmem>>, vector<4x4x32xf32>
    %c0_2 = arith.constant 0 : index
    %c0_3 = arith.constant 0 : index
    %c0_4 = arith.constant 0 : index
    %1 = vector.load %arg2[%c0_2, %c0_3, %c0_4] : memref<2x32x16xf32, #tpu.memory_space<vmem>>, vector<2x32x16xf32>
    %c0_5 = arith.constant 0 : index
    %c0_6 = arith.constant 0 : index
    %c0_7 = arith.constant 0 : index
    %2 = vector.load %arg3[%c0_5, %c0_6, %c0_7] : memref<2x1x16xf32, #tpu.memory_space<vmem>>, vector<2x1x16xf32>
    %c0_8 = arith.constant 0 : index
    %c0_9 = arith.constant 0 : index
    %c0_10 = arith.constant 0 : index
    %3 = vector.load %arg4[%c0_8, %c0_9, %c0_10] : memref<2x32x16xf32, #tpu.memory_space<vmem>>, vector<2x32x16xf32>
    %c0_11 = arith.constant 0 : index
    %c0_12 = arith.constant 0 : index
    %c0_13 = arith.constant 0 : index
    %4 = vector.load %arg5[%c0_11, %c0_12, %c0_13] : memref<2x1x16xf32, #tpu.memory_space<vmem>>, vector<2x1x16xf32>
    %c0_14 = arith.constant 0 : index
    %c0_15 = arith.constant 0 : index
    %c0_16 = arith.constant 0 : index
    %5 = vector.load %arg6[%c0_14, %c0_15, %c0_16] : memref<2x32x16xf32, #tpu.memory_space<vmem>>, vector<2x32x16xf32>
    %c0_17 = arith.constant 0 : index
    %c0_18 = arith.constant 0 : index
    %c0_19 = arith.constant 0 : index
    %6 = vector.load %arg7[%c0_17, %c0_18, %c0_19] : memref<2x1x16xf32, #tpu.memory_space<vmem>>, vector<2x1x16xf32>
    %c0_20 = arith.constant 0 : index
    %c0_21 = arith.constant 0 : index
    %c0_22 = arith.constant 0 : index
    %7 = vector.load %arg8[%c0_20, %c0_21, %c0_22] : memref<2x16x32xf32, #tpu.memory_space<vmem>>, vector<2x16x32xf32>
    %c0_23 = arith.constant 0 : index
    %c0_24 = arith.constant 0 : index
    %8 = vector.load %arg9[%c0_23, %c0_24] : memref<1x32xf32, #tpu.memory_space<vmem>>, vector<1x32xf32>
    %9 = vector.shape_cast %0 : vector<4x4x32xf32> to vector<16x32xf32>
    %10 = vector.shape_cast %0 : vector<4x4x32xf32> to vector<16x32xf32>
    %11 = vector.shape_cast %0 : vector<4x4x32xf32> to vector<16x32xf32>
    %cst = arith.constant 0.000000e+00 : f32
    %12 = vector.broadcast %cst : f32 to vector<16x32xf32>
    %13 = vector.extract_strided_slice %1 {offsets = [0, 0, 0], sizes = [1, 32, 16], strides = [1, 1, 1]} : vector<2x32x16xf32> to vector<1x32x16xf32>
    %14 = vector.shape_cast %13 : vector<1x32x16xf32> to vector<32x16xf32>
    %cst_25 = arith.constant dense<0.000000e+00> : vector<16x16xf32>
    %15 = tpu.matmul %9, %14, %cst_25 {dimension_numbers = #tpu.dot_dimension_numbers<[1], [0], [0], [1], [0, 0, 1, 1], [], []>} : vector<16x32xf32>, vector<32x16xf32>, vector<16x16xf32> -> vector<16x16xf32>
    %16 = vector.extract_strided_slice %2 {offsets = [0, 0, 0], sizes = [1, 1, 16], strides = [1, 1, 1]} : vector<2x1x16xf32> to vector<1x1x16xf32>
    %17 = vector.shape_cast %16 : vector<1x1x16xf32> to vector<1x16xf32>
    %18 = vector.broadcast %17 : vector<1x16xf32> to vector<16x16xf32>
    %19 = arith.addf %15, %18 : vector<16x16xf32>
    %20 = vector.shape_cast %19 : vector<16x16xf32> to vector<4x4x16xf32>
    %21 = vector.extract_strided_slice %3 {offsets = [0, 0, 0], sizes = [1, 32, 16], strides = [1, 1, 1]} : vector<2x32x16xf32> to vector<1x32x16xf32>
    %22 = vector.shape_cast %21 : vector<1x32x16xf32> to vector<32x16xf32>
    %cst_26 = arith.constant dense<0.000000e+00> : vector<16x16xf32>
    %23 = tpu.matmul %10, %22, %cst_26 {dimension_numbers = #tpu.dot_dimension_numbers<[1], [0], [0], [1], [0, 0, 1, 1], [], []>} : vector<16x32xf32>, vector<32x16xf32>, vector<16x16xf32> -> vector<16x16xf32>
    %24 = vector.extract_strided_slice %4 {offsets = [0, 0, 0], sizes = [1, 1, 16], strides = [1, 1, 1]} : vector<2x1x16xf32> to vector<1x1x16xf32>
    %25 = vector.shape_cast %24 : vector<1x1x16xf32> to vector<1x16xf32>
    %26 = vector.broadcast %25 : vector<1x16xf32> to vector<16x16xf32>
    %27 = arith.addf %23, %26 : vector<16x16xf32>
    %28 = vector.shape_cast %27 : vector<16x16xf32> to vector<4x4x16xf32>
    %29 = vector.extract_strided_slice %5 {offsets = [0, 0, 0], sizes = [1, 32, 16], strides = [1, 1, 1]} : vector<2x32x16xf32> to vector<1x32x16xf32>
    %30 = vector.shape_cast %29 : vector<1x32x16xf32> to vector<32x16xf32>
    %cst_27 = arith.constant dense<0.000000e+00> : vector<16x16xf32>
    %31 = tpu.matmul %11, %30, %cst_27 {dimension_numbers = #tpu.dot_dimension_numbers<[1], [0], [0], [1], [0, 0, 1, 1], [], []>} : vector<16x32xf32>, vector<32x16xf32>, vector<16x16xf32> -> vector<16x16xf32>
    %32 = vector.extract_strided_slice %6 {offsets = [0, 0, 0], sizes = [1, 1, 16], strides = [1, 1, 1]} : vector<2x1x16xf32> to vector<1x1x16xf32>
    %33 = vector.shape_cast %32 : vector<1x1x16xf32> to vector<1x16xf32>
    %34 = vector.broadcast %33 : vector<1x16xf32> to vector<16x16xf32>
    %35 = arith.addf %31, %34 : vector<16x16xf32>
    %36 = vector.shape_cast %35 : vector<16x16xf32> to vector<4x4x16xf32>
    "tpu.trace_start"() <{level = 10 : i32, message = "ble,bse->bls"}> : () -> ()
    %cst_28 = arith.constant dense<0.000000e+00> : vector<4x4x4xf32>
    %37 = tpu.matmul %20, %28, %cst_28 {dimension_numbers = #tpu.dot_dimension_numbers<[2], [2], [1], [1], [0, 0, 0, 1, 1, 1], [0], [0]>} : vector<4x4x16xf32>, vector<4x4x16xf32>, vector<4x4x4xf32> -> vector<4x4x4xf32>
    "tpu.trace_stop"() : () -> ()
    %cst_29 = arith.constant 2.500000e-01 : f32
    %38 = vector.broadcast %cst_29 : f32 to vector<4x4x4xf32>
    %39 = arith.mulf %37, %38 : vector<4x4x4xf32>
    %cst_30 = arith.constant dense<0xFF800000> : vector<4x4xf32>
    %40 = vector.multi_reduction <maximumf>, %39, %cst_30 [2] : vector<4x4x4xf32> to vector<4x4xf32>
    %41 = vector.shape_cast %40 : vector<4x4xf32> to vector<4x4x1xf32>
    %42 = vector.broadcast %41 : vector<4x4x1xf32> to vector<4x4x4xf32>
    %43 = arith.subf %39, %42 : vector<4x4x4xf32>
    %44 = math.exp %43 : vector<4x4x4xf32>
    %cst_31 = arith.constant dense<0.000000e+00> : vector<4x4xf32>
    %45 = vector.multi_reduction <add>, %44, %cst_31 [2] : vector<4x4x4xf32> to vector<4x4xf32>
    %46 = vector.shape_cast %45 : vector<4x4xf32> to vector<4x4x1xf32>
    %47 = tpu.reciprocal %46 {approx = true} : vector<4x4x1xf32> -> vector<4x4x1xf32>
    %48 = vector.broadcast %47 : vector<4x4x1xf32> to vector<4x4x4xf32>
    %49 = arith.mulf %44, %48 : vector<4x4x4xf32>
    "tpu.trace_start"() <{level = 10 : i32, message = "bls,bse->ble"}> : () -> ()
    %cst_32 = arith.constant dense<0.000000e+00> : vector<4x4x16xf32>
    %50 = tpu.matmul %49, %36, %cst_32 {dimension_numbers = #tpu.dot_dimension_numbers<[2], [1], [1], [2], [0, 0, 0, 1, 1, 2], [0], [0]>} : vector<4x4x4xf32>, vector<4x4x16xf32>, vector<4x4x16xf32> -> vector<4x4x16xf32>
    "tpu.trace_stop"() : () -> ()
    %51 = vector.shape_cast %50 : vector<4x4x16xf32> to vector<16x16xf32>
    %52 = vector.extract_strided_slice %7 {offsets = [0, 0, 0], sizes = [1, 16, 32], strides = [1, 1, 1]} : vector<2x16x32xf32> to vector<1x16x32xf32>
    %53 = vector.shape_cast %52 : vector<1x16x32xf32> to vector<16x32xf32>
    %cst_33 = arith.constant dense<0.000000e+00> : vector<16x32xf32>
    %54 = tpu.matmul %51, %53, %cst_33 {dimension_numbers = #tpu.dot_dimension_numbers<[1], [0], [0], [1], [0, 0, 1, 1], [], []>} : vector<16x16xf32>, vector<16x32xf32>, vector<16x32xf32> -> vector<16x32xf32>
    %55 = arith.addf %12, %54 : vector<16x32xf32>
    %56 = vector.extract_strided_slice %1 {offsets = [1, 0, 0], sizes = [1, 32, 16], strides = [1, 1, 1]} : vector<2x32x16xf32> to vector<1x32x16xf32>
    %57 = vector.shape_cast %56 : vector<1x32x16xf32> to vector<32x16xf32>
    %cst_34 = arith.constant dense<0.000000e+00> : vector<16x16xf32>
    %58 = tpu.matmul %9, %57, %cst_34 {dimension_numbers = #tpu.dot_dimension_numbers<[1], [0], [0], [1], [0, 0, 1, 1], [], []>} : vector<16x32xf32>, vector<32x16xf32>, vector<16x16xf32> -> vector<16x16xf32>
    %59 = vector.extract_strided_slice %2 {offsets = [1, 0, 0], sizes = [1, 1, 16], strides = [1, 1, 1]} : vector<2x1x16xf32> to vector<1x1x16xf32>
    %60 = vector.shape_cast %59 : vector<1x1x16xf32> to vector<1x16xf32>
    %61 = vector.broadcast %60 : vector<1x16xf32> to vector<16x16xf32>
    %62 = arith.addf %58, %61 : vector<16x16xf32>
    %63 = vector.shape_cast %62 : vector<16x16xf32> to vector<4x4x16xf32>
    %64 = vector.extract_strided_slice %3 {offsets = [1, 0, 0], sizes = [1, 32, 16], strides = [1, 1, 1]} : vector<2x32x16xf32> to vector<1x32x16xf32>
    %65 = vector.shape_cast %64 : vector<1x32x16xf32> to vector<32x16xf32>
    %cst_35 = arith.constant dense<0.000000e+00> : vector<16x16xf32>
    %66 = tpu.matmul %10, %65, %cst_35 {dimension_numbers = #tpu.dot_dimension_numbers<[1], [0], [0], [1], [0, 0, 1, 1], [], []>} : vector<16x32xf32>, vector<32x16xf32>, vector<16x16xf32> -> vector<16x16xf32>
    %67 = vector.extract_strided_slice %4 {offsets = [1, 0, 0], sizes = [1, 1, 16], strides = [1, 1, 1]} : vector<2x1x16xf32> to vector<1x1x16xf32>
    %68 = vector.shape_cast %67 : vector<1x1x16xf32> to vector<1x16xf32>
    %69 = vector.broadcast %68 : vector<1x16xf32> to vector<16x16xf32>
    %70 = arith.addf %66, %69 : vector<16x16xf32>
    %71 = vector.shape_cast %70 : vector<16x16xf32> to vector<4x4x16xf32>
    %72 = vector.extract_strided_slice %5 {offsets = [1, 0, 0], sizes = [1, 32, 16], strides = [1, 1, 1]} : vector<2x32x16xf32> to vector<1x32x16xf32>
    %73 = vector.shape_cast %72 : vector<1x32x16xf32> to vector<32x16xf32>
    %cst_36 = arith.constant dense<0.000000e+00> : vector<16x16xf32>
    %74 = tpu.matmul %11, %73, %cst_36 {dimension_numbers = #tpu.dot_dimension_numbers<[1], [0], [0], [1], [0, 0, 1, 1], [], []>} : vector<16x32xf32>, vector<32x16xf32>, vector<16x16xf32> -> vector<16x16xf32>
    %75 = vector.extract_strided_slice %6 {offsets = [1, 0, 0], sizes = [1, 1, 16], strides = [1, 1, 1]} : vector<2x1x16xf32> to vector<1x1x16xf32>
    %76 = vector.shape_cast %75 : vector<1x1x16xf32> to vector<1x16xf32>
    %77 = vector.broadcast %76 : vector<1x16xf32> to vector<16x16xf32>
    %78 = arith.addf %74, %77 : vector<16x16xf32>
    %79 = vector.shape_cast %78 : vector<16x16xf32> to vector<4x4x16xf32>
    "tpu.trace_start"() <{level = 10 : i32, message = "ble,bse->bls"}> : () -> ()
    %cst_37 = arith.constant dense<0.000000e+00> : vector<4x4x4xf32>
    %80 = tpu.matmul %63, %71, %cst_37 {dimension_numbers = #tpu.dot_dimension_numbers<[2], [2], [1], [1], [0, 0, 0, 1, 1, 1], [0], [0]>} : vector<4x4x16xf32>, vector<4x4x16xf32>, vector<4x4x4xf32> -> vector<4x4x4xf32>
    "tpu.trace_stop"() : () -> ()
    %cst_38 = arith.constant 2.500000e-01 : f32
    %81 = vector.broadcast %cst_38 : f32 to vector<4x4x4xf32>
    %82 = arith.mulf %80, %81 : vector<4x4x4xf32>
    %cst_39 = arith.constant dense<0xFF800000> : vector<4x4xf32>
    %83 = vector.multi_reduction <maximumf>, %82, %cst_39 [2] : vector<4x4x4xf32> to vector<4x4xf32>
    %84 = vector.shape_cast %83 : vector<4x4xf32> to vector<4x4x1xf32>
    %85 = vector.broadcast %84 : vector<4x4x1xf32> to vector<4x4x4xf32>
    %86 = arith.subf %82, %85 : vector<4x4x4xf32>
    %87 = math.exp %86 : vector<4x4x4xf32>
    %cst_40 = arith.constant dense<0.000000e+00> : vector<4x4xf32>
    %88 = vector.multi_reduction <add>, %87, %cst_40 [2] : vector<4x4x4xf32> to vector<4x4xf32>
    %89 = vector.shape_cast %88 : vector<4x4xf32> to vector<4x4x1xf32>
    %90 = tpu.reciprocal %89 {approx = true} : vector<4x4x1xf32> -> vector<4x4x1xf32>
    %91 = vector.broadcast %90 : vector<4x4x1xf32> to vector<4x4x4xf32>
    %92 = arith.mulf %87, %91 : vector<4x4x4xf32>
    "tpu.trace_start"() <{level = 10 : i32, message = "bls,bse->ble"}> : () -> ()
    %cst_41 = arith.constant dense<0.000000e+00> : vector<4x4x16xf32>
    %93 = tpu.matmul %92, %79, %cst_41 {dimension_numbers = #tpu.dot_dimension_numbers<[2], [1], [1], [2], [0, 0, 0, 1, 1, 2], [0], [0]>} : vector<4x4x4xf32>, vector<4x4x16xf32>, vector<4x4x16xf32> -> vector<4x4x16xf32>
    "tpu.trace_stop"() : () -> ()
    %94 = vector.shape_cast %93 : vector<4x4x16xf32> to vector<16x16xf32>
    %95 = vector.extract_strided_slice %7 {offsets = [1, 0, 0], sizes = [1, 16, 32], strides = [1, 1, 1]} : vector<2x16x32xf32> to vector<1x16x32xf32>
    %96 = vector.shape_cast %95 : vector<1x16x32xf32> to vector<16x32xf32>
    %cst_42 = arith.constant dense<0.000000e+00> : vector<16x32xf32>
    %97 = tpu.matmul %94, %96, %cst_42 {dimension_numbers = #tpu.dot_dimension_numbers<[1], [0], [0], [1], [0, 0, 1, 1], [], []>} : vector<16x16xf32>, vector<16x32xf32>, vector<16x32xf32> -> vector<16x32xf32>
    %98 = arith.addf %55, %97 : vector<16x32xf32>
    %99 = vector.broadcast %8 : vector<1x32xf32> to vector<16x32xf32>
    %100 = arith.addf %98, %99 : vector<16x32xf32>
    %101 = vector.shape_cast %100 : vector<16x32xf32> to vector<4x4x32xf32>
    %102 = arith.addf %0, %101 : vector<4x4x32xf32>
    %103 = vector.shape_cast %102 : vector<4x4x32xf32> to vector<16x32xf32>
    %c0_43 = arith.constant 0 : index
    %c0_44 = arith.constant 0 : index
    %104 = vector.load %arg10[%c0_43, %c0_44] : memref<1x32xf32, #tpu.memory_space<vmem>>, vector<1x32xf32>
    %c0_45 = arith.constant 0 : index
    %c0_46 = arith.constant 0 : index
    %105 = vector.load %arg11[%c0_45, %c0_46] : memref<1x32xf32, #tpu.memory_space<vmem>>, vector<1x32xf32>
    %cst_47 = arith.constant dense<0.000000e+00> : vector<16xf32>
    %106 = vector.multi_reduction <add>, %103, %cst_47 [1] : vector<16x32xf32> to vector<16xf32>
    %107 = vector.shape_cast %106 : vector<16xf32> to vector<16x1xf32>
    %cst_48 = arith.constant 3.200000e+01 : f32
    %108 = vector.broadcast %cst_48 : f32 to vector<16x1xf32>
    %109 = arith.divf %107, %108 : vector<16x1xf32>
    %110 = vector.broadcast %109 : vector<16x1xf32> to vector<16x32xf32>
    %111 = arith.subf %103, %110 : vector<16x32xf32>
    %112 = arith.mulf %111, %111 : vector<16x32xf32>
    %cst_49 = arith.constant dense<0.000000e+00> : vector<16xf32>
    %113 = vector.multi_reduction <add>, %112, %cst_49 [1] : vector<16x32xf32> to vector<16xf32>
    %114 = vector.shape_cast %113 : vector<16xf32> to vector<16x1xf32>
    %cst_50 = arith.constant 3.200000e+01 : f32
    %115 = vector.broadcast %cst_50 : f32 to vector<16x1xf32>
    %116 = arith.divf %114, %115 : vector<16x1xf32>
    %cst_51 = arith.constant 9.99999974E-6 : f32
    %117 = vector.broadcast %cst_51 : f32 to vector<16x1xf32>
    %118 = arith.addf %116, %117 : vector<16x1xf32>
    %119 = math.rsqrt %118 : vector<16x1xf32>
    %120 = vector.broadcast %119 : vector<16x1xf32> to vector<16x32xf32>
    %121 = arith.mulf %111, %120 : vector<16x32xf32>
    %122 = vector.broadcast %104 : vector<1x32xf32> to vector<16x32xf32>
    %123 = arith.mulf %121, %122 : vector<16x32xf32>
    %124 = vector.broadcast %105 : vector<1x32xf32> to vector<16x32xf32>
    %125 = arith.addf %123, %124 : vector<16x32xf32>
    %c0_52 = arith.constant 0 : index
    %c0_53 = arith.constant 0 : index
    %126 = vector.load %arg12[%c0_52, %c0_53] : memref<32x64xf32, #tpu.memory_space<vmem>>, vector<32x64xf32>
    %c0_54 = arith.constant 0 : index
    %c0_55 = arith.constant 0 : index
    %127 = vector.load %arg13[%c0_54, %c0_55] : memref<1x64xf32, #tpu.memory_space<vmem>>, vector<1x64xf32>
    %c0_56 = arith.constant 0 : index
    %c0_57 = arith.constant 0 : index
    %128 = vector.load %arg14[%c0_56, %c0_57] : memref<64x32xf32, #tpu.memory_space<vmem>>, vector<64x32xf32>
    %c0_58 = arith.constant 0 : index
    %c0_59 = arith.constant 0 : index
    %129 = vector.load %arg15[%c0_58, %c0_59] : memref<1x32xf32, #tpu.memory_space<vmem>>, vector<1x32xf32>
    %cst_60 = arith.constant dense<0.000000e+00> : vector<16x64xf32>
    %130 = tpu.matmul %125, %126, %cst_60 {dimension_numbers = #tpu.dot_dimension_numbers<[1], [0], [0], [1], [0, 0, 1, 1], [], []>} : vector<16x32xf32>, vector<32x64xf32>, vector<16x64xf32> -> vector<16x64xf32>
    %131 = vector.broadcast %127 : vector<1x64xf32> to vector<16x64xf32>
    %132 = arith.addf %130, %131 : vector<16x64xf32>
    %cst_61 = arith.constant 5.000000e-01 : f32
    %133 = vector.broadcast %cst_61 : f32 to vector<16x64xf32>
    %134 = arith.mulf %133, %132 : vector<16x64xf32>
    %cst_62 = arith.constant 0.707106769 : f32
    %135 = vector.broadcast %cst_62 : f32 to vector<16x64xf32>
    %136 = arith.mulf %132, %135 : vector<16x64xf32>
    %137 = math.erf %136 : vector<16x64xf32>
    %cst_63 = arith.constant 1.000000e+00 : f32
    %138 = vector.broadcast %cst_63 : f32 to vector<16x64xf32>
    %139 = arith.addf %138, %137 : vector<16x64xf32>
    %140 = arith.mulf %134, %139 : vector<16x64xf32>
    %cst_64 = arith.constant dense<0.000000e+00> : vector<16x32xf32>
    %141 = tpu.matmul %140, %128, %cst_64 {dimension_numbers = #tpu.dot_dimension_numbers<[1], [0], [0], [1], [0, 0, 1, 1], [], []>} : vector<16x64xf32>, vector<64x32xf32>, vector<16x32xf32> -> vector<16x32xf32>
    %142 = vector.broadcast %129 : vector<1x32xf32> to vector<16x32xf32>
    %143 = arith.addf %141, %142 : vector<16x32xf32>
    %144 = arith.addf %125, %143 : vector<16x32xf32>
    %c0_65 = arith.constant 0 : index
    %c0_66 = arith.constant 0 : index
    %145 = vector.load %arg16[%c0_65, %c0_66] : memref<1x32xf32, #tpu.memory_space<vmem>>, vector<1x32xf32>
    %c0_67 = arith.constant 0 : index
    %c0_68 = arith.constant 0 : index
    %146 = vector.load %arg17[%c0_67, %c0_68] : memref<1x32xf32, #tpu.memory_space<vmem>>, vector<1x32xf32>
    %cst_69 = arith.constant dense<0.000000e+00> : vector<16xf32>
    %147 = vector.multi_reduction <add>, %144, %cst_69 [1] : vector<16x32xf32> to vector<16xf32>
    %148 = vector.shape_cast %147 : vector<16xf32> to vector<16x1xf32>
    %cst_70 = arith.constant 3.200000e+01 : f32
    %149 = vector.broadcast %cst_70 : f32 to vector<16x1xf32>
    %150 = arith.divf %148, %149 : vector<16x1xf32>
    %151 = vector.broadcast %150 : vector<16x1xf32> to vector<16x32xf32>
    %152 = arith.subf %144, %151 : vector<16x32xf32>
    %153 = arith.mulf %152, %152 : vector<16x32xf32>
    %cst_71 = arith.constant dense<0.000000e+00> : vector<16xf32>
    %154 = vector.multi_reduction <add>, %153, %cst_71 [1] : vector<16x32xf32> to vector<16xf32>
    %155 = vector.shape_cast %154 : vector<16xf32> to vector<16x1xf32>
    %cst_72 = arith.constant 3.200000e+01 : f32
    %156 = vector.broadcast %cst_72 : f32 to vector<16x1xf32>
    %157 = arith.divf %155, %156 : vector<16x1xf32>
    %cst_73 = arith.constant 9.99999974E-6 : f32
    %158 = vector.broadcast %cst_73 : f32 to vector<16x1xf32>
    %159 = arith.addf %157, %158 : vector<16x1xf32>
    %160 = math.rsqrt %159 : vector<16x1xf32>
    %161 = vector.broadcast %160 : vector<16x1xf32> to vector<16x32xf32>
    %162 = arith.mulf %152, %161 : vector<16x32xf32>
    %163 = vector.broadcast %145 : vector<1x32xf32> to vector<16x32xf32>
    %164 = arith.mulf %162, %163 : vector<16x32xf32>
    %165 = vector.broadcast %146 : vector<1x32xf32> to vector<16x32xf32>
    %166 = arith.addf %164, %165 : vector<16x32xf32>
    %167 = vector.shape_cast %166 : vector<16x32xf32> to vector<4x4x32xf32>
    %c0_74 = arith.constant 0 : index
    %c0_75 = arith.constant 0 : index
    %c0_76 = arith.constant 0 : index
    %168 = vector.load %arg18[%c0_74, %c0_75, %c0_76] : memref<4x4x32xf32, #tpu.memory_space<vmem>>, vector<4x4x32xf32>
    tpu.vector_store %arg18[%c0_74, %c0_75, %c0_76], %167 {strides = array<i32>} : memref<4x4x32xf32, #tpu.memory_space<vmem>>, vector<4x4x32xf32>,
    return
  }
  func.func @transform_0(%arg0: i32) -> (i32, i32, i32) {
    %c0_i32 = arith.constant 0 : i32
    %c0_i32_0 = arith.constant 0 : i32
    %c0_i32_1 = arith.constant 0 : i32
    return %arg0, %c0_i32, %c0_i32_0 : i32, i32, i32
  }
  func.func @transform_1(%arg0: i32) -> (i32, i32, i32) {
    %c0_i32 = arith.constant 0 : i32
    %c0_i32_0 = arith.constant 0 : i32
    %c0_i32_1 = arith.constant 0 : i32
    %c0_i32_2 = arith.constant 0 : i32
    return %c0_i32, %c0_i32_0, %c0_i32_1 : i32, i32, i32
  }
  func.func @transform_2(%arg0: i32) -> (i32, i32, i32) {
    %c0_i32 = arith.constant 0 : i32
    %c0_i32_0 = arith.constant 0 : i32
    %c0_i32_1 = arith.constant 0 : i32
    %c0_i32_2 = arith.constant 0 : i32
    return %c0_i32, %c0_i32_0, %c0_i32_1 : i32, i32, i32
  }
  func.func @transform_3(%arg0: i32) -> (i32, i32, i32) {
    %c0_i32 = arith.constant 0 : i32
    %c0_i32_0 = arith.constant 0 : i32
    %c0_i32_1 = arith.constant 0 : i32
    %c0_i32_2 = arith.constant 0 : i32
    return %c0_i32, %c0_i32_0, %c0_i32_1 : i32, i32, i32
  }
  func.func @transform_4(%arg0: i32) -> (i32, i32, i32) {
    %c0_i32 = arith.constant 0 : i32
    %c0_i32_0 = arith.constant 0 : i32
    %c0_i32_1 = arith.constant 0 : i32
    %c0_i32_2 = arith.constant 0 : i32
    return %c0_i32, %c0_i32_0, %c0_i32_1 : i32, i32, i32
  }
  func.func @transform_5(%arg0: i32) -> (i32, i32, i32) {
    %c0_i32 = arith.constant 0 : i32
    %c0_i32_0 = arith.constant 0 : i32
    %c0_i32_1 = arith.constant 0 : i32
    %c0_i32_2 = arith.constant 0 : i32
    return %c0_i32, %c0_i32_0, %c0_i32_1 : i32, i32, i32
  }
  func.func @transform_6(%arg0: i32) -> (i32, i32, i32) {
    %c0_i32 = arith.constant 0 : i32
    %c0_i32_0 = arith.constant 0 : i32
    %c0_i32_1 = arith.constant 0 : i32
    %c0_i32_2 = arith.constant 0 : i32
    return %c0_i32, %c0_i32_0, %c0_i32_1 : i32, i32, i32
  }
  func.func @transform_7(%arg0: i32) -> (i32, i32, i32) {
    %c0_i32 = arith.constant 0 : i32
    %c0_i32_0 = arith.constant 0 : i32
    %c0_i32_1 = arith.constant 0 : i32
    %c0_i32_2 = arith.constant 0 : i32
    return %c0_i32, %c0_i32_0, %c0_i32_1 : i32, i32, i32
  }
  func.func @transform_8(%arg0: i32) -> (i32, i32) {
    %c0_i32 = arith.constant 0 : i32
    %c0_i32_0 = arith.constant 0 : i32
    %c0_i32_1 = arith.constant 0 : i32
    return %c0_i32, %c0_i32_0 : i32, i32
  }
  func.func @transform_9(%arg0: i32) -> (i32, i32) {
    %c0_i32 = arith.constant 0 : i32
    %c0_i32_0 = arith.constant 0 : i32
    %c0_i32_1 = arith.constant 0 : i32
    return %c0_i32, %c0_i32_0 : i32, i32
  }
  func.func @transform_10(%arg0: i32) -> (i32, i32) {
    %c0_i32 = arith.constant 0 : i32
    %c0_i32_0 = arith.constant 0 : i32
    %c0_i32_1 = arith.constant 0 : i32
    return %c0_i32, %c0_i32_0 : i32, i32
  }
  func.func @transform_11(%arg0: i32) -> (i32, i32) {
    %c0_i32 = arith.constant 0 : i32
    %c0_i32_0 = arith.constant 0 : i32
    %c0_i32_1 = arith.constant 0 : i32
    return %c0_i32, %c0_i32_0 : i32, i32
  }
  func.func @transform_12(%arg0: i32) -> (i32, i32) {
    %c0_i32 = arith.constant 0 : i32
    %c0_i32_0 = arith.constant 0 : i32
    %c0_i32_1 = arith.constant 0 : i32
    return %c0_i32, %c0_i32_0 : i32, i32
  }
  func.func @transform_13(%arg0: i32) -> (i32, i32) {
    %c0_i32 = arith.constant 0 : i32
    %c0_i32_0 = arith.constant 0 : i32
    %c0_i32_1 = arith.constant 0 : i32
    return %c0_i32, %c0_i32_0 : i32, i32
  }
  func.func @transform_14(%arg0: i32) -> (i32, i32) {
    %c0_i32 = arith.constant 0 : i32
    %c0_i32_0 = arith.constant 0 : i32
    %c0_i32_1 = arith.constant 0 : i32
    return %c0_i32, %c0_i32_0 : i32, i32
  }
  func.func @transform_15(%arg0: i32) -> (i32, i32) {
    %c0_i32 = arith.constant 0 : i32
    %c0_i32_0 = arith.constant 0 : i32
    %c0_i32_1 = arith.constant 0 : i32
    return %c0_i32, %c0_i32_0 : i32, i32
  }
  func.func @transform_16(%arg0: i32) -> (i32, i32) {
    %c0_i32 = arith.constant 0 : i32
    %c0_i32_0 = arith.constant 0 : i32
    %c0_i32_1 = arith.constant 0 : i32
    return %c0_i32, %c0_i32_0 : i32, i32
  }
  func.func @transform_17(%arg0: i32) -> (i32, i32, i32) {
    %c0_i32 = arith.constant 0 : i32
    %c0_i32_0 = arith.constant 0 : i32
    %c0_i32_1 = arith.constant 0 : i32
    return %arg0, %c0_i32, %c0_i32_0 : i32, i32, i32
  }
}

</mosaic_0001>

<bundles_post_ra>
// kernel: scale_block_forward.3
= control target key start
LH: loop header
LB: loop body
LE: loop exit
PB: predicated region body
PF: predicated region fallthrough
CT: control target
= control target key end

     0   :  { %s542_s18 = smov 0   ;;  %s605_s0 = inlined_call_operand.vmem [shape: f32[32,64], index: 0, kind: input, shape index: {}]   ;;  %s606_s1 = inlined_call_operand.vmem [shape: f32[1,64], index: 1, kind: input, shape index: {}]   ;;  %s607_s2 = inlined_call_operand.vmem [shape: f32[1,64], index: 2, kind: input, shape index: {}]   ;;  %s608_s3 = inlined_call_operand.vmem [shape: f32[64,32], index: 3, kind: input, shape index: {}]   ;;  %s609_s4 = inlined_call_operand.vmem [shape: f32[1,32], index: 4, kind: input, shape index: {}]   ;;  %s610_s5 = inlined_call_operand.vmem [shape: f32[32,32], index: 5, kind: output, shape index: {}]  }
   0x1 LB: > { %s431_s19 = sadd.s32 4294967295, %s510_s18   ;;  %p435_p0 = scmp.ge.s32.totalorder %s510_s18, 1  ;;  %s510_s18 = sphi %s542_s18, %s15_s18  }
   0x2   : > { %p188_p1 = scmp.lt.s32.totalorder %s510_s18, 3 }
   0x4   : > { %p189_p2 = pnand %p435_p0, %p188_p1 }
   0x5   : > { %s436_s20 = sshll.u32 (!%p189_p2), %s431_s19, 1  ;;  %vm232_vm0 = vcmask (!%p189_p2), 523264   ;;  %v276_v14 = vld [vmem:[%s608_s3] sm:$0xff] (!%p189_p2)  ;;  %v277_v15 = vld [vmem:[%s608_s3 + $0x8] sm:$0xff] (!%p189_p2)  ;;  %v278_v17 = vld [vmem:[%s608_s3 + $0x10] sm:$0xff] (!%p189_p2)  ;;  %vm372_vm1 = vcmask (!%p189_p2), 261120  }
   0x6   : > { %192 = sbr.rel (%p189_p2) target bundleno = 550 (0x226), region = 40  ;;  %p217_p3 = scmp.lt.s32.totalorder (!%p189_p2), %s436_s20, 3  ;;  %v476_v16 = vpack.c.bf16 (!%p189_p2), %v277_v15, %v276_v14  ;;  %v279_v18 = vld [vmem:[%s608_s3 + $0x18] sm:$0xff] (!%p189_p2)  ;;  %v280_v19 = vld [vmem:[%s608_s3 + $0x20] sm:$0xff] (!%p189_p2)  ;;  %v281_v21 = vld [vmem:[%s608_s3 + $0x28] sm:$0xff] (!%p189_p2) }
   0x7   : > { %v480_v20 = vpack.c.bf16 (!%p189_p2), %v279_v18, %v278_v17  ;;  %v484_v22 = vpack.c.bf16 (!%p189_p2), %v281_v21, %v280_v19  ;;  %v282_v23 = vld [vmem:[%s608_s3 + $0x30] sm:$0xff] (!%p189_p2)  ;;  %v283_v24 = vld [vmem:[%s608_s3 + $0x38] sm:$0xff] (!%p189_p2)  ;;  %v440_v33 = vld [vmem:[%s606_s1] ss:$0 sm:$0xff] (!%p189_p2) }
   0x8   : > { %477 = vmatprep.subr.bf16.mxu0 (!%p189_p2), %v476_v16  ;;  %v488_v25 = vpack.c.bf16 (!%p189_p2), %v283_v24, %v282_v23  ;;  %v441_v35 = vld [vmem:[%s607_s2] ss:$0 sm:$0xff] (!%p189_p2) }
   0x9   : > { %479 = vmatpush3.bf16.msra.mxu0 (!%p189_p2), %v476_v16  ;;  %v442_v42 = vld [vmem:[%s609_s4] ss:$0 sm:$0xff] (!%p189_p2) }
   0xa   : > { %481 = vmatprep.subr.bf16.mxu0 (!%p189_p2), %v480_v20 }
   0xd   : > { %s612_s20 = smov (!%p217_p3, %s436_s20), 3  ;;  %483 = vmatpush3.bf16.msra.mxu0 %v480_v20 }
   0xe   : > { %s437_s21 = sshll.u32 %s612_s20, 3  ;;  %485 = vmatprep.subr.bf16.mxu0 %v484_v22 }
   0xf   : > { %s220_s24 = scalar_lea.vmem %s605_s0, %s437_s21  ;;  %s226_s27 = scalar_lea.vmem %s610_s5, %s437_s21 }
  0x10   : > { %v228_v0 = vld [vmem:[%s220_s24] sm:$0xff]  ;;  %v229_v1 = vld [vmem:[%s220_s24 + $0x8] sm:$0xff] }
  0x11   : > { %v233_v2 = vsel %vm232_vm0, %v228_v0, 0.0  ;;  %v236_v3 = vsel %vm232_vm0, %v229_v1, 0.0  ;;  %487 = vmatpush3.bf16.msra.mxu0 %v484_v22 }
  0x12   : > { %234 = vadd.xlane.f32.xlu0 %v233_v2  ;;  %489 = vmatprep.subr.bf16.mxu0 %v488_v25 }
  0x15   : > { %491 = vmatpush3.bf16.msra.mxu0 %v488_v25 }
  0x16   : > { %237 = vadd.xlane.f32.xlu0 %v236_v3 }
  0x9f   : > { %v235_v4 = vpop.xlane.xlu0 %234 }
  0xa0   : > { %v240_v5 = vmul.f32 0.015625, %v235_v4 }
  0xa2   : > { %v242_v6 = vsub.f32 %v228_v0, %v240_v5 }
  0xa3   : > { %v238_v7 = vpop.xlane.xlu0 %237 }
  0xa4   : > { %v241_v8 = vmul.f32 0.015625, %v238_v7  ;;  %v244_v9 = vmul.f32 %v242_v6, %v242_v6 }
  0xa6   : > { %v243_v10 = vsub.f32 %v229_v1, %v241_v8  ;;  %v246_v11 = vsel %vm232_vm0, %v244_v9, 0.0 }
  0xa7   : > { %247 = vadd.xlane.f32.xlu1 %v246_v11 }
  0xa8   : > { %v245_v12 = vmul.f32 %v243_v10, %v243_v10 }
  0xaa   : > { %v249_v13 = vsel %vm232_vm0, %v245_v12, 0.0 }
  0xab   : > { %250 = vadd.xlane.f32.xlu1 %v249_v13 }
 0x134   : > { %v248_v26 = vpop.xlane.xlu1 %247 }
 0x135   : > { %v252_v27 = vmul.f32 0.015625, %v248_v26 }
 0x137   : > { %v254_v28 = vadd.f32 1e-05, %v252_v27 }
 0x138   : > { %v251_v29 = vpop.xlane.xlu1 %250 }
 0x139   : > { %500 = vrsqrt.f32 %v254_v28  ;;  %v253_v30 = vmul.f32 0.015625, %v251_v29 }
 0x13b   : > { %v255_v31 = vadd.f32 1e-05, %v253_v30 }
 0x13d   : > { %502 = vrsqrt.f32 %v255_v31 }
 0x143   : > { %v501_v32 = vpop.eup %500 }
 0x144   : > { %v258_v34 = vmul.f32 %v501_v32, %v242_v6 }
 0x146   : > { %v266_v36 = vmul.f32 %v440_v33, %v258_v34 }
 0x147   : > { %v503_v37 = vpop.eup %502 }
 0x148   : > { %v259_v38 = vmul.f32 %v503_v37, %v243_v10  ;;  %v274_v39 = vadd.f32 %v441_v35, %v266_v36 }
 0x14a   : > { %v267_v40 = vmul.f32 %v440_v33, %v259_v38  ;;  %473 = vmatprep.mubr.msk.f32.mxu0 %vm232_vm0, %v274_v39 }
 0x14c   : > { %v275_v41 = vadd.f32 %v441_v35, %v267_v40 }
 0x14e   : > { %474 = vmatmul.mubr.msk.f32.vlgmr.msra.gmra.mrb[0].mxu0 %vm232_vm0, %v275_v41 }
 0x221   : > { %v475_v43 = vpop.f32.mrb[0].mxu0 }
 0x222   : > { %v363_v44 = vpop.f32.mrb[1].mxu0  ;;  %v369_v46 = vadd.f32 %v475_v43, %v442_v42 }
 0x223   : > { %v364_v45 = vadd.f32 %v442_v42, %v363_v44 }
 0x224   : > { %374 = vst.msk [vmem:[%s226_s27 + $0x8] sm:$0xff] %vm372_vm1, %v369_v46 }
 0x225   : > { %373 = vst.msk [vmem:[%s226_s27] sm:$0xff] %vm372_vm1, %v364_v45 }
 0x226 PF: > { %s15_s18 = sadd.s32 1, %s510_s18  }
 0x227   : > { %p12_p4 = scmp.ge.s32.totalorder %s15_s18, 4  }
 0x229   :  { %14 = sbr.rel (!%p12_p4) target bundleno = 1 (0x1), region = 70 }

// kernel: scale_block_forward.4
= control target key start
LH: loop header
LB: loop body
LE: loop exit
PB: predicated region body
PF: predicated region fallthrough
CT: control target
= control target key end

     0   :  { %s3751_s24 = smov 0   ;;  %s4136_s0 = inlined_call_operand.vmem [shape: f32[8,4,32], index: 0, kind: input, shape index: {}]   ;;  %s4137_s1 = inlined_call_operand.vmem [shape: f32[2,32,16], index: 1, kind: input, shape index: {}]   ;;  %s4138_s2 = inlined_call_operand.vmem [shape: f32[2,1,16], index: 2, kind: input, shape index: {}]   ;;  %s4139_s3 = inlined_call_operand.vmem [shape: f32[2,32,16], index: 3, kind: input, shape index: {}]   ;;  %s4140_s4 = inlined_call_operand.vmem [shape: f32[2,1,16], index: 4, kind: input, shape index: {}]   ;;  %s4141_s5 = inlined_call_operand.vmem [shape: f32[2,32,16], index: 5, kind: input, shape index: {}]   ;;  %s4142_s6 = inlined_call_operand.vmem [shape: f32[2,1,16], index: 6, kind: input, shape index: {}]   ;;  %s4143_s7 = inlined_call_operand.vmem [shape: f32[2,16,32], index: 7, kind: input, shape index: {}]   ;;  %s4144_s8 = inlined_call_operand.vmem [shape: f32[1,32], index: 8, kind: input, shape index: {}]   ;;  %s4145_s9 = inlined_call_operand.vmem [shape: f32[1,32], index: 9, kind: input, shape index: {}]   ;;  %s4146_s10 = inlined_call_operand.vmem [shape: f32[1,32], index: 10, kind: input, shape index: {}]   ;;  %s4147_s11 = inlined_call_operand.vmem [shape: f32[32,64], index: 11, kind: input, shape index: {}]   ;;  %s4148_s12 = inlined_call_operand.vmem [shape: f32[1,64], index: 12, kind: input, shape index: {}]   ;;  %s4149_s13 = inlined_call_operand.vmem [shape: f32[64,32], index: 13, kind: input, shape index: {}]   ;;  %s4150_s14 = inlined_call_operand.vmem [shape: f32[1,32], index: 14, kind: input, shape index: {}]   ;;  %s4151_s15 = inlined_call_operand.vmem [shape: f32[1,32], index: 15, kind: input, shape index: {}]   ;;  %s4152_s16 = inlined_call_operand.vmem [shape: f32[1,32], index: 16, kind: input, shape index: {}]   ;;  %s4153_s17 = inlined_call_operand.vmem [shape: f32[8,4,32], index: 17, kind: output, shape index: {}]  }
   0x1   :  { %4155 = sst [smem:[#allocation2_spill]] %s4136_s0 }
   0x2   :  { %4156 = sst [smem:[#allocation3_spill]] %s4137_s1 }
   0x3 LB: > { %s3151_s25 = sadd.s32 4294967295, %s3655_s24   ;;  %p3155_p0 = scmp.ge.s32.totalorder %s3655_s24, 1  ;;  %s3655_s24 = sphi %s3751_s24, %s27_s24  }
   0x4   : > { %p488_p1 = scmp.lt.s32.totalorder %s3655_s24, 3 }
   0x6   : > { %p489_p2 = pnand %p3155_p0, %p488_p1 }
   0x7   : > { %s4157_s28 = sld [smem:[#allocation3_spill]] (!%p489_p2)  ;;  %s3156_s19 = sshll.u32 (!%p489_p2), %s3151_s25, 2  ;;  %v566_v6 = vld [vmem:[%s4139_s3] sm:$0xff] (!%p489_p2)  ;;  %v567_v7 = vld [vmem:[%s4139_s3 + $0x8] sm:$0xff] (!%p489_p2)  ;;  %vm603_vm0 = vcmask (!%p489_p2), 261120   ;;  %v568_v12 = vld [vmem:[%s4139_s3 + $0x10] sm:$0xff] (!%p489_p2) }
   0x8   : > { %492 = sbr.rel (%p489_p2) target bundleno = 3089 (0xc11), region = 88  ;;  %p541_p3 = scmp.lt.s32.totalorder (!%p489_p2), %s3156_s19, 7  ;;  %v576_v8 = vld [vmem:[%s4141_s5] sm:$0xff] (!%p489_p2)  ;;  %v577_v9 = vld [vmem:[%s4141_s5 + $0x8] sm:$0xff] (!%p489_p2)  ;;  %v3517_v11 = vpack.c.bf16 (!%p489_p2), %v567_v7, %v566_v6  ;;  %v569_v13 = vld [vmem:[%s4139_s3 + $0x18] sm:$0xff] (!%p489_p2)  ;;  %v3657_v24 = vmov (!%p489_p2), 0.0  }
   0x9   : > { %v3525_v10 = vpack.c.bf16 (!%p489_p2), %v577_v9, %v576_v8  ;;  %s4158_s20 = sld [smem:[#allocation2_spill]] (!%p489_p2)  ;;  %v3521_v20 = vpack.c.bf16 (!%p489_p2), %v569_v13, %v568_v12  ;;  %v578_v21 = vld [vmem:[%s4141_s5 + $0x10] sm:$0xff] (!%p489_p2)  ;;  %v579_v22 = vld [vmem:[%s4141_s5 + $0x18] sm:$0xff] (!%p489_p2)  ;;  %vm3658_vm1 = vmmov (!%p489_p2), 0   ;;  %v3163_v27 = vld [vmem:[%s4140_s4] ss:$0 sm:$0xff] (!%p489_p2) }
   0xa   : > { %v3529_v23 = vpack.c.bf16 (!%p489_p2), %v579_v22, %v578_v21  ;;  %vm857_vm2 = vcmask (!%p489_p2), 130048   ;;  %v3160_v29 = vld [vmem:[%s4138_s2] ss:$0 sm:$0xff] (!%p489_p2)  ;;  %vm1207_vm3 = vcmask (!%p489_p2), 1043456   ;;  %vm1158_vm4 = vcmask (!%p489_p2), 27648  }
   0xb   : > { %3526 = vmatprep.subr.bf16.mxu0 (!%p489_p2), %v3525_v10  ;;  %v3166_v39 = vld [vmem:[%s4142_s6] ss:$0 sm:$0xff] (!%p489_p2)  ;;  %vm1203_vm5 = vcmask (!%p489_p2), 31744   ;;  %vm2856_vm6 = vcmask (!%p489_p2), 523264   ;;  %vm3090_vm7 = vcmask (!%p489_p2), 257024  }
   0xc   : > { %3528 = vmatpush3.bf16.msra.mxu0 (!%p489_p2), %v3525_v10 }
   0xd   : > { %v556_v0 = vld [vmem:[%s4157_s28] sm:$0xff] (!%p489_p2)  ;;  %v557_v1 = vld [vmem:[%s4157_s28 + $0x8] sm:$0xff] (!%p489_p2)  ;;  %v558_v2 = vld [vmem:[%s4157_s28 + $0x10] sm:$0xff] (!%p489_p2)  ;;  %3530 = vmatprep.subr.bf16.mxu0 (!%p489_p2), %v3529_v23 }
   0xe   : > { %v3509_v3 = vpack.c.bf16 (!%p489_p2), %v557_v1, %v556_v0  ;;  %v559_v4 = vld [vmem:[%s4157_s28 + $0x18] sm:$0xff] (!%p489_p2) }
   0xf   : > { %v3513_v5 = vpack.c.bf16 %v559_v4, %v558_v2  ;;  %s4160_s19 = smov (!%p541_p3, %s3156_s19), 7 }
  0x10   : > { %3510 = vmatprep.subr.bf16.mxu1 %v3509_v3  ;;  %s3157_s30 = sshll.u32 %s4160_s19, 2  ;;  %3532 = vmatpush3.bf16.msra.mxu0 %v3529_v23 }
  0x11   : > { %3512 = vmatpush3.bf16.msra.mxu1 %v3509_v3  ;;  %s544_s21 = scalar_lea.vmem %s4158_s20, %s3157_s30  ;;  %3362 = vmatprep.subr.mxu0 %v3657_v24  ;;  %s550_s29 = scalar_lea.vmem %s4153_s17, %s3157_s30 }
  0x12   : > { %3514 = vmatprep.subr.bf16.mxu1 %v3513_v5  ;;  %v3797_v14 = vld [vmem:[%s544_s21] sm:$0xf]  ;;  %v3799_v15 = vld [vmem:[%s544_s21 + $0x4] sm:$0xf]  ;;  %v3801_v16 = vld [vmem:[%s544_s21 + $0x8] sm:$0xf] }
  0x13   : > { %v3805_v17 = vcombine.low %v3797_v14, %v3799_v15  ;;  %v3807_v18 = vld [vmem:[%s544_s21 + $0xc] sm:$0xf] }
  0x14   : > { %v3811_v19 = vcombine.low %v3801_v16, %v3807_v18 }
  0x15   : > { %3516 = vmatpush3.bf16.msra.mxu1 %v3513_v5  ;;  %3327 = vmatprep.mubr.msk.f32.mxu1 %vm603_vm0, %v3805_v17 }
  0x16   : > { %3518 = vmatprep.subr.bf16.mxu1 %v3517_v11  ;;  %3349 = vmatprep.mubr.msk.f32.mxu0 %vm603_vm0, %v3805_v17 }
  0x17   : > { %3350 = vmatmul.mubr.msk.f32.vlgmr.msra.gmra.mrb[0].mxu0 %vm603_vm0, %v3811_v19 }
  0x18   : > { %3328 = vmatmul.mubr.msk.f32.vlgmr.msra.gmra.mrb[0].mxu1 %vm603_vm0, %v3811_v19  ;;  %3364 = vmatprep.mubr.msk.f32.mxu0 %vm3658_vm1, %v3657_v24 }
  0x19   : > { %3520 = vmatpush3.bf16.msra.mxu1 %v3517_v11  ;;  %3338 = vmatprep.mubr.msk.f32.mxu1 %vm603_vm0, %v3805_v17 }
  0x1a   : > { %3522 = vmatprep.subr.bf16.mxu1 %v3521_v20 }
  0x1d   : > { %3524 = vmatpush3.bf16.msra.mxu1 %v3521_v20 }
  0x1e   : > { %3352 = vmatprep.subr.mxu1 %v3657_v24 }
  0x20   : > { %3339 = vmatmul.mubr.msk.f32.vlgmr.msra.gmra.mrb[2].mxu1 %vm603_vm0, %v3811_v19 }
  0x21   : > { %3354 = vmatprep.mubr.msk.f32.mxu1 %vm3658_vm1, %v3657_v24 }
  0xea   : > { %v3351_v40 = vpop.f32.mrb[0].mxu0 }
  0xeb   : > { %v3329_v25 = vpop.f32.mrb[0].mxu1  ;;  %v3866_v41 = vadd.f32 %v3351_v40, %v3166_v39  ;;  %v844_v42 = vpop.f32.mrb[1].mxu0 }
  0xec   : > { %v674_v26 = vpop.f32.mrb[1].mxu1  ;;  %v680_v33 = vadd.f32 %v3329_v25, %v3160_v29  ;;  %v845_v43 = vadd.f32 %v3166_v39, %v844_v42 }
  0xed   : > { %v675_v34 = vadd.f32 %v3160_v29, %v674_v26  ;;  %v571_v29 = vld [vmem:[%s4139_s3 + $0x28] sm:$0xff] }
  0xee   : > { %v686_v38 = vcombine.high %v680_v33, %v680_v33  ;;  %v855_v44 = vcombine.high %v845_v43, %v845_v43 }
  0xef   : > { %v685_v36 = vcombine.high %v675_v34, %v675_v34 }
  0xf3   : > { %v3340_v28 = vpop.f32.mrb[2].mxu1 }
  0xf4   : > { %v765_v30 = vadd.f32 %v3340_v28, %v3163_v27  ;;  %v759_v31 = vpop.f32.mrb[3].mxu1  ;;  %v570_v28 = vld [vmem:[%s4139_s3 + $0x20] sm:$0xff] }
  0xf5   : > { %v760_v32 = vadd.f32 %v3163_v27, %v759_v31 }
  0xf6   : > { %3363 = vmatpush3.xpose.msk.msra.mxu0 %vm857_vm2, %v765_v30  ;;  %v771_v37 = vcombine.high %v765_v30, %v765_v30 }
  0xf7   : > { %3353 = vmatpush3.xpose.msk.msra.mxu1 %vm857_vm2, %v760_v32  ;;  %3372 = vmatprep.subr.mxu0 %v3657_v24  ;;  %v770_v35 = vcombine.high %v760_v32, %v760_v32  ;;  %v3541_v32 = vpack.c.bf16 %v571_v29, %v570_v28 }
  0xf8   : > { %3357 = vmatprep.subr.mxu1 %v3657_v24 }
  0xf9   : > { %3365 = vmatmul.mubr.msk.f32.vlgmr.msra.gmra.mrb[2].mxu0 %vm857_vm2, %v680_v33  ;;  %v856_v33 = vcombine.high %v3866_v41, %v3866_v41 }
  0xfa   : > { %3355 = vmatmul.mubr.msk.f32.vlgmr.msra.gmra.mrb[4].mxu1 %vm857_vm2, %v675_v34  ;;  %3374 = vmatprep.mubr.msk.f32.mxu0 %vm3658_vm1, %v3657_v24  ;;  %v560_v34 = vld [vmem:[%s4157_s28 + $0x20] sm:$0xff] }
  0xfb   : > { %3358 = vmatpush3.xpose.msk.msra.mxu1 %vm857_vm2, %v770_v35  ;;  %3359 = vmatprep.mubr.msk.f32.mxu1 %vm3658_vm1, %v3657_v24  ;;  %v561_v35 = vld [vmem:[%s4157_s28 + $0x28] sm:$0xff] }
  0xfc   : > { %3367 = vmatprep.subr.mxu1 %v3657_v24  ;;  %3373 = vmatpush3.msk.msra.mxu0 %vm1207_vm3, %v845_v43  ;;  %v3533_v43 = vpack.c.bf16 %v561_v35, %v560_v34 }
  0xfd   : > { %3382 = vmatprep.subr.mxu0 %v3657_v24 }
  0xfe   : > { %3360 = vmatmul.mubr.msk.f32.vlgmr.msra.gmra.mrb[6].mxu1 %vm857_vm2, %v685_v36  ;;  %v572_v36 = vld [vmem:[%s4139_s3 + $0x30] sm:$0xff] }
  0xff   : > { %3368 = vmatpush3.xpose.msk.msra.mxu1 %vm857_vm2, %v771_v37  ;;  %3369 = vmatprep.mubr.msk.f32.mxu1 %vm3658_vm1, %v3657_v24  ;;  %v573_v37 = vld [vmem:[%s4139_s3 + $0x38] sm:$0xff] }
 0x100   : > { %3377 = vmatprep.subr.mxu1 %v3657_v24 }
 0x102   : > { %3370 = vmatmul.mubr.msk.f32.vlgmr.msra.gmra.mrb[8].mxu1 %vm857_vm2, %v686_v38 }
 0x103   : > { %3379 = vmatprep.mubr.msk.f32.mxu1 %vm3658_vm1, %v3657_v24  ;;  %3378 = vmatpush3.msk.msra.mxu1 %vm1207_vm3, %v855_v44  ;;  %v3545_v44 = vpack.c.bf16 %v573_v37, %v572_v36 }
 0x104   : > { %3387 = vmatprep.subr.mxu1 %v3657_v24 }
 0x1cc   : > { %v1076_v45 = vpop.f32.mrb[2].mxu0 }
 0x1cd   : > { %v928_v46 = vpop.f32.mrb[4].mxu1  ;;  %v3366_v47 = vpop.f32.mrb[3].mxu0  ;;  %v1156_v57 = vmul.f32 0.25, %v1076_v45  ;;  %v562_v45 = vld [vmem:[%s4157_s28 + $0x30] sm:$0xff] }
 0x1ce   : > { %v3356_v48 = vpop.f32.mrb[5].mxu1  ;;  %v1154_v52 = vmul.f32 0.25, %v928_v46  ;;  %v563_v46 = vld [vmem:[%s4157_s28 + $0x38] sm:$0xff] }
 0x1cf   : > { %v1165_v60 = vsel %vm1158_vm4, %v1156_v57, -inf }
 0x1d0   : > { %v1159_v58 = vsel %vm1158_vm4, %v1154_v52, -inf }
 0x1d1   : > { %v1002_v49 = vpop.f32.mrb[6].mxu1 }
 0x1d2   : > { %v1155_v50 = vmul.f32 0.25, %v1002_v49  ;;  %v3361_v51 = vpop.f32.mrb[7].mxu1  ;;  %v3537_v49 = vpack.c.bf16 %v563_v46, %v562_v45 }
 0x1d4   : > { %v1162_v53 = vsel %vm1158_vm4, %v1155_v50, -inf }
 0x1d5   : > { %1163 = vmax.xlane.f32.xlu0 %v1162_v53  ;;  %v1150_v54 = vpop.f32.mrb[8].mxu1  ;;  %v583_v53 = vld [vmem:[%s4141_s5 + $0x38] sm:$0xff] }
 0x1d6   : > { %v1157_v55 = vmul.f32 0.25, %v1150_v54  ;;  %v3371_v56 = vpop.f32.mrb[9].mxu1 }
 0x1d8   : > { %v1168_v59 = vsel %vm1158_vm4, %v1157_v55, -inf }
 0x1d9   : > { %1160 = vmax.xlane.f32.xlu0 %v1159_v58  ;;  %1169 = vmax.xlane.f32.xlu1 %v1168_v59 }
 0x1dd   : > { %1166 = vmax.xlane.f32.xlu1 %v1165_v60 }
 0x262   : > { %v1164_v61 = vpop.xlane.xlu0 %1163 }
 0x263   : > { %v1172_v62 = vsub.f32 %v1155_v50, %v1164_v61  ;;  %v581_v50 = vld [vmem:[%s4141_s5 + $0x28] sm:$0xff] }
 0x265   : > { %v1177_v63 = vmul.f32 1.442695, %v1172_v62 }
 0x266   : > { %v1161_v0 = vpop.xlane.xlu0 %1160  ;;  %v1170_v1 = vpop.xlane.xlu1 %1169 }
 0x267   : > { %3605 = vpow2.f32 %v1177_v63  ;;  %v1171_v2 = vsub.f32 %v1154_v52, %v1161_v0  ;;  %v1174_v3 = vsub.f32 %v1157_v55, %v1170_v1  ;;  %v582_v52 = vld [vmem:[%s4141_s5 + $0x30] sm:$0xff]  ;;  %v3188_v63 = vld [vmem:[%s4140_s4 + $0x1] ss:$0 sm:$0xff] }
 0x269   : > { %v1175_v4 = vmul.f32 1.442695, %v1171_v2  ;;  %v1181_v5 = vmul.f32 1.442695, %v1174_v3  ;;  %v3185_v3 = vld [vmem:[%s4138_s2 + $0x1] ss:$0 sm:$0xff] }
 0x26a   : > { %v1167_v6 = vpop.xlane.xlu1 %1166 }
 0x26b   : > { %3607 = vpow2.f32 %v1175_v4  ;;  %v1173_v7 = vsub.f32 %v1156_v57, %v1167_v6 }
 0x26c   : > { %3609 = vpow2.f32 %v1181_v5 }
 0x26d   : > { %v1179_v8 = vmul.f32 1.442695, %v1173_v7 }
 0x26f   : > { %3611 = vpow2.f32 %v1179_v8 }
 0x271   : > { %v3606_v9 = vpop.eup %3605 }
 0x272   : > { %v1186_v10 = vsel %vm1158_vm4, %v3606_v9, 0.0 }
 0x273   : > { %1187 = vadd.xlane.f32.xlu0 %v1186_v10 }
 0x275   : > { %v3608_v11 = vpop.eup %3607 }
 0x276   : > { %v3610_v12 = vpop.eup %3609  ;;  %v1183_v13 = vsel %vm1158_vm4, %v3608_v11, 0.0 }
 0x277   : > { %1184 = vadd.xlane.f32.xlu1 %v1183_v13  ;;  %v1192_v20 = vsel %vm1158_vm4, %v3610_v12, 0.0  ;;  %v3191_v13 = vld [vmem:[%s4142_s6 + $0x1] ss:$0 sm:$0xff] }
 0x278   : > { %1193 = vadd.xlane.f32.xlu0 %v1192_v20 }
 0x279   : > { %v3612_v21 = vpop.eup %3611 }
 0x27a   : > { %v1189_v22 = vsel %vm1158_vm4, %v3612_v21, 0.0 }
 0x27b   : > { %1190 = vadd.xlane.f32.xlu1 %v1189_v22 }
 0x300   : > { %v1188_v23 = vpop.xlane.xlu0 %1187 }
 0x301   : > { %3613 = vrcp.f32 %v1188_v23 }
 0x304   : > { %v1185_v25 = vpop.xlane.xlu1 %1184 }
 0x305   : > { %v1194_v26 = vpop.xlane.xlu0 %1193  ;;  %3615 = vrcp.f32 %v1185_v25 }
 0x306   : > { %3617 = vrcp.f32 %v1194_v26 }
 0x308   : > { %v1191_v27 = vpop.xlane.xlu1 %1190 }
 0x309   : > { %3619 = vrcp.f32 %v1191_v27 }
 0x30b   : > { %v3614_v30 = vpop.eup %3613 }
 0x30c   : > { %v1200_v31 = vmul.f32 %v3614_v30, %v3606_v9 }
 0x30e   : > { %3380 = vmatmul.mubr.msk.f32.vlgmr.msra.gmra.mrb[10].mxu1 %vm1203_vm5, %v1200_v31 }
 0x30f   : > { %v3616_v38 = vpop.eup %3615  ;;  %3388 = vmatpush3.msk.msra.mxu1 %vm1207_vm3, %v856_v33  ;;  %3389 = vmatprep.mubr.msk.f32.mxu1 %vm3658_vm1, %v3657_v24 }
 0x310   : > { %v3618_v39 = vpop.eup %3617  ;;  %v1199_v40 = vmul.f32 %v3616_v38, %v3608_v11  ;;  %3542 = vmatprep.subr.bf16.mxu1 %v3541_v32 }
 0x311   : > { %v1202_v42 = vmul.f32 %v3618_v39, %v3610_v12 }
 0x312   : > { %3375 = vmatmul.mubr.msk.f32.vlgmr.msra.gmra.mrb[4].mxu0 %vm1203_vm5, %v1199_v40 }
 0x313   : > { %v3620_v47 = vpop.eup %3619  ;;  %3383 = vmatpush3.msk.msra.mxu0 %vm1207_vm3, %v3866_v41  ;;  %3390 = vmatmul.mubr.msk.f32.vlgmr.msra.gmra.mrb[12].mxu1 %vm1203_vm5, %v1202_v42  ;;  %v580_v41 = vld [vmem:[%s4141_s5 + $0x20] sm:$0xff] }
 0x314   : > { %v1201_v48 = vmul.f32 %v3620_v47, %v3612_v21  ;;  %3544 = vmatpush3.bf16.msra.mxu1 %v3541_v32  ;;  %3384 = vmatprep.mubr.msk.f32.mxu0 %vm3658_vm1, %v3657_v24  ;;  %v3549_v51 = vpack.c.bf16 %v581_v50, %v580_v41 }
 0x315   : > { %3534 = vmatprep.subr.bf16.mxu0 %v3533_v43  ;;  %3546 = vmatprep.subr.bf16.mxu1 %v3545_v44 }
 0x316   : > { %3385 = vmatmul.mubr.msk.f32.vlgmr.msra.gmra.mrb[6].mxu0 %vm1203_vm5, %v1201_v48  ;;  %3411 = vmatprep.mubr.msk.f32.mxu1 %vm603_vm0, %v3805_v17 }
 0x317   : > { %3536 = vmatpush3.bf16.msra.mxu0 %v3533_v43  ;;  %3400 = vmatprep.mubr.msk.f32.mxu0 %vm603_vm0, %v3805_v17 }
 0x318   : > { %3548 = vmatpush3.bf16.msra.mxu1 %v3545_v44  ;;  %3538 = vmatprep.subr.bf16.mxu0 %v3537_v49 }
 0x319   : > { %3425 = vmatprep.subr.mxu1 %v3657_v24 }
 0x31b   : > { %3412 = vmatmul.mubr.msk.f32.vlgmr.msra.gmra.mrb[14].mxu1 %vm603_vm0, %v3811_v19  ;;  %3540 = vmatpush3.bf16.msra.mxu0 %v3537_v49 }
 0x31c   : > { %3427 = vmatprep.mubr.msk.f32.mxu1 %vm3658_vm1, %v3657_v24  ;;  %3550 = vmatprep.subr.bf16.mxu0 %v3549_v51 }
 0x31e   : > { %3401 = vmatmul.mubr.msk.f32.vlgmr.msra.gmra.mrb[8].mxu0 %vm603_vm0, %v3811_v19 }
 0x31f   : > { %3422 = vmatprep.mubr.msk.f32.mxu0 %vm603_vm0, %v3805_v17  ;;  %3552 = vmatpush3.bf16.msra.mxu0 %v3549_v51  ;;  %v3553_v17 = vpack.c.bf16 %v583_v53, %v582_v52 }
 0x321   : > { %3554 = vmatprep.subr.bf16.mxu0 %v3553_v17 }
 0x323   : > { %3556 = vmatpush3.bf16.msra.mxu0 %v3553_v17 }
 0x324   : > { %3435 = vmatprep.subr.mxu0 %v3657_v24 }
 0x326   : > { %3423 = vmatmul.mubr.msk.f32.vlgmr.msra.gmra.mrb[10].mxu0 %vm603_vm0, %v3811_v19 }
 0x327   : > { %3437 = vmatprep.mubr.msk.f32.mxu0 %vm3658_vm1, %v3657_v24 }
 0x3e1   : > { %v3947_v54 = vpop.f32.mrb[10].mxu1 }
 0x3e2   : > { %v3381_v55 = vpop.f32.mrb[11].mxu1 }
 0x3e5   : > { %v3949_v56 = vpop.f32.mrb[4].mxu0 }
 0x3e6   : > { %v2493_v57 = vcombine.low %v3949_v56, %v3947_v54  ;;  %v3953_v58 = vpop.f32.mrb[12].mxu1  ;;  %v3376_v59 = vpop.f32.mrb[5].mxu0 }
 0x3e7   : > { %v3391_v60 = vpop.f32.mrb[13].mxu1 }
 0x3e9   : > { %v3955_v61 = vpop.f32.mrb[6].mxu0 }
 0x3ea   : > { %v2494_v19 = vcombine.low %v3955_v61, %v3953_v58  ;;  %v3386_v62 = vpop.f32.mrb[7].mxu0 }
 0x3ee   : > { %v3413_v0 = vpop.f32.mrb[14].mxu1 }
 0x3ef   : > { %v1668_v1 = vadd.f32 %v3413_v0, %v3188_v63  ;;  %v1662_v2 = vpop.f32.mrb[15].mxu1 }
 0x3f0   : > { %v1663_v4 = vadd.f32 %v3188_v63, %v1662_v2 }
 0x3f1   : > { %v3402_v5 = vpop.f32.mrb[8].mxu0  ;;  %3436 = vmatpush3.xpose.msk.msra.mxu0 %vm857_vm2, %v1668_v1  ;;  %v1674_v11 = vcombine.high %v1668_v1, %v1668_v1 }
 0x3f2   : > { %v1583_v6 = vadd.f32 %v3402_v5, %v3185_v3  ;;  %3426 = vmatpush3.xpose.msk.msra.mxu1 %vm857_vm2, %v1663_v4  ;;  %v1577_v7 = vpop.f32.mrb[9].mxu0  ;;  %3445 = vmatprep.subr.mxu0 %v3657_v24  ;;  %v1673_v9 = vcombine.high %v1663_v4, %v1663_v4 }
 0x3f3   : > { %v1578_v8 = vadd.f32 %v3185_v3, %v1577_v7  ;;  %3430 = vmatprep.subr.mxu1 %v3657_v24 }
 0x3f4   : > { %3438 = vmatmul.mubr.msk.f32.vlgmr.msra.gmra.mrb[12].mxu0 %vm857_vm2, %v1583_v6  ;;  %v1589_v12 = vcombine.high %v1583_v6, %v1583_v6 }
 0x3f5   : > { %3428 = vmatmul.mubr.msk.f32.vlgmr.msra.gmra.mrb[16].mxu1 %vm857_vm2, %v1578_v8  ;;  %3447 = vmatprep.mubr.msk.f32.mxu0 %vm3658_vm1, %v3657_v24  ;;  %v1588_v10 = vcombine.high %v1578_v8, %v1578_v8 }
 0x3f6   : > { %3431 = vmatpush3.xpose.msk.msra.mxu1 %vm857_vm2, %v1673_v9  ;;  %3432 = vmatprep.mubr.msk.f32.mxu1 %vm3658_vm1, %v3657_v24 }
 0x3f7   : > { %3440 = vmatprep.subr.mxu1 %v3657_v24 }
 0x3f9   : > { %3433 = vmatmul.mubr.msk.f32.vlgmr.msra.gmra.mrb[18].mxu1 %vm857_vm2, %v1588_v10  ;;  %v3424_v20 = vpop.f32.mrb[10].mxu0 }
 0x3fa   : > { %3441 = vmatpush3.xpose.msk.msra.mxu1 %vm857_vm2, %v1674_v11  ;;  %3442 = vmatprep.mubr.msk.f32.mxu1 %vm3658_vm1, %v3657_v24  ;;  %v3988_v21 = vadd.f32 %v3424_v20, %v3191_v13  ;;  %v1747_v22 = vpop.f32.mrb[11].mxu0 }
 0x3fb   : > { %3450 = vmatprep.subr.mxu1 %v3657_v24  ;;  %v1748_v23 = vadd.f32 %v3191_v13, %v1747_v22  ;;  %v588_v22 = vld [vmem:[%s4143_s7 + $0x10] sm:$0xff] }
 0x3fd   : > { %3443 = vmatmul.mubr.msk.f32.vlgmr.msra.gmra.mrb[20].mxu1 %vm857_vm2, %v1589_v12  ;;  %v1758_v25 = vcombine.high %v1748_v23, %v1748_v23  ;;  %3446 = vmatpush3.msk.msra.mxu0 %vm1207_vm3, %v1748_v23  ;;  %v1759_v12 = vcombine.high %v3988_v21, %v3988_v21 }
 0x3fe   : > { %3452 = vmatprep.mubr.msk.f32.mxu1 %vm3658_vm1, %v3657_v24  ;;  %3455 = vmatprep.subr.mxu0 %v3657_v24 }
 0x3ff   : > { %3451 = vmatpush3.msk.msra.mxu1 %vm1207_vm3, %v1758_v25  ;;  %v586_v25 = vld [vmem:[%s4143_s7] sm:$0xff] }
 0x400   : > { %3460 = vmatprep.subr.mxu1 %v3657_v24 }
 0x4c7   : > { %v1978_v26 = vpop.f32.mrb[12].mxu0 }
 0x4c8   : > { %v1830_v27 = vpop.f32.mrb[16].mxu1  ;;  %v3439_v28 = vpop.f32.mrb[13].mxu0  ;;  %v2058_v31 = vmul.f32 0.25, %v1978_v26 }
 0x4c9   : > { %v2056_v29 = vmul.f32 0.25, %v1830_v27  ;;  %v3429_v30 = vpop.f32.mrb[17].mxu1 }
 0x4ca   : > { %v2066_v36 = vsel %vm1158_vm4, %v2058_v31, -inf }
 0x4cb   : > { %v2060_v32 = vsel %vm1158_vm4, %v2056_v29, -inf }
 0x4cc   : > { %2061 = vmax.xlane.f32.xlu0 %v2060_v32  ;;  %v1904_v33 = vpop.f32.mrb[18].mxu1 }
 0x4cd   : > { %v2057_v34 = vmul.f32 0.25, %v1904_v33  ;;  %v3434_v35 = vpop.f32.mrb[19].mxu1 }
 0x4cf   : > { %v2063_v37 = vsel %vm1158_vm4, %v2057_v34, -inf }
 0x4d0   : > { %2067 = vmax.xlane.f32.xlu0 %v2066_v36  ;;  %2064 = vmax.xlane.f32.xlu1 %v2063_v37  ;;  %v2052_v38 = vpop.f32.mrb[20].mxu1  ;;  %v3214_v37 = vld [vmem:[%s4144_s8] ss:$0 sm:$0xff] }
 0x4d1   : > { %v2059_v39 = vmul.f32 0.25, %v2052_v38  ;;  %v3444_v40 = vpop.f32.mrb[21].mxu1 }
 0x4d3   : > { %v2069_v42 = vsel %vm1158_vm4, %v2059_v39, -inf }
 0x4d4   : > { %2070 = vmax.xlane.f32.xlu1 %v2069_v42 }
 0x559   : > { %v2062_v43 = vpop.xlane.xlu0 %2061 }
 0x55a   : > { %v2072_v44 = vsub.f32 %v2056_v29, %v2062_v43 }
 0x55c   : > { %v2076_v45 = vmul.f32 1.442695, %v2072_v44 }
 0x55d   : > { %v2068_v46 = vpop.xlane.xlu0 %2067  ;;  %v2065_v47 = vpop.xlane.xlu1 %2064 }
 0x55e   : > { %3621 = vpow2.f32 %v2076_v45  ;;  %v2074_v48 = vsub.f32 %v2058_v31, %v2068_v46  ;;  %v2073_v49 = vsub.f32 %v2057_v34, %v2065_v47  ;;  %v3659_v47 = vmov 839922192  }
 0x560   : > { %v2080_v41 = vmul.f32 1.442695, %v2074_v48  ;;  %v2078_v50 = vmul.f32 1.442695, %v2073_v49  ;;  %v2614_v48 = vunpack.c.l.s4 %v3659_v47  ;;  %v2616_v49 = vlaneseq }
 0x561   : > { %v2071_v51 = vpop.xlane.xlu1 %2070 }
 0x562   : > { %3623 = vpow2.f32 %v2080_v41  ;;  %v2075_v52 = vsub.f32 %v2059_v39, %v2071_v51  ;;  %v3660_v41 = vmov 1985246804   ;;  %v2617_v51 = vshrl.u32 %v2616_v49, 7  ;;  %v2740_v49 = vld [vmem:[%s4149_s13] sm:$0xff] }
 0x563   : > { %3625 = vpow2.f32 %v2078_v50  ;;  %v2621_v50 = vunpack.c.l.s4 %v3660_v41  ;;  %v2741_v41 = vld [vmem:[%s4149_s13 + $0x8] sm:$0xff] }
 0x564   : > { %v2082_v53 = vmul.f32 1.442695, %v2075_v52 }
 0x566   : > { %3627 = vpow2.f32 %v2082_v53 }
 0x568   : > { %v3622_v17 = vpop.eup %3621 }
 0x569   : > { %v2084_v55 = vsel %vm1158_vm4, %v3622_v17, 0.0 }
 0x56a   : > { %2085 = vadd.xlane.f32.xlu0 %v2084_v55 }
 0x56c   : > { %v3624_v59 = vpop.eup %3623 }
 0x56d   : > { %v3626_v60 = vpop.eup %3625  ;;  %v2090_v62 = vsel %vm1158_vm4, %v3624_v59, 0.0 }
 0x56e   : > { %2091 = vadd.xlane.f32.xlu0 %v2090_v62  ;;  %v2087_v63 = vsel %vm1158_vm4, %v3626_v60, 0.0 }
 0x56f   : > { %2088 = vadd.xlane.f32.xlu1 %v2087_v63 }
 0x570   : > { %v3628_v0 = vpop.eup %3627 }
 0x571   : > { %v2093_v1 = vsel %vm1158_vm4, %v3628_v0, 0.0 }
 0x573   : > { %2094 = vadd.xlane.f32.xlu1 %v2093_v1 }
 0x5f7   : > { %v2086_v2 = vpop.xlane.xlu0 %2085 }
 0x5f8   : > { %3629 = vrcp.f32 %v2086_v2 }
 0x5fb   : > { %v2092_v3 = vpop.xlane.xlu0 %2091 }
 0x5fc   : > { %3631 = vrcp.f32 %v2092_v3  ;;  %v2089_v4 = vpop.xlane.xlu1 %2088 }
 0x5fd   : > { %3633 = vrcp.f32 %v2089_v4 }
 0x600   : > { %v2095_v5 = vpop.xlane.xlu1 %2094 }
 0x601   : > { %3635 = vrcp.f32 %v2095_v5 }
 0x602   : > { %v3630_v6 = vpop.eup %3629 }
 0x603   : > { %v2100_v7 = vmul.f32 %v3630_v6, %v3622_v17 }
 0x605   : > { %3448 = vmatmul.mubr.msk.f32.vlgmr.msra.gmra.mrb[14].mxu0 %vm1203_vm5, %v2100_v7 }
 0x606   : > { %v3632_v8 = vpop.eup %3631  ;;  %3456 = vmatpush3.msk.msra.mxu0 %vm1207_vm3, %v3988_v21  ;;  %3457 = vmatprep.mubr.msk.f32.mxu0 %vm3658_vm1, %v3657_v24  ;;  %v589_v21 = vld [vmem:[%s4143_s7 + $0x18] sm:$0xff] }
 0x607   : > { %v3634_v9 = vpop.eup %3633  ;;  %v2102_v10 = vmul.f32 %v3632_v8, %v3624_v59  ;;  %v3557_v23 = vpack.c.bf16 %v589_v21, %v588_v22  ;;  %v2738_v21 = vld [vmem:[%s4147_s11 + $0x18] sm:$0xff] }
 0x608   : > { %v2101_v11 = vmul.f32 %v3634_v9, %v3626_v60 }
 0x609   : > { %3458 = vmatmul.mubr.msk.f32.vlgmr.msra.gmra.mrb[16].mxu0 %vm1203_vm5, %v2102_v10  ;;  %3558 = vmatprep.subr.bf16.mxu0 %v3557_v23 }
 0x60a   : > { %3453 = vmatmul.mubr.msk.f32.vlgmr.msra.gmra.mrb[22].mxu1 %vm1203_vm5, %v2101_v11  ;;  %3560 = vmatpush3.bf16.msra.mxu0 %v3557_v23 }
 0x60b   : > { %v3636_v13 = vpop.eup %3635  ;;  %3461 = vmatpush3.msk.msra.mxu1 %vm1207_vm3, %v1759_v12  ;;  %3462 = vmatprep.mubr.msk.f32.mxu1 %vm3658_vm1, %v3657_v24  ;;  %v587_v24 = vld [vmem:[%s4143_s7 + $0x8] sm:$0xff]  ;;  %v2735_v12 = vld [vmem:[%s4147_s11] sm:$0xff] }
 0x60c   : > { %v2103_v20 = vmul.f32 %v3636_v13, %v3628_v0  ;;  %v3561_v26 = vpack.c.bf16 %v587_v24, %v586_v25  ;;  %v2736_v13 = vld [vmem:[%s4147_s11 + $0x8] sm:$0xff] }
 0x60d   : > { %v3565_v22 = vpack.c.bf16 %v2736_v13, %v2735_v12  ;;  %v3220_v13 = vld [vmem:[%s4150_s14] ss:$0 sm:$0xff] }
 0x60e   : > { %3463 = vmatmul.mubr.msk.f32.vlgmr.msra.gmra.mrb[24].mxu1 %vm1203_vm5, %v2103_v20  ;;  %3562 = vmatprep.subr.bf16.mxu0 %v3561_v26  ;;  %v2737_v20 = vld [vmem:[%s4147_s11 + $0x10] sm:$0xff] }
 0x60f   : > { %v3569_v23 = vpack.c.bf16 %v2738_v21, %v2737_v20  ;;  %3566 = vmatprep.subr.bf16.mxu1 %v3565_v22 }
 0x610   : > { %3568 = vmatpush3.bf16.msra.mxu1 %v3565_v22 }
 0x611   : > { %3570 = vmatprep.subr.bf16.mxu1 %v3569_v23 }
 0x614   : > { %3572 = vmatpush3.bf16.msra.mxu1 %v3569_v23 }
 0x6d8   : > { %v2175_v27 = vpop.f32.mrb[14].mxu0 }
 0x6d9   : > { %v3449_v28 = vpop.f32.mrb[15].mxu0 }
 0x6dc   : > { %v2325_v29 = vpop.f32.mrb[16].mxu0 }
 0x6dd   : > { %v2250_v30 = vpop.f32.mrb[22].mxu1  ;;  %v3459_v31 = vpop.f32.mrb[17].mxu0 }
 0x6de   : > { %v2408_v32 = vcombine.low %v2175_v27, %v2250_v30  ;;  %v3454_v33 = vpop.f32.mrb[23].mxu1  ;;  %v3215_v30 = vld [vmem:[%s4145_s9] ss:$0 sm:$0xff] }
 0x6e0   : > { %3469 = vmatprep.mubr.msk.f32.mxu0 %vm857_vm2, %v2408_v32  ;;  %v3216_v32 = vld [vmem:[%s4146_s10] ss:$0 sm:$0xff] }
 0x6e1   : > { %v2400_v34 = vpop.f32.mrb[24].mxu1 }
 0x6e2   : > { %v2409_v35 = vcombine.low %v2325_v29, %v2400_v34  ;;  %v3464_v36 = vpop.f32.mrb[25].mxu1 }
 0x6e3   : > { %v2717_v36 = vcombine.high %v3215_v30, %v3215_v30 }
 0x6e4   : > { %3470 = vmatmul.mubr.msk.f32.vlgmr.msra.gmra.mrb[18].mxu0 %vm857_vm2, %v2409_v35 }
 0x6e5   : > { %3564 = vmatpush3.bf16.msra.mxu0 %v3561_v26  ;;  %3476 = vmatprep.mubr.msk.f32.mxu0 %vm857_vm2, %v2493_v57 }
 0x6ec   : > { %3477 = vmatmul.mubr.msk.f32.vlgmr.msra.gmra.mrb[18].mxu0 %vm857_vm2, %v2494_v19 }
 0x7bf   : > { %v3478_v38 = vpop.f32.mrb[18].mxu0 }
 0x7c0   : > { %v2581_v39 = vadd.f32 %v3478_v38, %v3214_v37  ;;  %v2565_v40 = vpop.f32.mrb[19].mxu0 }
 0x7c1   : > { %v2580_v42 = vadd.f32 %v3214_v37, %v2565_v40 }
 0x7c2   : > { %v2585_v43 = vcombine.high %v2581_v39, %v2581_v39  ;;  %v2590_v45 = vadd.f32 %v2581_v39, %v3801_v16  ;;  %v2615_v16 = vunpack.c.0.s8 %v2614_v48 }
 0x7c3   : > { %v2584_v44 = vcombine.high %v2580_v42, %v2580_v42  ;;  %v2588_v56 = vadd.f32 %v2580_v42, %v3797_v14  ;;  %v2729_v42 = vcombine.high %v3216_v32, %v3216_v32 }
 0x7c4   : > { %v2591_v54 = vadd.f32 %v2585_v43, %v3807_v18  ;;  %v2622_v18 = vunpack.c.0.s8 %v2621_v50  ;;  %v4046_v52 = vsub.s32 %v2615_v16, %v2617_v51  ;;  %v3573_v50 = vpack.c.bf16 %v2741_v41, %v2740_v49  ;;  %v2742_v16 = vld [vmem:[%s4149_s13 + $0x10] sm:$0xff] }
 0x7c5   : > { %v2589_v57 = vadd.f32 %v2584_v44, %v3799_v15 }
 0x7c6   : > { %v2599_v58 = vcombine.low %v2590_v45, %v2591_v54  ;;  %v4048_v14 = vsub.s32 %v2622_v18, %v2617_v51  ;;  %3574 = vmatprep.subr.bf16.mxu0 %v3573_v50  ;;  %v2743_v51 = vld [vmem:[%s4149_s13 + $0x18] sm:$0xff] }
 0x7c7   : > { %v2598_v61 = vcombine.low %v2588_v56, %v2589_v57  ;;  %3576 = vmatpush3.bf16.msra.mxu0 %v3573_v50  ;;  %v3577_v18 = vpack.c.bf16 %v2743_v51, %v2742_v16 }
 0x7c8   : > { %v2605_v19 = vsel %vm603_vm0, %v2599_v58, 0.0 }
 0x7c9   : > { %2606 = vadd.xlane.f32.xlu1 %v2605_v19  ;;  %v2602_v46 = vsel %vm603_vm0, %v2598_v61, 0.0  ;;  %3578 = vmatprep.subr.bf16.mxu0 %v3577_v18 }
 0x7ca   : > { %2603 = vadd.xlane.f32.xlu0 %v2602_v46 }
 0x7cb   : > { %3580 = vmatpush3.bf16.msra.mxu0 %v3577_v18 }
 0x856   : > { %v2607_v15 = vpop.xlane.xlu1 %2606 }
 0x857   : > { %v2610_v53 = vmul.f32 0.03125, %v2607_v15  ;;  %v2604_v17 = vpop.xlane.xlu0 %2603  ;;  %v2744_v15 = vld [vmem:[%s4149_s13 + $0x20] sm:$0xff] }
 0x858   : > { %v2609_v55 = vmul.f32 0.03125, %v2604_v17 }
 0x859   : > { %v2633_v59 = vrot.slane %v2610_v53, %v4046_v52  ;;  %v2640_v60 = vrot.slane %v2610_v53, %v4048_v14  ;;  %v2745_v53 = vld [vmem:[%s4149_s13 + $0x28] sm:$0xff] }
 0x85a   : > { %v2619_v62 = vrot.slane %v2609_v55, %v4046_v52  ;;  %v2626_v63 = vrot.slane %v2609_v55, %v4048_v14  ;;  %v3581_v17 = vpack.c.bf16 %v2745_v53, %v2744_v15  ;;  %v2746_v55 = vld [vmem:[%s4149_s13 + $0x30] sm:$0xff]  ;;  %v3223_v15 = vld [vmem:[%s4151_s15] ss:$0 sm:$0xff] }
 0x85b   : > { %v2647_v0 = vsub.f32 %v2590_v45, %v2633_v59  ;;  %v2648_v1 = vsub.f32 %v2591_v54, %v2640_v60  ;;  %v2747_v59 = vld [vmem:[%s4149_s13 + $0x38] sm:$0xff] }
 0x85c   : > { %v2645_v2 = vsub.f32 %v2588_v56, %v2619_v62  ;;  %v2646_v3 = vsub.f32 %v2589_v57, %v2626_v63  ;;  %3582 = vmatprep.subr.bf16.mxu0 %v3581_v17  ;;  %v3585_v60 = vpack.c.bf16 %v2747_v59, %v2746_v55  ;;  %v3217_v62 = vld [vmem:[%s4148_s12] ss:$0 sm:$0xff] }
 0x85d   : > { %v2651_v4 = vmul.f32 %v2647_v0, %v2647_v0  ;;  %v2652_v5 = vmul.f32 %v2648_v1, %v2648_v1  ;;  %3584 = vmatpush3.bf16.msra.mxu0 %v3581_v17  ;;  %v3224_v55 = vld [vmem:[%s4152_s16] ss:$0 sm:$0xff] }
 0x85e   : > { %v2649_v6 = vmul.f32 %v2645_v2, %v2645_v2  ;;  %v2650_v7 = vmul.f32 %v2646_v3, %v2646_v3  ;;  %3586 = vmatprep.subr.bf16.mxu0 %v3585_v60 }
 0x85f   : > { %v2658_v8 = vcombine.low %v2651_v4, %v2652_v5 }
 0x860   : > { %v2657_v9 = vcombine.low %v2649_v6, %v2650_v7 }
 0x861   : > { %v2664_v10 = vsel %vm603_vm0, %v2658_v8, 0.0  ;;  %3588 = vmatpush3.bf16.msra.mxu0 %v3585_v60 }
 0x862   : > { %2665 = vadd.xlane.f32.xlu1 %v2664_v10  ;;  %v2661_v11 = vsel %vm603_vm0, %v2657_v9, 0.0 }
 0x863   : > { %2662 = vadd.xlane.f32.xlu0 %v2661_v11 }
 0x8ef   : > { %v2666_v25 = vpop.xlane.xlu1 %2665 }
 0x8f0   : > { %v2668_v24 = vmul.f32 0.03125, %v2666_v25  ;;  %v2663_v26 = vpop.xlane.xlu0 %2662 }
 0x8f1   : > { %v2667_v27 = vmul.f32 0.03125, %v2663_v26 }
 0x8f2   : > { %v2670_v28 = vadd.f32 1e-05, %v2668_v24 }
 0x8f3   : > { %v2669_v29 = vadd.f32 1e-05, %v2667_v27 }
 0x8f4   : > { %3637 = vrsqrt.f32 %v2670_v28 }
 0x8f5   : > { %3639 = vrsqrt.f32 %v2669_v29 }
 0x8fe   : > { %v3638_v31 = vpop.eup %3637 }
 0x8ff   : > { %v3640_v33 = vpop.eup %3639  ;;  %v2695_v34 = vrot.slane %v3638_v31, %v4046_v52  ;;  %v2702_v35 = vrot.slane %v3638_v31, %v4048_v14 }
 0x900   : > { %v2681_v37 = vrot.slane %v3640_v33, %v4046_v52  ;;  %v2688_v38 = vrot.slane %v3640_v33, %v4048_v14 }
 0x901   : > { %v2709_v39 = vmul.f32 %v2695_v34, %v2647_v0  ;;  %v2710_v40 = vmul.f32 %v2702_v35, %v2648_v1 }
 0x902   : > { %v2707_v43 = vmul.f32 %v2681_v37, %v2645_v2  ;;  %v2708_v44 = vmul.f32 %v2688_v38, %v2646_v3 }
 0x903   : > { %v2722_v45 = vmul.f32 %v2717_v36, %v2710_v40  ;;  %v2721_v54 = vmul.f32 %v3215_v30, %v2709_v39 }
 0x904   : > { %v2719_v56 = vmul.f32 %v3215_v30, %v2707_v43  ;;  %v2720_v57 = vmul.f32 %v2717_v36, %v2708_v44 }
 0x905   : > { %v2734_v58 = vadd.f32 %v2729_v42, %v2722_v45  ;;  %v2733_v61 = vadd.f32 %v3216_v32, %v2721_v54 }
 0x906   : > { %v2731_v19 = vadd.f32 %v3216_v32, %v2719_v56  ;;  %v2732_v46 = vadd.f32 %v2729_v42, %v2720_v57 }
 0x907   : > { %v2760_v48 = vcombine.low %v2733_v61, %v2734_v58 }
 0x908   : > { %v2759_v47 = vcombine.low %v2731_v19, %v2732_v46 }
 0x90a   : > { %3487 = vmatprep.mubr.msk.f32.mxu1 %vm603_vm0, %v2759_v47 }
 0x90b   : > { %3488 = vmatmul.mubr.msk.f32.vlgmr.msra.gmra.mrb[26].mxu1 %vm603_vm0, %v2760_v48 }
 0x9de   : > { %v3489_v63 = vpop.f32.mrb[26].mxu1 }
 0x9df   : > { %v2837_v0 = vadd.f32 %v3489_v63, %v3217_v62  ;;  %v2831_v1 = vpop.f32.mrb[27].mxu1 }
 0x9e0   : > { %v2832_v2 = vadd.f32 %v3217_v62, %v2831_v1  ;;  %v3072_v62 = vcombine.high %v3223_v15, %v3223_v15 }
 0x9e1   : > { %v2843_v3 = vmul.f32 0.70710677, %v2837_v0  ;;  %v2841_v10 = vmul.f32 0.5, %v2837_v0 }
 0x9e2   : > { %v2842_v4 = vmul.f32 0.70710677, %v2832_v2  ;;  %v2840_v8 = vmul.f32 0.5, %v2832_v2 }
 0x9e3   : > { %3641 = verf.f32 %v2843_v3  ;;  %v3084_v3 = vcombine.high %v3224_v55, %v3224_v55 }
 0x9e4   : > { %3643 = verf.f32 %v2842_v4 }
 0x9ed   : > { %v3642_v5 = vpop.eup %3641 }
 0x9ee   : > { %v3644_v6 = vpop.eup %3643  ;;  %v2847_v7 = vadd.f32 1.0, %v3642_v5 }
 0x9ef   : > { %v2846_v9 = vadd.f32 1.0, %v3644_v6 }
 0x9f0   : > { %v2849_v12 = vmul.f32 %v2847_v7, %v2841_v10 }
 0x9f1   : > { %v2848_v11 = vmul.f32 %v2846_v9, %v2840_v8 }
 0x9f3   : > { %3506 = vmatprep.mubr.msk.f32.mxu0 %vm2856_vm6, %v2848_v11 }
 0x9f4   : > { %3507 = vmatmul.mubr.msk.f32.vlgmr.msra.gmra.mrb[20].mxu0 %vm2856_vm6, %v2849_v12 }
 0xac7   : > { %v3508_v20 = vpop.f32.mrb[20].mxu0 }
 0xac8   : > { %v2935_v22 = vadd.f32 %v3508_v20, %v3220_v13  ;;  %v2929_v21 = vpop.f32.mrb[21].mxu0 }
 0xac9   : > { %v2930_v23 = vadd.f32 %v3220_v13, %v2929_v21 }
 0xaca   : > { %v2941_v25 = vcombine.high %v2935_v22, %v2935_v22  ;;  %v2946_v26 = vadd.f32 %v2935_v22, %v2733_v61 }
 0xacb   : > { %v2940_v24 = vcombine.high %v2930_v23, %v2930_v23  ;;  %v2944_v28 = vadd.f32 %v2930_v23, %v2731_v19 }
 0xacc   : > { %v2947_v27 = vadd.f32 %v2941_v25, %v2734_v58 }
 0xacd   : > { %v2945_v29 = vadd.f32 %v2940_v24, %v2732_v46 }
 0xace   : > { %v2955_v30 = vcombine.low %v2946_v26, %v2947_v27 }
 0xacf   : > { %v2954_v31 = vcombine.low %v2944_v28, %v2945_v29 }
 0xad0   : > { %v2961_v32 = vsel %vm603_vm0, %v2955_v30, 0.0 }
 0xad1   : > { %2962 = vadd.xlane.f32.xlu1 %v2961_v32  ;;  %v2958_v33 = vsel %vm603_vm0, %v2954_v31, 0.0 }
 0xad2   : > { %2959 = vadd.xlane.f32.xlu0 %v2958_v33 }
 0xb5e   : > { %v2963_v34 = vpop.xlane.xlu1 %2962 }
 0xb5f   : > { %v2965_v35 = vmul.f32 0.03125, %v2963_v34  ;;  %v2960_v36 = vpop.xlane.xlu0 %2959 }
 0xb60   : > { %v2964_v37 = vmul.f32 0.03125, %v2960_v36 }
 0xb61   : > { %v2988_v38 = vrot.slane %v2965_v35, %v4046_v52  ;;  %v2995_v39 = vrot.slane %v2965_v35, %v4048_v14 }
 0xb62   : > { %v2974_v40 = vrot.slane %v2964_v37, %v4046_v52  ;;  %v2981_v42 = vrot.slane %v2964_v37, %v4048_v14 }
 0xb63   : > { %v3002_v43 = vsub.f32 %v2946_v26, %v2988_v38  ;;  %v3003_v44 = vsub.f32 %v2947_v27, %v2995_v39 }
 0xb64   : > { %v3000_v45 = vsub.f32 %v2944_v28, %v2974_v40  ;;  %v3001_v54 = vsub.f32 %v2945_v29, %v2981_v42 }
 0xb65   : > { %v3006_v56 = vmul.f32 %v3002_v43, %v3002_v43  ;;  %v3007_v57 = vmul.f32 %v3003_v44, %v3003_v44 }
 0xb66   : > { %v3004_v58 = vmul.f32 %v3000_v45, %v3000_v45  ;;  %v3005_v61 = vmul.f32 %v3001_v54, %v3001_v54 }
 0xb67   : > { %v3013_v19 = vcombine.low %v3006_v56, %v3007_v57 }
 0xb68   : > { %v3012_v46 = vcombine.low %v3004_v58, %v3005_v61 }
 0xb69   : > { %v3019_v47 = vsel %vm603_vm0, %v3013_v19, 0.0 }
 0xb6a   : > { %3020 = vadd.xlane.f32.xlu1 %v3019_v47  ;;  %v3016_v48 = vsel %vm603_vm0, %v3012_v46, 0.0 }
 0xb6b   : > { %3017 = vadd.xlane.f32.xlu0 %v3016_v48 }
 0xbf7   : > { %v3021_v49 = vpop.xlane.xlu1 %3020 }
 0xbf8   : > { %v3023_v41 = vmul.f32 0.03125, %v3021_v49  ;;  %v3018_v50 = vpop.xlane.xlu0 %3017 }
 0xbf9   : > { %v3022_v16 = vmul.f32 0.03125, %v3018_v50 }
 0xbfa   : > { %v3025_v51 = vadd.f32 1e-05, %v3023_v41 }
 0xbfb   : > { %v3024_v18 = vadd.f32 1e-05, %v3022_v16 }
 0xbfc   : > { %3645 = vrsqrt.f32 %v3025_v51 }
 0xbfd   : > { %3647 = vrsqrt.f32 %v3024_v18 }
 0xc06   : > { %v3646_v53 = vpop.eup %3645 }
 0xc07   : > { %v3648_v17 = vpop.eup %3647  ;;  %v3050_v59 = vrot.slane %v3646_v53, %v4046_v52  ;;  %v3057_v60 = vrot.slane %v3646_v53, %v4048_v14 }
 0xc08   : > { %v3036_v63 = vrot.slane %v3648_v17, %v4046_v52  ;;  %v3043_v0 = vrot.slane %v3648_v17, %v4048_v14 }
 0xc09   : > { %v3064_v1 = vmul.f32 %v3050_v59, %v3002_v43  ;;  %v3065_v2 = vmul.f32 %v3057_v60, %v3003_v44 }
 0xc0a   : > { %v3062_v4 = vmul.f32 %v3036_v63, %v3000_v45  ;;  %v3063_v5 = vmul.f32 %v3043_v0, %v3001_v54 }
 0xc0b   : > { %v3076_v6 = vmul.f32 %v3223_v15, %v3064_v1  ;;  %v3077_v9 = vmul.f32 %v3072_v62, %v3065_v2 }
 0xc0c   : > { %v3074_v7 = vmul.f32 %v3223_v15, %v3062_v4  ;;  %v3075_v8 = vmul.f32 %v3072_v62, %v3063_v5 }
 0xc0d   : > { %v3088_v52 = vadd.f32 %v3224_v55, %v3076_v6  ;;  %v3089_v14 = vadd.f32 %v3084_v3, %v3077_v9 }
 0xc0e   : > { %v3086_v10 = vadd.f32 %v3224_v55, %v3074_v7  ;;  %v3087_v11 = vadd.f32 %v3084_v3, %v3075_v8 }
 0xc0f   : > { %3093 = vst.msk [vmem:[%s550_s29 + $0x8] sm:$0xf] %vm3090_vm7, %v3088_v52  ;;  %3094 = vst.msk [vmem:[%s550_s29 + $0xc] sm:$0xf] %vm3090_vm7, %v3089_v14 }
 0xc10   : > { %3091 = vst.msk [vmem:[%s550_s29] sm:$0xf] %vm3090_vm7, %v3086_v10  ;;  %3092 = vst.msk [vmem:[%s550_s29 + $0x4] sm:$0xf] %vm3090_vm7, %v3087_v11 }
 0xc11 PF: > { %s27_s24 = sadd.s32 1, %s3655_s24  }
 0xc12   : > { %p24_p4 = scmp.ge.s32.totalorder %s27_s24, 4  }
 0xc14   :  { %26 = sbr.rel (!%p24_p4) target bundleno = 3 (0x3), region = 118 }

// kernel: scale_block_forward.5
= control target key start
LH: loop header
LB: loop body
LE: loop exit
PB: predicated region body
PF: predicated region fallthrough
CT: control target
= control target key end

     0   :  { %s6457_s27 = smov 0   ;;  %s7107_s0 = inlined_call_operand.vmem [shape: f32[8,4,32], index: 0, kind: input, shape index: {}]   ;;  %s7108_s1 = inlined_call_operand.vmem [shape: f32[4,4,32], index: 1, kind: input, shape index: {}]   ;;  %s7109_s2 = inlined_call_operand.vmem [shape: f32[2,32,16], index: 2, kind: input, shape index: {}]   ;;  %s7110_s3 = inlined_call_operand.vmem [shape: f32[2,1,16], index: 3, kind: input, shape index: {}]   ;;  %s7111_s4 = inlined_call_operand.vmem [shape: f32[2,32,16], index: 4, kind: input, shape index: {}]   ;;  %s7112_s5 = inlined_call_operand.vmem [shape: f32[2,1,16], index: 5, kind: input, shape index: {}]   ;;  %s7113_s6 = inlined_call_operand.vmem [shape: f32[2,32,16], index: 6, kind: input, shape index: {}]   ;;  %s7114_s7 = inlined_call_operand.vmem [shape: f32[2,1,16], index: 7, kind: input, shape index: {}]   ;;  %s7115_s8 = inlined_call_operand.vmem [shape: f32[2,16,32], index: 8, kind: input, shape index: {}]   ;;  %s7116_s9 = inlined_call_operand.vmem [shape: f32[1,32], index: 9, kind: input, shape index: {}]   ;;  %s7117_s10 = inlined_call_operand.vmem [shape: f32[2,32,16], index: 10, kind: input, shape index: {}]   ;;  %s7118_s11 = inlined_call_operand.vmem [shape: f32[2,1,16], index: 11, kind: input, shape index: {}]   ;;  %s7119_s12 = inlined_call_operand.vmem [shape: f32[2,32,16], index: 12, kind: input, shape index: {}]   ;;  %s7120_s13 = inlined_call_operand.vmem [shape: f32[2,1,16], index: 13, kind: input, shape index: {}]   ;;  %s7121_s14 = inlined_call_operand.vmem [shape: f32[2,32,16], index: 14, kind: input, shape index: {}]   ;;  %s7122_s15 = inlined_call_operand.vmem [shape: f32[2,1,16], index: 15, kind: input, shape index: {}]   ;;  %s7123_s16 = inlined_call_operand.vmem [shape: f32[2,16,32], index: 16, kind: input, shape index: {}]   ;;  %s7124_s17 = inlined_call_operand.vmem [shape: f32[1,32], index: 17, kind: input, shape index: {}]   ;;  %s7125_s18 = inlined_call_operand.vmem [shape: f32[1,32], index: 18, kind: input, shape index: {}]   ;;  %s7126_s19 = inlined_call_operand.vmem [shape: f32[1,32], index: 19, kind: input, shape index: {}]   ;;  %s7127_s20 = inlined_call_operand.vmem [shape: f32[32,64], index: 20, kind: input, shape index: {}]   ;;  %s7128_s21 = inlined_call_operand.vmem [shape: f32[1,64], index: 21, kind: input, shape index: {}]   ;;  %s7129_s22 = inlined_call_operand.vmem [shape: f32[64,32], index: 22, kind: input, shape index: {}]   ;;  %s7130_s23 = inlined_call_operand.vmem [shape: f32[1,32], index: 23, kind: input, shape index: {}]   ;;  %s7131_s24 = inlined_call_operand.vmem [shape: f32[1,32], index: 24, kind: input, shape index: {}]   ;;  %s7132_s25 = inlined_call_operand.vmem [shape: f32[1,32], index: 25, kind: input, shape index: {}]   ;;  %s7133_s26 = inlined_call_operand.vmem [shape: f32[8,4,32], index: 26, kind: output, shape index: {}]  }
   0x1   :  { %7150 = sst [smem:[#allocation3_spill]] %s7107_s0 }
   0x2   :  { %7151 = sst [smem:[#allocation4_spill]] %s7108_s1 }
   0x3   :  { %7152 = sst [smem:[#allocation5_spill]] %s7109_s2 }
   0x4   :  { %7153 = sst [smem:[#allocation6_spill]] %s7110_s3 }
   0x5   :  { %7154 = sst [smem:[#allocation7_spill]] %s7111_s4 }
   0x6   :  { %7155 = sst [smem:[#allocation8_spill]] %s7112_s5 }
   0x7   :  { %7156 = sst [smem:[#allocation9_spill]] %s7113_s6 }
   0x8   :  { %7157 = sst [smem:[#allocation10_spill]] %s7114_s7 }
   0x9   :  { %7158 = sst [smem:[#allocation11_spill]] %s7115_s8 }
   0xa   :  { %7159 = sst [smem:[#allocation12_spill]] %s7116_s9 }
   0xb   :  { %7160 = sst [smem:[#allocation13_spill]] %s7117_s10 }
   0xc   :  { %7161 = sst [smem:[#allocation14_spill]] %s7133_s26 }
   0xd LB: > { %7162 = sst [smem:[#allocation2_spill]] %s6316_s27  ;;  %s5425_s3 = sadd.s32 4294967295, %s6316_s27   ;;  %s6316_s27 = sphi %s6457_s27, %s36_s27  }
   0xe   : > { %p5429_p0 = scmp.ge.s32.totalorder %s6316_s27, 1  ;;  %p713_p1 = scmp.lt.s32.totalorder %s6316_s27, 3 }
  0x10   : > { %p714_p2 = pnand %p5429_p0, %p713_p1 }
  0x11   : > { %s7163_s8 = sld [smem:[#allocation5_spill]] (!%p714_p2)  ;;  %vm850_vm0 = vcmask (!%p714_p2), 261120   ;;  %s5430_s30 = sshll.u32 (!%p714_p2), %s5425_s3, 2  ;;  %v6318_v26 = vmov (!%p714_p2), 0.0   ;;  %vm6319_vm1 = vmmov (!%p714_p2), 0   ;;  %vm1114_vm2 = vcmask (!%p714_p2), 130048  }
  0x12   : > { %717 = sbr.rel (%p714_p2) target bundleno = 5052 (0x13bc), region = 124  ;;  %p784_p3 = scmp.lt.s32.totalorder (!%p714_p2), %s5430_s30, 7  ;;  %vm1464_vm3 = vcmask (!%p714_p2), 1043456   ;;  %vm1415_vm4 = vcmask (!%p714_p2), 27648   ;;  %vm1460_vm5 = vcmask (!%p714_p2), 31744   ;;  %vm5130_vm6 = vcmask (!%p714_p2), 523264  }
  0x13   : > { %s7164_s1 = sld [smem:[#allocation4_spill]] (!%p714_p2)  ;;  %s7165_s4 = sld [smem:[#allocation7_spill]] (!%p714_p2)  ;;  %vm5364_vm7 = vcmask (!%p714_p2), 257024  }
  0x14   : > { %s7166_s2 = sld [smem:[#allocation9_spill]] (!%p714_p2)  ;;  %s7167_s3 = sld [smem:[#allocation3_spill]] (!%p714_p2) }
  0x15   : > { %s7169_s26 = sld [smem:[#allocation6_spill]] (!%p714_p2)  ;;  %s7170_s28 = sld [smem:[#allocation10_spill]] (!%p714_p2) }
  0x16   : > { %s7172_s29 = sld [smem:[#allocation13_spill]] (!%p714_p2)  ;;  %s7173_s6 = sld [smem:[#allocation12_spill]] (!%p714_p2) }
  0x17   : > { %v803_v0 = vld [vmem:[%s7163_s8] sm:$0xff] (!%p714_p2)  ;;  %v804_v1 = vld [vmem:[%s7163_s8 + $0x8] sm:$0xff] (!%p714_p2)  ;;  %v805_v2 = vld [vmem:[%s7163_s8 + $0x10] sm:$0xff] (!%p714_p2) }
  0x18   : > { %v6074_v3 = vpack.c.bf16 (!%p714_p2), %v804_v1, %v803_v0  ;;  %v806_v4 = vld [vmem:[%s7163_s8 + $0x18] sm:$0xff] (!%p714_p2) }
  0x19   : > { %v6078_v5 = vpack.c.bf16 %v806_v4, %v805_v2  ;;  %v6480_v6 = vld [vmem:[%s7164_s1] sm:$0xff]   ;;  %v814_v8 = vld [vmem:[%s7165_s4 + $0x8] sm:$0xff]  ;;  %s7178_s30 = smov (!%p784_p3, %s5430_s30), 7  ;;  %v815_v12 = vld [vmem:[%s7165_s4 + $0x10] sm:$0xff] }
  0x1a   : > { %6075 = vmatprep.subr.bf16.mxu1 %v6074_v3  ;;  %v813_v7 = vld [vmem:[%s7165_s4] sm:$0xff]  ;;  %5732 = vmatprep.mubr.msk.f32.mxu1 %vm850_vm0, %v6480_v6  ;;  %s7144_s5 = sshll.u32 %s7178_s30, 2  ;;  %v824_v11 = vld [vmem:[%s7166_s2 + $0x8] sm:$0xff]  ;;  %v816_v13 = vld [vmem:[%s7165_s4 + $0x18] sm:$0xff]  ;;  %s7174_s10 = sshll.u32 %s7178_s30, 2 }
  0x1b   : > { %6077 = vmatpush3.bf16.msra.mxu1 %v6074_v3  ;;  %v823_v9 = vld [vmem:[%s7166_s2] sm:$0xff]  ;;  %v6082_v10 = vpack.c.bf16 %v814_v8, %v813_v7  ;;  %s6510_s9 = scalar_lea.vmem %s7167_s3, %s7144_s5  ;;  %v6515_v15 = vld [vmem:[%s7164_s1 + $0x8] sm:$0xff]   ;;  %v6086_v19 = vpack.c.bf16 %v816_v13, %v815_v12  ;;  %v825_v23 = vld [vmem:[%s7166_s2 + $0x10] sm:$0xff]  ;;  %s7168_s3 = sld [smem:[#allocation8_spill]] }
  0x1c   : > { %6079 = vmatprep.subr.bf16.mxu1 %v6078_v5  ;;  %v6090_v14 = vpack.c.bf16 %v824_v11, %v823_v9  ;;  %v795_v16 = vld [vmem:[%s6510_s9] sm:$0xf]  ;;  %v796_v17 = vld [vmem:[%s6510_s9 + $0x4] sm:$0xf]  ;;  %v797_v20 = vld [vmem:[%s6510_s9 + $0x8] sm:$0xf] }
  0x1d   : > { %v6519_v18 = vcombine.low %v795_v16, %v796_v17  ;;  %v798_v21 = vld [vmem:[%s6510_s9 + $0xc] sm:$0xf]  ;;  %v826_v24 = vld [vmem:[%s7166_s2 + $0x18] sm:$0xff]  ;;  %v5434_v31 = vld [vmem:[%s7169_s26] ss:$0 sm:$0xff]  ;;  %s7171_s1 = sld [smem:[#allocation11_spill]] }
  0x1e   : > { %6091 = vmatprep.subr.bf16.mxu0 %v6090_v14  ;;  %v6529_v22 = vcombine.low %v797_v20, %v798_v21  ;;  %v6094_v25 = vpack.c.bf16 %v826_v24, %v825_v23  ;;  %v5440_v41 = vld [vmem:[%s7170_s28] ss:$0 sm:$0xff] }
  0x1f   : > { %6081 = vmatpush3.bf16.msra.mxu1 %v6078_v5  ;;  %6093 = vmatpush3.bf16.msra.mxu0 %v6090_v14 }
  0x20   : > { %6083 = vmatprep.subr.bf16.mxu1 %v6082_v10  ;;  %5754 = vmatprep.mubr.msk.f32.mxu0 %vm850_vm0, %v6519_v18 }
  0x21   : > { %6095 = vmatprep.subr.bf16.mxu0 %v6094_v25  ;;  %v5437_v29 = vld [vmem:[%s7168_s3] ss:$0 sm:$0xff] }
  0x22   : > { %5733 = vmatmul.mubr.msk.f32.vlgmr.msra.gmra.mrb[0].mxu1 %vm850_vm0, %v6515_v15 }
  0x23   : > { %6085 = vmatpush3.bf16.msra.mxu1 %v6082_v10  ;;  %5743 = vmatprep.mubr.msk.f32.mxu1 %vm850_vm0, %v6519_v18 }
  0x24   : > { %6087 = vmatprep.subr.bf16.mxu1 %v6086_v19  ;;  %6097 = vmatpush3.bf16.msra.mxu0 %v6094_v25 }
  0x25   : > { %5767 = vmatprep.subr.mxu0 %v6318_v26 }
  0x27   : > { %6089 = vmatpush3.bf16.msra.mxu1 %v6086_v19  ;;  %5755 = vmatmul.mubr.msk.f32.vlgmr.msra.gmra.mrb[0].mxu0 %vm850_vm0, %v6529_v22 }
  0x28   : > { %5757 = vmatprep.subr.mxu1 %v6318_v26  ;;  %5769 = vmatprep.mubr.msk.f32.mxu0 %vm6319_vm1, %v6318_v26 }
  0x2a   : > { %5744 = vmatmul.mubr.msk.f32.vlgmr.msra.gmra.mrb[2].mxu1 %vm850_vm0, %v6529_v22 }
  0x2b   : > { %5759 = vmatprep.mubr.msk.f32.mxu1 %vm6319_vm1, %v6318_v26 }
  0xf5   : > { %v5734_v27 = vpop.f32.mrb[0].mxu1 }
  0xf6   : > { %v921_v28 = vpop.f32.mrb[1].mxu1  ;;  %v927_v35 = vadd.f32 %v5734_v27, %v5434_v31 }
  0xf7   : > { %v922_v36 = vadd.f32 %v5434_v31, %v921_v28  ;;  %v817_v28 = vld [vmem:[%s7165_s4 + $0x20] sm:$0xff] }
  0xf8   : > { %v933_v40 = vcombine.high %v927_v35, %v927_v35 }
  0xf9   : > { %v932_v38 = vcombine.high %v922_v36, %v922_v36 }
  0xfa   : > { %v5756_v42 = vpop.f32.mrb[0].mxu0 }
  0xfb   : > { %v6576_v43 = vadd.f32 %v5756_v42, %v5440_v41  ;;  %v1101_v44 = vpop.f32.mrb[1].mxu0 }
  0xfc   : > { %v1102_v45 = vadd.f32 %v5440_v41, %v1101_v44 }
  0xfd   : > { %v5745_v30 = vpop.f32.mrb[2].mxu1 }
  0xfe   : > { %v1022_v32 = vadd.f32 %v5745_v30, %v5437_v29  ;;  %v1016_v33 = vpop.f32.mrb[3].mxu1  ;;  %v1112_v46 = vcombine.high %v1102_v45, %v1102_v45 }
  0xff   : > { %v1017_v34 = vadd.f32 %v5437_v29, %v1016_v33  ;;  %v818_v29 = vld [vmem:[%s7165_s4 + $0x28] sm:$0xff]  ;;  %v1113_v33 = vcombine.high %v6576_v43, %v6576_v43 }
 0x100   : > { %5768 = vmatpush3.xpose.msk.msra.mxu0 %vm1114_vm2, %v1022_v32  ;;  %v1028_v39 = vcombine.high %v1022_v32, %v1022_v32  ;;  %v6106_v32 = vpack.c.bf16 %v818_v29, %v817_v28 }
 0x101   : > { %5758 = vmatpush3.xpose.msk.msra.mxu1 %vm1114_vm2, %v1017_v34  ;;  %5777 = vmatprep.subr.mxu0 %v6318_v26  ;;  %v1027_v37 = vcombine.high %v1017_v34, %v1017_v34  ;;  %v807_v34 = vld [vmem:[%s7163_s8 + $0x20] sm:$0xff] }
 0x102   : > { %5762 = vmatprep.subr.mxu1 %v6318_v26 }
 0x103   : > { %5770 = vmatmul.mubr.msk.f32.vlgmr.msra.gmra.mrb[2].mxu0 %vm1114_vm2, %v927_v35  ;;  %v808_v35 = vld [vmem:[%s7163_s8 + $0x28] sm:$0xff] }
 0x104   : > { %5760 = vmatmul.mubr.msk.f32.vlgmr.msra.gmra.mrb[4].mxu1 %vm1114_vm2, %v922_v36  ;;  %5779 = vmatprep.mubr.msk.f32.mxu0 %vm6319_vm1, %v6318_v26  ;;  %v819_v36 = vld [vmem:[%s7165_s4 + $0x30] sm:$0xff]  ;;  %v6098_v42 = vpack.c.bf16 %v808_v35, %v807_v34 }
 0x105   : > { %5763 = vmatpush3.xpose.msk.msra.mxu1 %vm1114_vm2, %v1027_v37  ;;  %5764 = vmatprep.mubr.msk.f32.mxu1 %vm6319_vm1, %v6318_v26  ;;  %v820_v37 = vld [vmem:[%s7165_s4 + $0x38] sm:$0xff] }
 0x106   : > { %5772 = vmatprep.subr.mxu1 %v6318_v26  ;;  %5778 = vmatpush3.msk.msra.mxu0 %vm1464_vm3, %v1102_v45  ;;  %v6110_v44 = vpack.c.bf16 %v820_v37, %v819_v36  ;;  %v809_v45 = vld [vmem:[%s7163_s8 + $0x30] sm:$0xff] }
 0x107   : > { %5787 = vmatprep.subr.mxu0 %v6318_v26 }
 0x108   : > { %5765 = vmatmul.mubr.msk.f32.vlgmr.msra.gmra.mrb[6].mxu1 %vm1114_vm2, %v932_v38 }
 0x109   : > { %5773 = vmatpush3.xpose.msk.msra.mxu1 %vm1114_vm2, %v1028_v39  ;;  %5774 = vmatprep.mubr.msk.f32.mxu1 %vm6319_vm1, %v6318_v26 }
 0x10a   : > { %5782 = vmatprep.subr.mxu1 %v6318_v26 }
 0x10c   : > { %5775 = vmatmul.mubr.msk.f32.vlgmr.msra.gmra.mrb[8].mxu1 %vm1114_vm2, %v933_v40 }
 0x10d   : > { %5784 = vmatprep.mubr.msk.f32.mxu1 %vm6319_vm1, %v6318_v26  ;;  %5783 = vmatpush3.msk.msra.mxu1 %vm1464_vm3, %v1112_v46  ;;  %v810_v46 = vld [vmem:[%s7163_s8 + $0x38] sm:$0xff] }
 0x10e   : > { %5792 = vmatprep.subr.mxu1 %v6318_v26 }
 0x1d6   : > { %v1333_v47 = vpop.f32.mrb[2].mxu0 }
 0x1d7   : > { %v1185_v48 = vpop.f32.mrb[4].mxu1  ;;  %v5771_v49 = vpop.f32.mrb[3].mxu0  ;;  %v1413_v59 = vmul.f32 0.25, %v1333_v47 }
 0x1d8   : > { %v5761_v50 = vpop.f32.mrb[5].mxu1  ;;  %v1411_v54 = vmul.f32 0.25, %v1185_v48  ;;  %v6102_v49 = vpack.c.bf16 %v810_v46, %v809_v45 }
 0x1d9   : > { %v1422_v62 = vsel %vm1415_vm4, %v1413_v59, -inf }
 0x1da   : > { %v1416_v60 = vsel %vm1415_vm4, %v1411_v54, -inf }
 0x1db   : > { %v1259_v51 = vpop.f32.mrb[6].mxu1 }
 0x1dc   : > { %v1412_v52 = vmul.f32 0.25, %v1259_v51  ;;  %v5766_v53 = vpop.f32.mrb[7].mxu1  ;;  %v829_v51 = vld [vmem:[%s7166_s2 + $0x30] sm:$0xff] }
 0x1de   : > { %v1419_v55 = vsel %vm1415_vm4, %v1412_v52, -inf }
 0x1df   : > { %1420 = vmax.xlane.f32.xlu0 %v1419_v55  ;;  %v1407_v56 = vpop.f32.mrb[8].mxu1 }
 0x1e0   : > { %v1414_v57 = vmul.f32 0.25, %v1407_v56  ;;  %v5776_v58 = vpop.f32.mrb[9].mxu1 }
 0x1e2   : > { %v1425_v61 = vsel %vm1415_vm4, %v1414_v57, -inf }
 0x1e3   : > { %1417 = vmax.xlane.f32.xlu0 %v1416_v60  ;;  %1426 = vmax.xlane.f32.xlu1 %v1425_v61 }
 0x1e7   : > { %1423 = vmax.xlane.f32.xlu1 %v1422_v62 }
 0x26c   : > { %v1421_v63 = vpop.xlane.xlu0 %1420 }
 0x26d   : > { %v1429_v0 = vsub.f32 %v1412_v52, %v1421_v63  ;;  %v5462_v63 = vld [vmem:[%s7168_s3 + $0x1] ss:$0 sm:$0xff] }
 0x26f   : > { %v1434_v1 = vmul.f32 1.442695, %v1429_v0 }
 0x270   : > { %v1418_v2 = vpop.xlane.xlu0 %1417  ;;  %v1427_v3 = vpop.xlane.xlu1 %1426 }
 0x271   : > { %6230 = vpow2.f32 %v1434_v1  ;;  %v1428_v4 = vsub.f32 %v1411_v54, %v1418_v2  ;;  %v1431_v5 = vsub.f32 %v1414_v57, %v1427_v3  ;;  %v5459_v3 = vld [vmem:[%s7169_s26 + $0x1] ss:$0 sm:$0xff] }
 0x273   : > { %v1432_v7 = vmul.f32 1.442695, %v1428_v4  ;;  %v1438_v8 = vmul.f32 1.442695, %v1431_v5 }
 0x274   : > { %v1424_v9 = vpop.xlane.xlu1 %1423 }
 0x275   : > { %6232 = vpow2.f32 %v1432_v7  ;;  %v1430_v10 = vsub.f32 %v1413_v59, %v1424_v9 }
 0x276   : > { %6234 = vpow2.f32 %v1438_v8 }
 0x277   : > { %v1436_v11 = vmul.f32 1.442695, %v1430_v10 }
 0x279   : > { %6236 = vpow2.f32 %v1436_v11 }
 0x27b   : > { %v6231_v12 = vpop.eup %6230 }
 0x27c   : > { %v1443_v13 = vsel %vm1415_vm4, %v6231_v12, 0.0 }
 0x27d   : > { %1444 = vadd.xlane.f32.xlu0 %v1443_v13 }
 0x27f   : > { %v6233_v14 = vpop.eup %6232 }
 0x280   : > { %v6235_v16 = vpop.eup %6234  ;;  %v1440_v17 = vsel %vm1415_vm4, %v6233_v14, 0.0 }
 0x281   : > { %1441 = vadd.xlane.f32.xlu1 %v1440_v17  ;;  %v1449_v19 = vsel %vm1415_vm4, %v6235_v16, 0.0 }
 0x282   : > { %1450 = vadd.xlane.f32.xlu0 %v1449_v19 }
 0x283   : > { %v6237_v20 = vpop.eup %6236 }
 0x284   : > { %v1446_v21 = vsel %vm1415_vm4, %v6237_v20, 0.0 }
 0x285   : > { %1447 = vadd.xlane.f32.xlu1 %v1446_v21 }
 0x30a   : > { %v1445_v23 = vpop.xlane.xlu0 %1444 }
 0x30b   : > { %6238 = vrcp.f32 %v1445_v23 }
 0x30e   : > { %v1442_v24 = vpop.xlane.xlu1 %1441 }
 0x30f   : > { %v1451_v25 = vpop.xlane.xlu0 %1450  ;;  %6240 = vrcp.f32 %v1442_v24 }
 0x310   : > { %6242 = vrcp.f32 %v1451_v25 }
 0x312   : > { %v1448_v27 = vpop.xlane.xlu1 %1447 }
 0x313   : > { %6244 = vrcp.f32 %v1448_v27 }
 0x315   : > { %v6239_v30 = vpop.eup %6238 }
 0x316   : > { %v1457_v31 = vmul.f32 %v6239_v30, %v6231_v12 }
 0x318   : > { %5785 = vmatmul.mubr.msk.f32.vlgmr.msra.gmra.mrb[10].mxu1 %vm1460_vm5, %v1457_v31 }
 0x319   : > { %v6241_v38 = vpop.eup %6240  ;;  %5793 = vmatpush3.msk.msra.mxu1 %vm1464_vm3, %v1113_v33  ;;  %5794 = vmatprep.mubr.msk.f32.mxu1 %vm6319_vm1, %v6318_v26 }
 0x31a   : > { %v6243_v39 = vpop.eup %6242  ;;  %v1456_v40 = vmul.f32 %v6241_v38, %v6233_v14  ;;  %6107 = vmatprep.subr.bf16.mxu1 %v6106_v32  ;;  %v5465_v14 = vld [vmem:[%s7170_s28 + $0x1] ss:$0 sm:$0xff] }
 0x31b   : > { %v1459_v41 = vmul.f32 %v6243_v39, %v6235_v16 }
 0x31c   : > { %5780 = vmatmul.mubr.msk.f32.vlgmr.msra.gmra.mrb[4].mxu0 %vm1460_vm5, %v1456_v40 }
 0x31d   : > { %v6245_v47 = vpop.eup %6244  ;;  %5788 = vmatpush3.msk.msra.mxu0 %vm1464_vm3, %v6576_v43  ;;  %5795 = vmatmul.mubr.msk.f32.vlgmr.msra.gmra.mrb[12].mxu1 %vm1460_vm5, %v1459_v41  ;;  %v828_v43 = vld [vmem:[%s7166_s2 + $0x28] sm:$0xff] }
 0x31e   : > { %v1458_v48 = vmul.f32 %v6245_v47, %v6237_v20  ;;  %6109 = vmatpush3.bf16.msra.mxu1 %v6106_v32  ;;  %5789 = vmatprep.mubr.msk.f32.mxu0 %vm6319_vm1, %v6318_v26 }
 0x31f   : > { %6099 = vmatprep.subr.bf16.mxu0 %v6098_v42  ;;  %6111 = vmatprep.subr.bf16.mxu1 %v6110_v44 }
 0x320   : > { %5790 = vmatmul.mubr.msk.f32.vlgmr.msra.gmra.mrb[6].mxu0 %vm1460_vm5, %v1458_v48  ;;  %5816 = vmatprep.mubr.msk.f32.mxu1 %vm850_vm0, %v6519_v18 }
 0x321   : > { %6101 = vmatpush3.bf16.msra.mxu0 %v6098_v42  ;;  %5805 = vmatprep.mubr.msk.f32.mxu0 %vm850_vm0, %v6480_v6  ;;  %v827_v6 = vld [vmem:[%s7166_s2 + $0x20] sm:$0xff] }
 0x322   : > { %6113 = vmatpush3.bf16.msra.mxu1 %v6110_v44  ;;  %6103 = vmatprep.subr.bf16.mxu0 %v6102_v49  ;;  %v6114_v50 = vpack.c.bf16 %v828_v43, %v827_v6 }
 0x323   : > { %5830 = vmatprep.subr.mxu1 %v6318_v26 }
 0x325   : > { %5817 = vmatmul.mubr.msk.f32.vlgmr.msra.gmra.mrb[14].mxu1 %vm850_vm0, %v6529_v22  ;;  %6105 = vmatpush3.bf16.msra.mxu0 %v6102_v49 }
 0x326   : > { %5832 = vmatprep.mubr.msk.f32.mxu1 %vm6319_vm1, %v6318_v26  ;;  %6115 = vmatprep.subr.bf16.mxu0 %v6114_v50 }
 0x328   : > { %5806 = vmatmul.mubr.msk.f32.vlgmr.msra.gmra.mrb[8].mxu0 %vm850_vm0, %v6515_v15  ;;  %v830_v15 = vld [vmem:[%s7166_s2 + $0x38] sm:$0xff]  ;;  %s7175_s2 = sld [smem:[#allocation14_spill]] }
 0x329   : > { %5827 = vmatprep.mubr.msk.f32.mxu0 %vm850_vm0, %v6519_v18  ;;  %6117 = vmatpush3.bf16.msra.mxu0 %v6114_v50  ;;  %v6118_v52 = vpack.c.bf16 %v830_v15, %v829_v51 }
 0x32b   : > { %6119 = vmatprep.subr.bf16.mxu0 %v6118_v52 }
 0x32d   : > { %6121 = vmatpush3.bf16.msra.mxu0 %v6118_v52 }
 0x32e   : > { %5840 = vmatprep.subr.mxu0 %v6318_v26  ;;  %s793_s27 = scalar_lea.vmem %s7175_s2, %s7174_s10 }
 0x330   : > { %5828 = vmatmul.mubr.msk.f32.vlgmr.msra.gmra.mrb[10].mxu0 %vm850_vm0, %v6529_v22 }
 0x331   : > { %5842 = vmatprep.mubr.msk.f32.mxu0 %vm6319_vm1, %v6318_v26 }
 0x3eb   : > { %v6657_v53 = vpop.f32.mrb[10].mxu1 }
 0x3ec   : > { %v5786_v54 = vpop.f32.mrb[11].mxu1 }
 0x3ef   : > { %v6659_v55 = vpop.f32.mrb[4].mxu0 }
 0x3f0   : > { %v2750_v56 = vcombine.low %v6659_v55, %v6657_v53  ;;  %v6663_v57 = vpop.f32.mrb[12].mxu1  ;;  %v5781_v58 = vpop.f32.mrb[5].mxu0  ;;  %v2861_v53 = vld [vmem:[%s7121_s14 + $0x10] sm:$0xff] }
 0x3f1   : > { %v5796_v59 = vpop.f32.mrb[13].mxu1 }
 0x3f3   : > { %v6665_v60 = vpop.f32.mrb[6].mxu0 }
 0x3f4   : > { %v2751_v61 = vcombine.low %v6665_v60, %v6663_v57  ;;  %v5791_v62 = vpop.f32.mrb[7].mxu0 }
 0x3f8   : > { %v5818_v0 = vpop.f32.mrb[14].mxu1 }
 0x3f9   : > { %v1925_v1 = vadd.f32 %v5818_v0, %v5462_v63  ;;  %v1919_v2 = vpop.f32.mrb[15].mxu1 }
 0x3fa   : > { %v1920_v4 = vadd.f32 %v5462_v63, %v1919_v2 }
 0x3fb   : > { %v5807_v5 = vpop.f32.mrb[8].mxu0  ;;  %5841 = vmatpush3.xpose.msk.msra.mxu0 %vm1114_vm2, %v1925_v1  ;;  %v1931_v12 = vcombine.high %v1925_v1, %v1925_v1 }
 0x3fc   : > { %v1840_v7 = vadd.f32 %v5807_v5, %v5459_v3  ;;  %5831 = vmatpush3.xpose.msk.msra.mxu1 %vm1114_vm2, %v1920_v4  ;;  %v1834_v8 = vpop.f32.mrb[9].mxu0  ;;  %5850 = vmatprep.subr.mxu0 %v6318_v26  ;;  %v1930_v10 = vcombine.high %v1920_v4, %v1920_v4 }
 0x3fd   : > { %v1835_v9 = vadd.f32 %v5459_v3, %v1834_v8  ;;  %5835 = vmatprep.subr.mxu1 %v6318_v26 }
 0x3fe   : > { %5843 = vmatmul.mubr.msk.f32.vlgmr.msra.gmra.mrb[12].mxu0 %vm1114_vm2, %v1840_v7  ;;  %v1846_v13 = vcombine.high %v1840_v7, %v1840_v7 }
 0x3ff   : > { %5833 = vmatmul.mubr.msk.f32.vlgmr.msra.gmra.mrb[16].mxu1 %vm1114_vm2, %v1835_v9  ;;  %5852 = vmatprep.mubr.msk.f32.mxu0 %vm6319_vm1, %v6318_v26  ;;  %v1845_v11 = vcombine.high %v1835_v9, %v1835_v9 }
 0x400   : > { %5836 = vmatpush3.xpose.msk.msra.mxu1 %vm1114_vm2, %v1930_v10  ;;  %5837 = vmatprep.mubr.msk.f32.mxu1 %vm6319_vm1, %v6318_v26 }
 0x401   : > { %5845 = vmatprep.subr.mxu1 %v6318_v26 }
 0x403   : > { %5838 = vmatmul.mubr.msk.f32.vlgmr.msra.gmra.mrb[18].mxu1 %vm1114_vm2, %v1845_v11  ;;  %v5829_v16 = vpop.f32.mrb[10].mxu0 }
 0x404   : > { %5846 = vmatpush3.xpose.msk.msra.mxu1 %vm1114_vm2, %v1931_v12  ;;  %5847 = vmatprep.mubr.msk.f32.mxu1 %vm6319_vm1, %v6318_v26  ;;  %v6698_v17 = vadd.f32 %v5829_v16, %v5465_v14  ;;  %v2004_v19 = vpop.f32.mrb[11].mxu0  ;;  %v836_v16 = vld [vmem:[%s7171_s1 + $0x18] sm:$0xff] }
 0x405   : > { %5855 = vmatprep.subr.mxu1 %v6318_v26  ;;  %v2005_v20 = vadd.f32 %v5465_v14, %v2004_v19  ;;  %v835_v14 = vld [vmem:[%s7171_s1 + $0x10] sm:$0xff]  ;;  %v833_v19 = vld [vmem:[%s7171_s1] sm:$0xff] }
 0x406   : > { %v2016_v11 = vcombine.high %v6698_v17, %v6698_v17 }
 0x407   : > { %5848 = vmatmul.mubr.msk.f32.vlgmr.msra.gmra.mrb[20].mxu1 %vm1114_vm2, %v1846_v13  ;;  %v2015_v21 = vcombine.high %v2005_v20, %v2005_v20  ;;  %5851 = vmatpush3.msk.msra.mxu0 %vm1464_vm3, %v2005_v20  ;;  %v834_v20 = vld [vmem:[%s7171_s1 + $0x8] sm:$0xff] }
 0x408   : > { %5857 = vmatprep.mubr.msk.f32.mxu1 %vm6319_vm1, %v6318_v26  ;;  %5860 = vmatprep.subr.mxu0 %v6318_v26 }
 0x409   : > { %5856 = vmatpush3.msk.msra.mxu1 %vm1464_vm3, %v2015_v21  ;;  %v6126_v21 = vpack.c.bf16 %v834_v20, %v833_v19 }
 0x40a   : > { %5865 = vmatprep.subr.mxu1 %v6318_v26 }
 0x4d1   : > { %v2235_v23 = vpop.f32.mrb[12].mxu0 }
 0x4d2   : > { %v2087_v24 = vpop.f32.mrb[16].mxu1  ;;  %v5844_v25 = vpop.f32.mrb[13].mxu0  ;;  %v2315_v29 = vmul.f32 0.25, %v2235_v23  ;;  %v2839_v23 = vld [vmem:[%s7172_s29] sm:$0xff] }
 0x4d3   : > { %v2313_v27 = vmul.f32 0.25, %v2087_v24  ;;  %v5834_v28 = vpop.f32.mrb[17].mxu1  ;;  %v2840_v24 = vld [vmem:[%s7172_s29 + $0x8] sm:$0xff]  ;;  %v2841_v25 = vld [vmem:[%s7172_s29 + $0x10] sm:$0xff] }
 0x4d4   : > { %v2323_v34 = vsel %vm1415_vm4, %v2315_v29, -inf  ;;  %v2842_v28 = vld [vmem:[%s7172_s29 + $0x18] sm:$0xff] }
 0x4d5   : > { %v2317_v30 = vsel %vm1415_vm4, %v2313_v27, -inf }
 0x4d6   : > { %2318 = vmax.xlane.f32.xlu0 %v2317_v30  ;;  %v2161_v31 = vpop.f32.mrb[18].mxu1  ;;  %v2859_v30 = vld [vmem:[%s7121_s14] sm:$0xff] }
 0x4d7   : > { %v2314_v32 = vmul.f32 0.25, %v2161_v31  ;;  %v5839_v33 = vpop.f32.mrb[19].mxu1  ;;  %v2860_v31 = vld [vmem:[%s7121_s14 + $0x8] sm:$0xff] }
 0x4d9   : > { %v2320_v35 = vsel %vm1415_vm4, %v2314_v32, -inf }
 0x4da   : > { %2324 = vmax.xlane.f32.xlu0 %v2323_v34  ;;  %2321 = vmax.xlane.f32.xlu1 %v2320_v35  ;;  %v2309_v36 = vpop.f32.mrb[20].mxu1 }
 0x4db   : > { %v2316_v37 = vmul.f32 0.25, %v2309_v36  ;;  %v5849_v38 = vpop.f32.mrb[21].mxu1 }
 0x4dd   : > { %v2326_v39 = vsel %vm1415_vm4, %v2316_v37, -inf }
 0x4de   : > { %2327 = vmax.xlane.f32.xlu1 %v2326_v39 }
 0x563   : > { %v2319_v40 = vpop.xlane.xlu0 %2318 }
 0x564   : > { %v2329_v41 = vsub.f32 %v2313_v27, %v2319_v40  ;;  %v6130_v27 = vpack.c.bf16 %v2840_v24, %v2839_v23  ;;  %v2849_v40 = vld [vmem:[%s7119_s12] sm:$0xff] }
 0x566   : > { %v2333_v42 = vmul.f32 1.442695, %v2329_v41  ;;  %v2850_v41 = vld [vmem:[%s7119_s12 + $0x8] sm:$0xff] }
 0x567   : > { %v2325_v44 = vpop.xlane.xlu0 %2324  ;;  %v2322_v45 = vpop.xlane.xlu1 %2321 }
 0x568   : > { %6246 = vpow2.f32 %v2333_v42  ;;  %v2331_v46 = vsub.f32 %v2315_v29, %v2325_v44  ;;  %v2330_v47 = vsub.f32 %v2314_v32, %v2322_v45  ;;  %v6134_v29 = vpack.c.bf16 %v2842_v28, %v2841_v25 }
 0x569   : > { %v6146_v32 = vpack.c.bf16 %v2860_v31, %v2859_v30 }
 0x56a   : > { %v2337_v48 = vmul.f32 1.442695, %v2331_v46  ;;  %v2335_v49 = vmul.f32 1.442695, %v2330_v47  ;;  %v6138_v46 = vpack.c.bf16 %v2850_v41, %v2849_v40  ;;  %v2851_v47 = vld [vmem:[%s7119_s12 + $0x10] sm:$0xff] }
 0x56b   : > { %v2328_v6 = vpop.xlane.xlu1 %2327 }
 0x56c   : > { %6248 = vpow2.f32 %v2337_v48  ;;  %v2332_v43 = vsub.f32 %v2316_v37, %v2328_v6  ;;  %v2852_v48 = vld [vmem:[%s7119_s12 + $0x18] sm:$0xff] }
 0x56d   : > { %6250 = vpow2.f32 %v2335_v49  ;;  %v6142_v55 = vpack.c.bf16 %v2852_v48, %v2851_v47  ;;  %v5488_v49 = vld [vmem:[%s7173_s6] ss:$0 sm:$0xff] }
 0x56e   : > { %v2339_v50 = vmul.f32 1.442695, %v2332_v43 }
 0x570   : > { %6252 = vpow2.f32 %v2339_v50 }
 0x572   : > { %v6247_v51 = vpop.eup %6246 }
 0x573   : > { %v2341_v15 = vsel %vm1415_vm4, %v6247_v51, 0.0 }
 0x574   : > { %2342 = vadd.xlane.f32.xlu0 %v2341_v15  ;;  %v5489_v15 = vld [vmem:[%s7118_s11] ss:$0 sm:$0xff] }
 0x576   : > { %v6249_v52 = vpop.eup %6248 }
 0x577   : > { %v6251_v54 = vpop.eup %6250  ;;  %v2347_v58 = vsel %vm1415_vm4, %v6249_v52, 0.0 }
 0x578   : > { %2348 = vadd.xlane.f32.xlu0 %v2347_v58  ;;  %v2344_v59 = vsel %vm1415_vm4, %v6251_v54, 0.0 }
 0x579   : > { %2345 = vadd.xlane.f32.xlu1 %v2344_v59 }
 0x57a   : > { %v6253_v62 = vpop.eup %6252 }
 0x57b   : > { %v2350_v63 = vsel %vm1415_vm4, %v6253_v62, 0.0 }
 0x57d   : > { %2351 = vadd.xlane.f32.xlu1 %v2350_v63 }
 0x601   : > { %v2343_v0 = vpop.xlane.xlu0 %2342 }
 0x602   : > { %6254 = vrcp.f32 %v2343_v0 }
 0x605   : > { %v2349_v1 = vpop.xlane.xlu0 %2348 }
 0x606   : > { %6256 = vrcp.f32 %v2349_v1  ;;  %v2346_v2 = vpop.xlane.xlu1 %2345 }
 0x607   : > { %6258 = vrcp.f32 %v2346_v2 }
 0x60a   : > { %v2352_v3 = vpop.xlane.xlu1 %2351 }
 0x60b   : > { %6260 = vrcp.f32 %v2352_v3 }
 0x60c   : > { %v6255_v4 = vpop.eup %6254 }
 0x60d   : > { %v2357_v5 = vmul.f32 %v6255_v4, %v6247_v51 }
 0x60f   : > { %5853 = vmatmul.mubr.msk.f32.vlgmr.msra.gmra.mrb[14].mxu0 %vm1460_vm5, %v2357_v5 }
 0x610   : > { %v6257_v7 = vpop.eup %6256  ;;  %5861 = vmatpush3.msk.msra.mxu0 %vm1464_vm3, %v6698_v17  ;;  %5862 = vmatprep.mubr.msk.f32.mxu0 %vm6319_vm1, %v6318_v26  ;;  %v6122_v17 = vpack.c.bf16 %v836_v16, %v835_v14 }
 0x611   : > { %v6259_v8 = vpop.eup %6258  ;;  %v2359_v9 = vmul.f32 %v6257_v7, %v6249_v52  ;;  %v5495_v52 = vld [vmem:[%s7122_s15] ss:$0 sm:$0xff] }
 0x612   : > { %v2358_v10 = vmul.f32 %v6259_v8, %v6251_v54  ;;  %6123 = vmatprep.subr.bf16.mxu0 %v6122_v17  ;;  %v5492_v54 = vld [vmem:[%s7120_s13] ss:$0 sm:$0xff] }
 0x613   : > { %5863 = vmatmul.mubr.msk.f32.vlgmr.msra.gmra.mrb[16].mxu0 %vm1460_vm5, %v2359_v9 }
 0x614   : > { %5858 = vmatmul.mubr.msk.f32.vlgmr.msra.gmra.mrb[22].mxu1 %vm1460_vm5, %v2358_v10  ;;  %6125 = vmatpush3.bf16.msra.mxu0 %v6122_v17 }
 0x615   : > { %v6261_v12 = vpop.eup %6260  ;;  %5866 = vmatpush3.msk.msra.mxu1 %vm1464_vm3, %v2016_v11  ;;  %5867 = vmatprep.mubr.msk.f32.mxu1 %vm6319_vm1, %v6318_v26 }
 0x616   : > { %v2360_v13 = vmul.f32 %v6261_v12, %v6253_v62  ;;  %6127 = vmatprep.subr.bf16.mxu0 %v6126_v21  ;;  %6131 = vmatprep.subr.bf16.mxu1 %v6130_v27 }
 0x618   : > { %5868 = vmatmul.mubr.msk.f32.vlgmr.msra.gmra.mrb[24].mxu1 %vm1460_vm5, %v2360_v13 }
 0x619   : > { %5892 = vmatprep.mubr.msk.f32.mxu1 %vm850_vm0, %v6519_v18  ;;  %6133 = vmatpush3.bf16.msra.mxu1 %v6130_v27 }
 0x61a   : > { %6135 = vmatprep.subr.bf16.mxu1 %v6134_v29 }
 0x61d   : > { %6137 = vmatpush3.bf16.msra.mxu1 %v6134_v29 }
 0x61e   : > { %6147 = vmatprep.subr.bf16.mxu1 %v6146_v32 }
 0x620   : > { %5893 = vmatmul.mubr.msk.f32.vlgmr.msra.gmra.mrb[26].mxu1 %vm850_vm0, %v6529_v22 }
 0x621   : > { %6149 = vmatpush3.bf16.msra.mxu1 %v6146_v32 }
 0x6e2   : > { %v2432_v33 = vpop.f32.mrb[14].mxu0 }
 0x6e3   : > { %v5854_v34 = vpop.f32.mrb[15].mxu0 }
 0x6e6   : > { %v2582_v35 = vpop.f32.mrb[16].mxu0 }
 0x6e7   : > { %v2507_v36 = vpop.f32.mrb[22].mxu1  ;;  %v5864_v37 = vpop.f32.mrb[17].mxu0 }
 0x6e8   : > { %v2665_v38 = vcombine.low %v2432_v33, %v2507_v36  ;;  %v5859_v39 = vpop.f32.mrb[23].mxu1 }
 0x6ea   : > { %5874 = vmatprep.mubr.msk.f32.mxu0 %vm1114_vm2, %v2665_v38 }
 0x6eb   : > { %v2657_v42 = vpop.f32.mrb[24].mxu1 }
 0x6ec   : > { %v2666_v44 = vcombine.low %v2582_v35, %v2657_v42  ;;  %v5869_v45 = vpop.f32.mrb[25].mxu1 }
 0x6ee   : > { %5875 = vmatmul.mubr.msk.f32.vlgmr.msra.gmra.mrb[18].mxu0 %vm1114_vm2, %v2666_v44 }
 0x6ef   : > { %6129 = vmatpush3.bf16.msra.mxu0 %v6126_v21  ;;  %5881 = vmatprep.mubr.msk.f32.mxu0 %vm1114_vm2, %v2750_v56  ;;  %v2862_v56 = vld [vmem:[%s7121_s14 + $0x18] sm:$0xff] }
 0x6f0   : > { %6139 = vmatprep.subr.bf16.mxu0 %v6138_v46  ;;  %v6150_v57 = vpack.c.bf16 %v2862_v56, %v2861_v53 }
 0x6f2   : > { %6151 = vmatprep.subr.bf16.mxu1 %v6150_v57 }
 0x6f3   : > { %6153 = vmatpush3.bf16.msra.mxu1 %v6150_v57  ;;  %v5894_v60 = vpop.f32.mrb[26].mxu1 }
 0x6f4   : > { %5922 = vmatprep.subr.mxu1 %v6318_v26  ;;  %v2952_v7 = vadd.f32 %v5894_v60, %v5489_v15 }
 0x6f6   : > { %5882 = vmatmul.mubr.msk.f32.vlgmr.msra.gmra.mrb[18].mxu0 %vm1114_vm2, %v2751_v61  ;;  %v2946_v61 = vpop.f32.mrb[27].mxu1  ;;  %v2958_v10 = vcombine.high %v2952_v7, %v2952_v7 }
 0x6f7   : > { %6141 = vmatpush3.bf16.msra.mxu0 %v6138_v46  ;;  %v2947_v62 = vadd.f32 %v5489_v15, %v2946_v61  ;;  %v2844_v15 = vld [vmem:[%s7172_s29 + $0x28] sm:$0xff] }
 0x6f8   : > { %6143 = vmatprep.subr.bf16.mxu0 %v6142_v55 }
 0x6f9   : > { %v2957_v5 = vcombine.high %v2947_v62, %v2947_v62 }
 0x6fb   : > { %6145 = vmatpush3.bf16.msra.mxu0 %v6142_v55 }
 0x6fc   : > { %5917 = vmatprep.subr.mxu0 %v6318_v26 }
 0x7c9   : > { %v5883_v6 = vpop.f32.mrb[18].mxu0 }
 0x7ca   : > { %v2822_v43 = vpop.f32.mrb[19].mxu0  ;;  %v6794_v51 = vadd.f32 %v5883_v6, %v5488_v49 }
 0x7cb   : > { %v6792_v50 = vadd.f32 %v5488_v49, %v2822_v43  ;;  %v2843_v43 = vld [vmem:[%s7172_s29 + $0x20] sm:$0xff] }
 0x7cd   : > { %5903 = vmatprep.mubr.msk.f32.mxu0 %vm850_vm0, %v6792_v50  ;;  %5914 = vmatprep.mubr.msk.f32.mxu1 %vm850_vm0, %v6792_v50 }
 0x7ce   : > { %5904 = vmatmul.mubr.msk.f32.vlgmr.msra.gmra.mrb[20].mxu0 %vm850_vm0, %v6794_v51  ;;  %5915 = vmatmul.mubr.msk.f32.vlgmr.msra.gmra.mrb[28].mxu1 %vm850_vm0, %v6794_v51 }
 0x7cf   : > { %5919 = vmatprep.mubr.msk.f32.mxu0 %vm6319_vm1, %v6318_v26  ;;  %5924 = vmatprep.mubr.msk.f32.mxu1 %vm6319_vm1, %v6318_v26 }
 0x8a1   : > { %v5905_v58 = vpop.f32.mrb[20].mxu0  ;;  %v5916_v59 = vpop.f32.mrb[28].mxu1 }
 0x8a2   : > { %v6817_v63 = vadd.f32 %v5916_v59, %v5495_v52  ;;  %v3037_v0 = vpop.f32.mrb[21].mxu0  ;;  %v3122_v1 = vpop.f32.mrb[29].mxu1  ;;  %v3043_v3 = vadd.f32 %v5905_v58, %v5492_v54  ;;  %v2854_v58 = vld [vmem:[%s7119_s12 + $0x28] sm:$0xff] }
 0x8a3   : > { %v3038_v2 = vadd.f32 %v5492_v54, %v3037_v0  ;;  %v3123_v9 = vadd.f32 %v5495_v52, %v3122_v1  ;;  %v2853_v54 = vld [vmem:[%s7119_s12 + $0x20] sm:$0xff]  ;;  %v2845_v1 = vld [vmem:[%s7172_s29 + $0x30] sm:$0xff] }
 0x8a4   : > { %v3049_v8 = vcombine.high %v3043_v3, %v3043_v3 }
 0x8a5   : > { %v3048_v4 = vcombine.high %v3038_v2, %v3038_v2  ;;  %5918 = vmatpush3.xpose.msk.msra.mxu0 %vm1114_vm2, %v3038_v2  ;;  %v3133_v11 = vcombine.high %v3123_v9, %v3123_v9  ;;  %v2846_v2 = vld [vmem:[%s7172_s29 + $0x38] sm:$0xff] }
 0x8a6   : > { %5927 = vmatprep.subr.mxu0 %v6318_v26 }
 0x8a7   : > { %5923 = vmatpush3.xpose.msk.msra.mxu1 %vm1114_vm2, %v3048_v4  ;;  %v6162_v4 = vpack.c.bf16 %v2854_v58, %v2853_v54 }
 0x8a8   : > { %5920 = vmatmul.mubr.msk.f32.vlgmr.msra.gmra.mrb[22].mxu0 %vm1114_vm2, %v2947_v62  ;;  %5932 = vmatprep.subr.mxu1 %v6318_v26  ;;  %v6154_v62 = vpack.c.bf16 %v2844_v15, %v2843_v43 }
 0x8a9   : > { %5928 = vmatpush3.xpose.msk.msra.mxu0 %vm1114_vm2, %v3043_v3  ;;  %5929 = vmatprep.mubr.msk.f32.mxu0 %vm6319_vm1, %v6318_v26 }
 0x8aa   : > { %5925 = vmatmul.mubr.msk.f32.vlgmr.msra.gmra.mrb[30].mxu1 %vm1114_vm2, %v2957_v5  ;;  %5937 = vmatprep.subr.mxu0 %v6318_v26 }
 0x8ab   : > { %5933 = vmatpush3.xpose.msk.msra.mxu1 %vm1114_vm2, %v3049_v8  ;;  %5934 = vmatprep.mubr.msk.f32.mxu1 %vm6319_vm1, %v6318_v26  ;;  %v2855_v8 = vld [vmem:[%s7119_s12 + $0x30] sm:$0xff] }
 0x8ac   : > { %5930 = vmatmul.mubr.msk.f32.vlgmr.msra.gmra.mrb[24].mxu0 %vm1114_vm2, %v2952_v7  ;;  %5942 = vmatprep.subr.mxu1 %v6318_v26  ;;  %v3134_v7 = vcombine.high %v6817_v63, %v6817_v63 }
 0x8ad   : > { %5938 = vmatpush3.msk.msra.mxu0 %vm1464_vm3, %v3123_v9  ;;  %5939 = vmatprep.mubr.msk.f32.mxu0 %vm6319_vm1, %v6318_v26  ;;  %v2856_v9 = vld [vmem:[%s7119_s12 + $0x38] sm:$0xff] }
 0x8ae   : > { %5935 = vmatmul.mubr.msk.f32.vlgmr.msra.gmra.mrb[32].mxu1 %vm1114_vm2, %v2958_v10  ;;  %5947 = vmatprep.subr.mxu0 %v6318_v26 }
 0x8af   : > { %5943 = vmatpush3.msk.msra.mxu1 %vm1464_vm3, %v3133_v11  ;;  %5944 = vmatprep.mubr.msk.f32.mxu1 %vm6319_vm1, %v6318_v26  ;;  %v6158_v11 = vpack.c.bf16 %v2846_v2, %v2845_v1 }
 0x8b0   : > { %5952 = vmatprep.subr.mxu1 %v6318_v26 }
 0x97b   : > { %v3205_v12 = vpop.f32.mrb[22].mxu0 }
 0x97c   : > { %v3431_v13 = vmul.f32 0.25, %v3205_v12  ;;  %v5921_v14 = vpop.f32.mrb[23].mxu0 }
 0x97d   : > { %v3279_v16 = vpop.f32.mrb[30].mxu1 }
 0x97e   : > { %v3432_v17 = vmul.f32 0.25, %v3279_v16  ;;  %v5926_v19 = vpop.f32.mrb[31].mxu1  ;;  %v3435_v20 = vsel %vm1415_vm4, %v3431_v13, -inf  ;;  %v6166_v16 = vpack.c.bf16 %v2856_v9, %v2855_v8 }
 0x97f   : > { %3436 = vmax.xlane.f32.xlu1 %v3435_v20  ;;  %v3353_v21 = vpop.f32.mrb[24].mxu0  ;;  %v2865_v19 = vld [vmem:[%s7121_s14 + $0x30] sm:$0xff]  ;;  %v2866_v20 = vld [vmem:[%s7121_s14 + $0x38] sm:$0xff] }
 0x980   : > { %v3433_v23 = vmul.f32 0.25, %v3353_v21  ;;  %v5931_v24 = vpop.f32.mrb[25].mxu0  ;;  %v3438_v25 = vsel %vm1415_vm4, %v3432_v17, -inf }
 0x981   : > { %3439 = vmax.xlane.f32.xlu0 %v3438_v25  ;;  %v3427_v27 = vpop.f32.mrb[32].mxu1 }
 0x982   : > { %v3434_v28 = vmul.f32 0.25, %v3427_v27  ;;  %v5936_v29 = vpop.f32.mrb[33].mxu1  ;;  %v3441_v30 = vsel %vm1415_vm4, %v3433_v23, -inf }
 0x983   : > { %3442 = vmax.xlane.f32.xlu1 %v3441_v30  ;;  %v5517_v30 = vld [vmem:[%s7120_s13 + $0x1] ss:$0 sm:$0xff] }
 0x984   : > { %v3444_v31 = vsel %vm1415_vm4, %v3434_v28, -inf }
 0x985   : > { %3445 = vmax.xlane.f32.xlu0 %v3444_v31 }
 0xa0c   : > { %v3437_v32 = vpop.xlane.xlu1 %3436 }
 0xa0d   : > { %v3447_v33 = vsub.f32 %v3431_v13, %v3437_v32  ;;  %v2864_v13 = vld [vmem:[%s7121_s14 + $0x28] sm:$0xff]  ;;  %v5514_v32 = vld [vmem:[%s7118_s11 + $0x1] ss:$0 sm:$0xff] }
 0xa0e   : > { %v3440_v34 = vpop.xlane.xlu0 %3439 }
 0xa0f   : > { %v3451_v35 = vmul.f32 1.442695, %v3447_v33  ;;  %v3448_v36 = vsub.f32 %v3432_v17, %v3440_v34 }
 0xa10   : > { %v3443_v37 = vpop.xlane.xlu1 %3442 }
 0xa11   : > { %6262 = vpow2.f32 %v3451_v35  ;;  %v3453_v38 = vmul.f32 1.442695, %v3448_v36  ;;  %v3449_v39 = vsub.f32 %v3433_v23, %v3443_v37 }
 0xa12   : > { %v3446_v40 = vpop.xlane.xlu0 %3445 }
 0xa13   : > { %6264 = vpow2.f32 %v3453_v38  ;;  %v3455_v41 = vmul.f32 1.442695, %v3449_v39  ;;  %v3450_v42 = vsub.f32 %v3434_v28, %v3446_v40  ;;  %v5520_v40 = vld [vmem:[%s7122_s15 + $0x1] ss:$0 sm:$0xff] }
 0xa15   : > { %6266 = vpow2.f32 %v3455_v41  ;;  %v3457_v44 = vmul.f32 1.442695, %v3450_v42 }
 0xa17   : > { %6268 = vpow2.f32 %v3457_v44 }
 0xa1b   : > { %v6263_v45 = vpop.eup %6262 }
 0xa1c   : > { %v3459_v46 = vsel %vm1415_vm4, %v6263_v45, 0.0 }
 0xa1d   : > { %v6265_v47 = vpop.eup %6264  ;;  %3460 = vadd.xlane.f32.xlu1 %v3459_v46 }
 0xa1e   : > { %v3462_v48 = vsel %vm1415_vm4, %v6265_v47, 0.0 }
 0xa1f   : > { %v6267_v53 = vpop.eup %6266  ;;  %3463 = vadd.xlane.f32.xlu0 %v3462_v48 }
 0xa20   : > { %v3465_v55 = vsel %vm1415_vm4, %v6267_v53, 0.0 }
 0xa21   : > { %v6269_v56 = vpop.eup %6268  ;;  %3466 = vadd.xlane.f32.xlu1 %v3465_v55 }
 0xa22   : > { %v3468_v57 = vsel %vm1415_vm4, %v6269_v56, 0.0 }
 0xa23   : > { %3469 = vadd.xlane.f32.xlu0 %v3468_v57 }
 0xaaa   : > { %v3461_v60 = vpop.xlane.xlu1 %3460 }
 0xaab   : > { %6270 = vrcp.f32 %v3461_v60 }
 0xaac   : > { %v3464_v61 = vpop.xlane.xlu0 %3463 }
 0xaad   : > { %6272 = vrcp.f32 %v3464_v61 }
 0xaae   : > { %v3467_v49 = vpop.xlane.xlu1 %3466 }
 0xaaf   : > { %6274 = vrcp.f32 %v3467_v49 }
 0xab0   : > { %v3470_v6 = vpop.xlane.xlu0 %3469 }
 0xab1   : > { %6276 = vrcp.f32 %v3470_v6 }
 0xab5   : > { %v6271_v52 = vpop.eup %6270 }
 0xab6   : > { %v3475_v59 = vmul.f32 %v6271_v52, %v6263_v45 }
 0xab7   : > { %v6273_v0 = vpop.eup %6272 }
 0xab8   : > { %v3476_v3 = vmul.f32 %v6273_v0, %v6265_v47  ;;  %5940 = vmatmul.mubr.msk.f32.vlgmr.msra.gmra.mrb[26].mxu0 %vm1460_vm5, %v3475_v59 }
 0xab9   : > { %v6275_v5 = vpop.eup %6274  ;;  %5948 = vmatpush3.msk.msra.mxu0 %vm1464_vm3, %v6817_v63  ;;  %5949 = vmatprep.mubr.msk.f32.mxu0 %vm6319_vm1, %v6318_v26  ;;  %v2863_v63 = vld [vmem:[%s7121_s14 + $0x20] sm:$0xff] }
 0xaba   : > { %v3477_v10 = vmul.f32 %v6275_v5, %v6267_v53  ;;  %5945 = vmatmul.mubr.msk.f32.vlgmr.msra.gmra.mrb[34].mxu1 %vm1460_vm5, %v3476_v3  ;;  %6155 = vmatprep.subr.bf16.mxu0 %v6154_v62  ;;  %v6170_v17 = vpack.c.bf16 %v2864_v13, %v2863_v63 }
 0xabb   : > { %v6277_v12 = vpop.eup %6276  ;;  %5953 = vmatpush3.msk.msra.mxu1 %vm1464_vm3, %v3134_v7  ;;  %5954 = vmatprep.mubr.msk.f32.mxu1 %vm6319_vm1, %v6318_v26 }
 0xabc   : > { %v3478_v14 = vmul.f32 %v6277_v12, %v6269_v56  ;;  %5950 = vmatmul.mubr.msk.f32.vlgmr.msra.gmra.mrb[28].mxu0 %vm1460_vm5, %v3477_v10  ;;  %6163 = vmatprep.subr.bf16.mxu1 %v6162_v4 }
 0xabd   : > { %6157 = vmatpush3.bf16.msra.mxu0 %v6154_v62  ;;  %5965 = vmatprep.mubr.msk.f32.mxu0 %vm850_vm0, %v6519_v18  ;;  %v6174_v18 = vpack.c.bf16 %v2866_v20, %v2865_v19 }
 0xabe   : > { %5955 = vmatmul.mubr.msk.f32.vlgmr.msra.gmra.mrb[36].mxu1 %vm1460_vm5, %v3478_v14  ;;  %6159 = vmatprep.subr.bf16.mxu0 %v6158_v11 }
 0xabf   : > { %6165 = vmatpush3.bf16.msra.mxu1 %v6162_v4  ;;  %5976 = vmatprep.mubr.msk.f32.mxu1 %vm850_vm0, %v6792_v50 }
 0xac0   : > { %6167 = vmatprep.subr.bf16.mxu1 %v6166_v16 }
 0xac1   : > { %6161 = vmatpush3.bf16.msra.mxu0 %v6158_v11 }
 0xac2   : > { %6171 = vmatprep.subr.bf16.mxu0 %v6170_v17 }
 0xac3   : > { %6169 = vmatpush3.bf16.msra.mxu1 %v6166_v16 }
 0xac4   : > { %5966 = vmatmul.mubr.msk.f32.vlgmr.msra.gmra.mrb[30].mxu0 %vm850_vm0, %v6529_v22  ;;  %5990 = vmatprep.subr.mxu1 %v6318_v26 }
 0xac5   : > { %6173 = vmatpush3.bf16.msra.mxu0 %v6170_v17  ;;  %5987 = vmatprep.mubr.msk.f32.mxu0 %vm850_vm0, %v6792_v50 }
 0xac6   : > { %5977 = vmatmul.mubr.msk.f32.vlgmr.msra.gmra.mrb[38].mxu1 %vm850_vm0, %v6794_v51  ;;  %6175 = vmatprep.subr.bf16.mxu0 %v6174_v18 }
 0xac7   : > { %5992 = vmatprep.mubr.msk.f32.mxu1 %vm6319_vm1, %v6318_v26 }
 0xac9   : > { %6177 = vmatpush3.bf16.msra.mxu0 %v6174_v18 }
 0xaca   : > { %6000 = vmatprep.subr.mxu0 %v6318_v26 }
 0xacc   : > { %5988 = vmatmul.mubr.msk.f32.vlgmr.msra.gmra.mrb[32].mxu0 %vm850_vm0, %v6794_v51 }
 0xacd   : > { %6002 = vmatprep.mubr.msk.f32.mxu0 %vm6319_vm1, %v6318_v26 }
 0xb8b   : > { %v6918_v22 = vpop.f32.mrb[26].mxu0 }
 0xb8c   : > { %v5941_v21 = vpop.f32.mrb[27].mxu0 }
 0xb8d   : > { %v6920_v50 = vpop.f32.mrb[34].mxu1 }
 0xb8e   : > { %v4767_v23 = vcombine.low %v6918_v22, %v6920_v50  ;;  %v5946_v24 = vpop.f32.mrb[35].mxu1  ;;  %v6307_v50 = vld [vmem:[%s6510_s9 + $0xc] sm:$0xf] }
 0xb8f   : > { %v6924_v25 = vpop.f32.mrb[28].mxu0 }
 0xb90   : > { %v5951_v27 = vpop.f32.mrb[29].mxu0 }
 0xb91   : > { %v6926_v28 = vpop.f32.mrb[36].mxu1 }
 0xb92   : > { %v4768_v51 = vcombine.low %v6924_v25, %v6926_v28  ;;  %v5956_v29 = vpop.f32.mrb[37].mxu1 }
 0xb97   : > { %v5967_v31 = vpop.f32.mrb[30].mxu0 }
 0xb98   : > { %v3851_v33 = vpop.f32.mrb[31].mxu0  ;;  %v3857_v38 = vadd.f32 %v5967_v31, %v5514_v32 }
 0xb99   : > { %v5978_v34 = vpop.f32.mrb[38].mxu1  ;;  %v3852_v39 = vadd.f32 %v5514_v32, %v3851_v33 }
 0xb9a   : > { %v3942_v35 = vadd.f32 %v5978_v34, %v5517_v30  ;;  %v3936_v36 = vpop.f32.mrb[39].mxu1  ;;  %v3863_v53 = vcombine.high %v3857_v38, %v3857_v38 }
 0xb9b   : > { %v3937_v37 = vadd.f32 %v5517_v30, %v3936_v36  ;;  %v3862_v47 = vcombine.high %v3852_v39, %v3852_v39 }
 0xb9c   : > { %6001 = vmatpush3.xpose.msk.msra.mxu0 %vm1114_vm2, %v3942_v35  ;;  %v3948_v48 = vcombine.high %v3942_v35, %v3942_v35 }
 0xb9d   : > { %5991 = vmatpush3.xpose.msk.msra.mxu1 %vm1114_vm2, %v3937_v37  ;;  %6010 = vmatprep.subr.mxu0 %v6318_v26  ;;  %v3947_v41 = vcombine.high %v3937_v37, %v3937_v37 }
 0xb9e   : > { %5995 = vmatprep.subr.mxu1 %v6318_v26 }
 0xb9f   : > { %v5989_v42 = vpop.f32.mrb[32].mxu0  ;;  %6003 = vmatmul.mubr.msk.f32.vlgmr.msra.gmra.mrb[34].mxu0 %vm1114_vm2, %v3857_v38 }
 0xba0   : > { %v6944_v44 = vadd.f32 %v5989_v42, %v5520_v40  ;;  %v4021_v45 = vpop.f32.mrb[33].mxu0  ;;  %5993 = vmatmul.mubr.msk.f32.vlgmr.msra.gmra.mrb[40].mxu1 %vm1114_vm2, %v3852_v39  ;;  %6012 = vmatprep.mubr.msk.f32.mxu0 %vm6319_vm1, %v6318_v26  ;;  %v2871_v42 = vld [vmem:[%s7123_s16 + $0x10] sm:$0xff] }
 0xba1   : > { %v4022_v46 = vadd.f32 %v5520_v40, %v4021_v45  ;;  %5996 = vmatpush3.xpose.msk.msra.mxu1 %vm1114_vm2, %v3947_v41  ;;  %5997 = vmatprep.mubr.msk.f32.mxu1 %vm6319_vm1, %v6318_v26 }
 0xba2   : > { %6005 = vmatprep.subr.mxu1 %v6318_v26  ;;  %v4033_v39 = vcombine.high %v6944_v44, %v6944_v44 }
 0xba3   : > { %6011 = vmatpush3.msk.msra.mxu0 %vm1464_vm3, %v4022_v46  ;;  %v4032_v55 = vcombine.high %v4022_v46, %v4022_v46  ;;  %v2869_v46 = vld [vmem:[%s7123_s16] sm:$0xff] }
 0xba4   : > { %5998 = vmatmul.mubr.msk.f32.vlgmr.msra.gmra.mrb[42].mxu1 %vm1114_vm2, %v3862_v47  ;;  %6020 = vmatprep.subr.mxu0 %v6318_v26 }
 0xba5   : > { %6006 = vmatpush3.xpose.msk.msra.mxu1 %vm1114_vm2, %v3948_v48  ;;  %6007 = vmatprep.mubr.msk.f32.mxu1 %vm6319_vm1, %v6318_v26 }
 0xba6   : > { %6015 = vmatprep.subr.mxu1 %v6318_v26 }
 0xba8   : > { %6008 = vmatmul.mubr.msk.f32.vlgmr.msra.gmra.mrb[44].mxu1 %vm1114_vm2, %v3863_v53 }
 0xba9   : > { %6016 = vmatpush3.msk.msra.mxu1 %vm1464_vm3, %v4032_v55  ;;  %6017 = vmatprep.mubr.msk.f32.mxu1 %vm6319_vm1, %v6318_v26 }
 0xbaa   : > { %6025 = vmatprep.subr.mxu1 %v6318_v26 }
 0xc72   : > { %v4252_v56 = vpop.f32.mrb[34].mxu0 }
 0xc73   : > { %v4104_v57 = vpop.f32.mrb[40].mxu1  ;;  %v6004_v60 = vpop.f32.mrb[35].mxu0  ;;  %v4332_v6 = vmul.f32 0.25, %v4252_v56 }
 0xc74   : > { %v4330_v61 = vmul.f32 0.25, %v4104_v57  ;;  %v5994_v49 = vpop.f32.mrb[41].mxu1 }
 0xc75   : > { %v4340_v58 = vsel %vm1415_vm4, %v4332_v6, -inf }
 0xc76   : > { %v4334_v43 = vsel %vm1415_vm4, %v4330_v61, -inf }
 0xc77   : > { %4335 = vmax.xlane.f32.xlu0 %v4334_v43  ;;  %v4178_v15 = vpop.f32.mrb[42].mxu1 }
 0xc78   : > { %v4331_v52 = vmul.f32 0.25, %v4178_v15  ;;  %v5999_v54 = vpop.f32.mrb[43].mxu1  ;;  %v5543_v15 = vld [vmem:[%s7124_s17] ss:$0 sm:$0xff] }
 0xc7a   : > { %v4337_v59 = vsel %vm1415_vm4, %v4331_v52, -inf }
 0xc7b   : > { %4341 = vmax.xlane.f32.xlu0 %v4340_v58  ;;  %4338 = vmax.xlane.f32.xlu1 %v4337_v59  ;;  %v4326_v62 = vpop.f32.mrb[44].mxu1 }
 0xc7c   : > { %v4333_v0 = vmul.f32 0.25, %v4326_v62  ;;  %v6009_v1 = vpop.f32.mrb[45].mxu1 }
 0xc7d   : > { %v6306_v1 = vld [vmem:[%s6510_s9 + $0x8] sm:$0xf] }
 0xc7e   : > { %v4343_v2 = vsel %vm1415_vm4, %v4333_v0, -inf }
 0xc7f   : > { %4344 = vmax.xlane.f32.xlu1 %v4343_v2 }
 0xd04   : > { %v4336_v3 = vpop.xlane.xlu0 %4335 }
 0xd05   : > { %v4346_v4 = vsub.f32 %v4330_v61, %v4336_v3 }
 0xd07   : > { %v4350_v5 = vmul.f32 1.442695, %v4346_v4  ;;  %v6309_v4 = vld [vmem:[%s6510_s9 + $0x4] sm:$0xf] }
 0xd08   : > { %v4342_v7 = vpop.xlane.xlu0 %4341  ;;  %v4339_v8 = vpop.xlane.xlu1 %4338 }
 0xd09   : > { %6278 = vpow2.f32 %v4350_v5  ;;  %v4348_v9 = vsub.f32 %v4332_v6, %v4342_v7  ;;  %v4347_v10 = vsub.f32 %v4331_v52, %v4339_v8  ;;  %v6320_v8 = vmov 839922192  }
 0xd0b   : > { %v4354_v11 = vmul.f32 1.442695, %v4348_v9  ;;  %v4352_v12 = vmul.f32 1.442695, %v4347_v10  ;;  %v4888_v9 = vunpack.c.l.s4 %v6320_v8  ;;  %v4890_v10 = vlaneseq }
 0xd0c   : > { %v4345_v63 = vpop.xlane.xlu1 %4344 }
 0xd0d   : > { %6280 = vpow2.f32 %v4354_v11  ;;  %v4349_v13 = vsub.f32 %v4333_v0, %v4345_v63  ;;  %v6321_v11 = vmov 1985246804   ;;  %v4889_v63 = vunpack.c.0.s8 %v4888_v9 }
 0xd0e   : > { %6282 = vpow2.f32 %v4352_v12  ;;  %v4895_v12 = vunpack.c.l.s4 %v6321_v11  ;;  %v5015_v11 = vld [vmem:[%s7129_s22 + $0x8] sm:$0xff] }
 0xd0f   : > { %v4356_v14 = vmul.f32 1.442695, %v4349_v13  ;;  %v4891_v13 = vshrl.u32 %v4890_v10, 7  ;;  %v5014_v10 = vld [vmem:[%s7129_s22] sm:$0xff] }
 0xd11   : > { %6284 = vpow2.f32 %v4356_v14  ;;  %v4896_v14 = vunpack.c.0.s8 %v4895_v12  ;;  %v6194_v12 = vpack.c.bf16 %v5015_v11, %v5014_v10 }
 0xd13   : > { %v6279_v16 = vpop.eup %6278 }
 0xd14   : > { %v4358_v17 = vsel %vm1415_vm4, %v6279_v16, 0.0 }
 0xd15   : > { %4359 = vadd.xlane.f32.xlu0 %v4358_v17  ;;  %v7019_v17 = vsub.s32 %v4896_v14, %v4891_v13 }
 0xd17   : > { %v6281_v19 = vpop.eup %6280 }
 0xd18   : > { %v6283_v20 = vpop.eup %6282  ;;  %v4364_v18 = vsel %vm1415_vm4, %v6281_v19, 0.0 }
 0xd19   : > { %4365 = vadd.xlane.f32.xlu0 %v4364_v18  ;;  %v4361_v21 = vsel %vm1415_vm4, %v6283_v20, 0.0 }
 0xd1a   : > { %4362 = vadd.xlane.f32.xlu1 %v4361_v21 }
 0xd1b   : > { %v6285_v24 = vpop.eup %6284 }
 0xd1c   : > { %v4367_v27 = vsel %vm1415_vm4, %v6285_v24, 0.0 }
 0xd1e   : > { %4368 = vadd.xlane.f32.xlu1 %v4367_v27 }
 0xda2   : > { %v4360_v29 = vpop.xlane.xlu0 %4359 }
 0xda3   : > { %6286 = vrcp.f32 %v4360_v29 }
 0xda6   : > { %v4366_v30 = vpop.xlane.xlu0 %4365 }
 0xda7   : > { %6288 = vrcp.f32 %v4366_v30  ;;  %v4363_v31 = vpop.xlane.xlu1 %4362 }
 0xda8   : > { %6290 = vrcp.f32 %v4363_v31 }
 0xdab   : > { %v4369_v32 = vpop.xlane.xlu1 %4368 }
 0xdac   : > { %6292 = vrcp.f32 %v4369_v32 }
 0xdad   : > { %v6287_v33 = vpop.eup %6286 }
 0xdae   : > { %v4374_v34 = vmul.f32 %v6287_v33, %v6279_v16  ;;  %v7017_v16 = vsub.s32 %v4889_v63, %v4891_v13  ;;  %v5016_v63 = vld [vmem:[%s7129_s22 + $0x10] sm:$0xff]  ;;  %v5017_v13 = vld [vmem:[%s7129_s22 + $0x18] sm:$0xff] }
 0xdaf   : > { %v6198_v14 = vpack.c.bf16 %v5017_v13, %v5016_v63 }
 0xdb0   : > { %6013 = vmatmul.mubr.msk.f32.vlgmr.msra.gmra.mrb[36].mxu0 %vm1460_vm5, %v4374_v34 }
 0xdb1   : > { %v6289_v35 = vpop.eup %6288  ;;  %6021 = vmatpush3.msk.msra.mxu0 %vm1464_vm3, %v6944_v44  ;;  %6022 = vmatprep.mubr.msk.f32.mxu0 %vm6319_vm1, %v6318_v26  ;;  %v2872_v44 = vld [vmem:[%s7123_s16 + $0x18] sm:$0xff] }
 0xdb2   : > { %v6291_v36 = vpop.eup %6290  ;;  %v4376_v37 = vmul.f32 %v6289_v35, %v6281_v19  ;;  %v6178_v45 = vpack.c.bf16 %v2872_v44, %v2871_v42  ;;  %v5009_v44 = vld [vmem:[%s7127_s20] sm:$0xff] }
 0xdb3   : > { %v4375_v38 = vmul.f32 %v6291_v36, %v6283_v20 }
 0xdb4   : > { %6023 = vmatmul.mubr.msk.f32.vlgmr.msra.gmra.mrb[38].mxu0 %vm1460_vm5, %v4376_v37  ;;  %6179 = vmatprep.subr.bf16.mxu0 %v6178_v45 }
 0xdb5   : > { %6018 = vmatmul.mubr.msk.f32.vlgmr.msra.gmra.mrb[46].mxu1 %vm1460_vm5, %v4375_v38  ;;  %6181 = vmatpush3.bf16.msra.mxu0 %v6178_v45  ;;  %v5010_v45 = vld [vmem:[%s7127_s20 + $0x8] sm:$0xff] }
 0xdb6   : > { %v6293_v40 = vpop.eup %6292  ;;  %6026 = vmatpush3.msk.msra.mxu1 %vm1464_vm3, %v4033_v39  ;;  %6027 = vmatprep.mubr.msk.f32.mxu1 %vm6319_vm1, %v6318_v26  ;;  %v2870_v26 = vld [vmem:[%s7123_s16 + $0x8] sm:$0xff] }
 0xdb7   : > { %v4377_v41 = vmul.f32 %v6293_v40, %v6285_v24  ;;  %v6182_v47 = vpack.c.bf16 %v2870_v26, %v2869_v46  ;;  %v5011_v46 = vld [vmem:[%s7127_s20 + $0x10] sm:$0xff]  ;;  %v6186_v26 = vpack.c.bf16 %v5010_v45, %v5009_v44  ;;  %v5549_v45 = vld [vmem:[%s7130_s23] ss:$0 sm:$0xff] }
 0xdb9   : > { %6028 = vmatmul.mubr.msk.f32.vlgmr.msra.gmra.mrb[48].mxu1 %vm1460_vm5, %v4377_v41  ;;  %6183 = vmatprep.subr.bf16.mxu0 %v6182_v47 }
 0xdba   : > { %6187 = vmatprep.subr.bf16.mxu1 %v6186_v26 }
 0xdbb   : > { %6189 = vmatpush3.bf16.msra.mxu1 %v6186_v26 }
 0xe83   : > { %v4449_v48 = vpop.f32.mrb[36].mxu0 }
 0xe84   : > { %v6014_v53 = vpop.f32.mrb[37].mxu0 }
 0xe87   : > { %v4599_v55 = vpop.f32.mrb[38].mxu0 }
 0xe88   : > { %v4524_v56 = vpop.f32.mrb[46].mxu1  ;;  %v6024_v57 = vpop.f32.mrb[39].mxu0 }
 0xe89   : > { %v4682_v60 = vcombine.low %v4449_v48, %v4524_v56  ;;  %v6019_v61 = vpop.f32.mrb[47].mxu1 }
 0xe8b   : > { %6034 = vmatprep.mubr.msk.f32.mxu0 %vm1114_vm2, %v4682_v60 }
 0xe8c   : > { %v4674_v49 = vpop.f32.mrb[48].mxu1 }
 0xe8d   : > { %v4683_v6 = vcombine.low %v4599_v55, %v4674_v49  ;;  %v6029_v43 = vpop.f32.mrb[49].mxu1  ;;  %v5544_v49 = vld [vmem:[%s7125_s18] ss:$0 sm:$0xff] }
 0xe8e   : > { %v5545_v43 = vld [vmem:[%s7126_s19] ss:$0 sm:$0xff] }
 0xe8f   : > { %6035 = vmatmul.mubr.msk.f32.vlgmr.msra.gmra.mrb[40].mxu0 %vm1114_vm2, %v4683_v6 }
 0xe90   : > { %6185 = vmatpush3.bf16.msra.mxu0 %v6182_v47  ;;  %6041 = vmatprep.mubr.msk.f32.mxu0 %vm1114_vm2, %v4767_v23  ;;  %v6308_v23 = vld [vmem:[%s6510_s9] sm:$0xf]  ;;  %v5012_v47 = vld [vmem:[%s7127_s20 + $0x18] sm:$0xff] }
 0xe91   : > { %v6190_v48 = vpack.c.bf16 %v5012_v47, %v5011_v46  ;;  %6195 = vmatprep.subr.bf16.mxu0 %v6194_v12 }
 0xe93   : > { %6191 = vmatprep.subr.bf16.mxu1 %v6190_v48 }
 0xe94   : > { %6193 = vmatpush3.bf16.msra.mxu1 %v6190_v48 }
 0xe97   : > { %6042 = vmatmul.mubr.msk.f32.vlgmr.msra.gmra.mrb[40].mxu0 %vm1114_vm2, %v4768_v51 }
 0xe98   : > { %6197 = vmatpush3.bf16.msra.mxu0 %v6194_v12 }
 0xe99   : > { %6199 = vmatprep.subr.bf16.mxu0 %v6198_v14 }
 0xe9c   : > { %6201 = vmatpush3.bf16.msra.mxu0 %v6198_v14 }
 0xf6a   : > { %v6043_v52 = vpop.f32.mrb[40].mxu0 }
 0xf6b   : > { %v4855_v54 = vadd.f32 %v6043_v52, %v5543_v15  ;;  %v4839_v58 = vpop.f32.mrb[41].mxu0 }
 0xf6c   : > { %v4854_v59 = vadd.f32 %v5543_v15, %v4839_v58  ;;  %v4991_v58 = vcombine.high %v5544_v49, %v5544_v49 }
 0xf6d   : > { %v4859_v62 = vcombine.high %v4855_v54, %v4855_v54  ;;  %v4864_v22 = vadd.f32 %v6306_v1, %v4855_v54 }
 0xf6e   : > { %v4858_v0 = vcombine.high %v4854_v59, %v4854_v59  ;;  %v4862_v3 = vadd.f32 %v6308_v23, %v4854_v59 }
 0xf6f   : > { %v4865_v2 = vadd.f32 %v6307_v50, %v4859_v62 }
 0xf70   : > { %v4863_v25 = vadd.f32 %v6309_v4, %v4858_v0 }
 0xf71   : > { %v4873_v28 = vcombine.low %v4864_v22, %v4865_v2 }
 0xf72   : > { %v4872_v51 = vcombine.low %v4862_v3, %v4863_v25 }
 0xf73   : > { %v4879_v5 = vsel %vm850_vm0, %v4873_v28, 0.0 }
 0xf74   : > { %4880 = vadd.xlane.f32.xlu1 %v4879_v5  ;;  %v4876_v7 = vsel %vm850_vm0, %v4872_v51, 0.0 }
 0xf75   : > { %4877 = vadd.xlane.f32.xlu0 %v4876_v7 }
0x1001   : > { %v4881_v19 = vpop.xlane.xlu1 %4880 }
0x1002   : > { %v4884_v20 = vmul.f32 0.03125, %v4881_v19  ;;  %v4878_v18 = vpop.xlane.xlu0 %4877  ;;  %v5018_v19 = vld [vmem:[%s7129_s22 + $0x20] sm:$0xff] }
0x1003   : > { %v4883_v21 = vmul.f32 0.03125, %v4878_v18 }
0x1004   : > { %v4907_v24 = vrot.slane %v4884_v20, %v7017_v16  ;;  %v4914_v27 = vrot.slane %v4884_v20, %v7019_v17  ;;  %v5019_v20 = vld [vmem:[%s7129_s22 + $0x28] sm:$0xff] }
0x1005   : > { %v4893_v29 = vrot.slane %v4883_v21, %v7017_v16  ;;  %v4900_v30 = vrot.slane %v4883_v21, %v7019_v17  ;;  %v6202_v18 = vpack.c.bf16 %v5019_v20, %v5018_v19  ;;  %v5020_v21 = vld [vmem:[%s7129_s22 + $0x30] sm:$0xff]  ;;  %v5552_v19 = vld [vmem:[%s7131_s24] ss:$0 sm:$0xff] }
0x1006   : > { %v4921_v31 = vsub.f32 %v4864_v22, %v4907_v24  ;;  %v4922_v32 = vsub.f32 %v4865_v2, %v4914_v27  ;;  %v5003_v22 = vcombine.high %v5545_v43, %v5545_v43  ;;  %v5021_v24 = vld [vmem:[%s7129_s22 + $0x38] sm:$0xff] }
0x1007   : > { %v4919_v33 = vsub.f32 %v4862_v3, %v4893_v29  ;;  %v4920_v34 = vsub.f32 %v4863_v25, %v4900_v30  ;;  %6203 = vmatprep.subr.bf16.mxu0 %v6202_v18  ;;  %v6206_v27 = vpack.c.bf16 %v5021_v24, %v5020_v21  ;;  %v5546_v29 = vld [vmem:[%s7128_s21] ss:$0 sm:$0xff] }
0x1008   : > { %v4925_v35 = vmul.f32 %v4921_v31, %v4921_v31  ;;  %v4926_v36 = vmul.f32 %v4922_v32, %v4922_v32  ;;  %6205 = vmatpush3.bf16.msra.mxu0 %v6202_v18  ;;  %v5553_v21 = vld [vmem:[%s7132_s25] ss:$0 sm:$0xff] }
0x1009   : > { %v4923_v37 = vmul.f32 %v4919_v33, %v4919_v33  ;;  %v4924_v38 = vmul.f32 %v4920_v34, %v4920_v34  ;;  %6207 = vmatprep.subr.bf16.mxu0 %v6206_v27 }
0x100a   : > { %v4932_v39 = vcombine.low %v4925_v35, %v4926_v36 }
0x100b   : > { %v4931_v40 = vcombine.low %v4923_v37, %v4924_v38 }
0x100c   : > { %v4938_v41 = vsel %vm850_vm0, %v4932_v39, 0.0  ;;  %6209 = vmatpush3.bf16.msra.mxu0 %v6206_v27 }
0x100d   : > { %4939 = vadd.xlane.f32.xlu1 %v4938_v41  ;;  %v4935_v42 = vsel %vm850_vm0, %v4931_v40, 0.0 }
0x100e   : > { %4936 = vadd.xlane.f32.xlu0 %v4935_v42 }
0x109a   : > { %v4940_v53 = vpop.xlane.xlu1 %4939 }
0x109b   : > { %v4942_v55 = vmul.f32 0.03125, %v4940_v53  ;;  %v4937_v56 = vpop.xlane.xlu0 %4936 }
0x109c   : > { %v4941_v57 = vmul.f32 0.03125, %v4937_v56 }
0x109d   : > { %v4944_v60 = vadd.f32 1e-05, %v4942_v55 }
0x109e   : > { %v4943_v61 = vadd.f32 1e-05, %v4941_v57 }
0x109f   : > { %6294 = vrsqrt.f32 %v4944_v60 }
0x10a0   : > { %6296 = vrsqrt.f32 %v4943_v61 }
0x10a9   : > { %v6295_v6 = vpop.eup %6294 }
0x10aa   : > { %v6297_v15 = vpop.eup %6296  ;;  %v4969_v52 = vrot.slane %v6295_v6, %v7017_v16  ;;  %v4976_v54 = vrot.slane %v6295_v6, %v7019_v17 }
0x10ab   : > { %v4955_v59 = vrot.slane %v6297_v15, %v7017_v16  ;;  %v4962_v62 = vrot.slane %v6297_v15, %v7019_v17 }
0x10ac   : > { %v4983_v0 = vmul.f32 %v4969_v52, %v4921_v31  ;;  %v4984_v1 = vmul.f32 %v4976_v54, %v4922_v32 }
0x10ad   : > { %v4981_v50 = vmul.f32 %v4955_v59, %v4919_v33  ;;  %v4982_v2 = vmul.f32 %v4962_v62, %v4920_v34 }
0x10ae   : > { %v4996_v23 = vmul.f32 %v4991_v58, %v4984_v1  ;;  %v4995_v3 = vmul.f32 %v5544_v49, %v4983_v0 }
0x10af   : > { %v4993_v4 = vmul.f32 %v5544_v49, %v4981_v50  ;;  %v4994_v25 = vmul.f32 %v4991_v58, %v4982_v2 }
0x10b0   : > { %v5008_v28 = vadd.f32 %v5003_v22, %v4996_v23  ;;  %v5007_v51 = vadd.f32 %v5545_v43, %v4995_v3 }
0x10b1   : > { %v5005_v5 = vadd.f32 %v5545_v43, %v4993_v4  ;;  %v5006_v7 = vadd.f32 %v5003_v22, %v4994_v25 }
0x10b2   : > { %v5034_v9 = vcombine.low %v5007_v51, %v5008_v28 }
0x10b3   : > { %v5033_v8 = vcombine.low %v5005_v5, %v5006_v7 }
0x10b5   : > { %6052 = vmatprep.mubr.msk.f32.mxu1 %vm850_vm0, %v5033_v8 }
0x10b6   : > { %6053 = vmatmul.mubr.msk.f32.vlgmr.msra.gmra.mrb[50].mxu1 %vm850_vm0, %v5034_v9 }
0x1189   : > { %v6054_v30 = vpop.f32.mrb[50].mxu1 }
0x118a   : > { %v5111_v31 = vadd.f32 %v6054_v30, %v5546_v29  ;;  %v5105_v32 = vpop.f32.mrb[51].mxu1 }
0x118b   : > { %v5106_v33 = vadd.f32 %v5546_v29, %v5105_v32  ;;  %v5346_v29 = vcombine.high %v5552_v19, %v5552_v19 }
0x118c   : > { %v5117_v34 = vmul.f32 0.70710677, %v5111_v31  ;;  %v5115_v41 = vmul.f32 0.5, %v5111_v31 }
0x118d   : > { %v5116_v35 = vmul.f32 0.70710677, %v5106_v33  ;;  %v5114_v39 = vmul.f32 0.5, %v5106_v33 }
0x118e   : > { %6298 = verf.f32 %v5117_v34  ;;  %v5358_v34 = vcombine.high %v5553_v21, %v5553_v21 }
0x118f   : > { %6300 = verf.f32 %v5116_v35 }
0x1198   : > { %v6299_v36 = vpop.eup %6298 }
0x1199   : > { %v6301_v37 = vpop.eup %6300  ;;  %v5121_v38 = vadd.f32 1.0, %v6299_v36 }
0x119a   : > { %v5120_v40 = vadd.f32 1.0, %v6301_v37 }
0x119b   : > { %v5123_v44 = vmul.f32 %v5121_v38, %v5115_v41 }
0x119c   : > { %v5122_v42 = vmul.f32 %v5120_v40, %v5114_v39 }
0x119e   : > { %6071 = vmatprep.mubr.msk.f32.mxu0 %vm5130_vm6, %v5122_v42 }
0x119f   : > { %6072 = vmatmul.mubr.msk.f32.vlgmr.msra.gmra.mrb[42].mxu0 %vm5130_vm6, %v5123_v44 }
0x1272   : > { %v6073_v46 = vpop.f32.mrb[42].mxu0 }
0x1273   : > { %v5209_v26 = vadd.f32 %v6073_v46, %v5549_v45  ;;  %v5203_v47 = vpop.f32.mrb[43].mxu0 }
0x1274   : > { %v5204_v48 = vadd.f32 %v5549_v45, %v5203_v47 }
0x1275   : > { %v5215_v53 = vcombine.high %v5209_v26, %v5209_v26  ;;  %v5220_v56 = vadd.f32 %v5209_v26, %v5007_v51 }
0x1276   : > { %v5214_v55 = vcombine.high %v5204_v48, %v5204_v48  ;;  %v5218_v60 = vadd.f32 %v5204_v48, %v5005_v5 }
0x1277   : > { %v5221_v57 = vadd.f32 %v5215_v53, %v5008_v28 }
0x1278   : > { %v5219_v61 = vadd.f32 %v5214_v55, %v5006_v7 }
0x1279   : > { %v5229_v49 = vcombine.low %v5220_v56, %v5221_v57 }
0x127a   : > { %v5228_v6 = vcombine.low %v5218_v60, %v5219_v61 }
0x127b   : > { %v5235_v43 = vsel %vm850_vm0, %v5229_v49, 0.0 }
0x127c   : > { %5236 = vadd.xlane.f32.xlu1 %v5235_v43  ;;  %v5232_v15 = vsel %vm850_vm0, %v5228_v6, 0.0 }
0x127d   : > { %5233 = vadd.xlane.f32.xlu0 %v5232_v15 }
0x1309   : > { %v5237_v52 = vpop.xlane.xlu1 %5236 }
0x130a   : > { %v5239_v54 = vmul.f32 0.03125, %v5237_v52  ;;  %v5234_v58 = vpop.xlane.xlu0 %5233 }
0x130b   : > { %v5238_v59 = vmul.f32 0.03125, %v5234_v58 }
0x130c   : > { %v5262_v62 = vrot.slane %v5239_v54, %v7017_v16  ;;  %v5269_v0 = vrot.slane %v5239_v54, %v7019_v17 }
0x130d   : > { %v5248_v1 = vrot.slane %v5238_v59, %v7017_v16  ;;  %v5255_v22 = vrot.slane %v5238_v59, %v7019_v17 }
0x130e   : > { %v5276_v50 = vsub.f32 %v5220_v56, %v5262_v62  ;;  %v5277_v2 = vsub.f32 %v5221_v57, %v5269_v0 }
0x130f   : > { %v5274_v23 = vsub.f32 %v5218_v60, %v5248_v1  ;;  %v5275_v3 = vsub.f32 %v5219_v61, %v5255_v22 }
0x1310   : > { %v5280_v4 = vmul.f32 %v5276_v50, %v5276_v50  ;;  %v5281_v25 = vmul.f32 %v5277_v2, %v5277_v2 }
0x1311   : > { %v5278_v28 = vmul.f32 %v5274_v23, %v5274_v23  ;;  %v5279_v51 = vmul.f32 %v5275_v3, %v5275_v3 }
0x1312   : > { %v5287_v5 = vcombine.low %v5280_v4, %v5281_v25 }
0x1313   : > { %v5286_v7 = vcombine.low %v5278_v28, %v5279_v51 }
0x1314   : > { %v5293_v8 = vsel %vm850_vm0, %v5287_v5, 0.0 }
0x1315   : > { %5294 = vadd.xlane.f32.xlu1 %v5293_v8  ;;  %v5290_v9 = vsel %vm850_vm0, %v5286_v7, 0.0 }
0x1316   : > { %5291 = vadd.xlane.f32.xlu0 %v5290_v9 }
0x13a2   : > { %v5295_v10 = vpop.xlane.xlu1 %5294 }
0x13a3   : > { %v5297_v11 = vmul.f32 0.03125, %v5295_v10  ;;  %v5292_v12 = vpop.xlane.xlu0 %5291 }
0x13a4   : > { %v5296_v63 = vmul.f32 0.03125, %v5292_v12 }
0x13a5   : > { %v5299_v13 = vadd.f32 1e-05, %v5297_v11 }
0x13a6   : > { %v5298_v14 = vadd.f32 1e-05, %v5296_v63 }
0x13a7   : > { %6302 = vrsqrt.f32 %v5299_v13 }
0x13a8   : > { %6304 = vrsqrt.f32 %v5298_v14 }
0x13b1   : > { %v6303_v20 = vpop.eup %6302 }
0x13b2   : > { %v6305_v18 = vpop.eup %6304  ;;  %v5324_v24 = vrot.slane %v6303_v20, %v7017_v16  ;;  %v5331_v27 = vrot.slane %v6303_v20, %v7019_v17 }
0x13b3   : > { %v5310_v30 = vrot.slane %v6305_v18, %v7017_v16  ;;  %v5317_v31 = vrot.slane %v6305_v18, %v7019_v17 }
0x13b4   : > { %v5338_v32 = vmul.f32 %v5324_v24, %v5276_v50  ;;  %v5339_v33 = vmul.f32 %v5331_v27, %v5277_v2 }
0x13b5   : > { %v5336_v35 = vmul.f32 %v5310_v30, %v5274_v23  ;;  %v5337_v36 = vmul.f32 %v5317_v31, %v5275_v3 }
0x13b6   : > { %v5350_v37 = vmul.f32 %v5552_v19, %v5338_v32  ;;  %v5351_v40 = vmul.f32 %v5346_v29, %v5339_v33 }
0x13b7   : > { %v5348_v38 = vmul.f32 %v5552_v19, %v5336_v35  ;;  %v5349_v39 = vmul.f32 %v5346_v29, %v5337_v36 }
0x13b8   : > { %v5362_v16 = vadd.f32 %v5553_v21, %v5350_v37  ;;  %v5363_v17 = vadd.f32 %v5358_v34, %v5351_v40 }
0x13b9   : > { %v5360_v41 = vadd.f32 %v5553_v21, %v5348_v38  ;;  %v5361_v42 = vadd.f32 %v5358_v34, %v5349_v39 }
0x13ba   : > { %5367 = vst.msk [vmem:[%s793_s27 + $0x8] sm:$0xf] %vm5364_vm7, %v5362_v16  ;;  %5368 = vst.msk [vmem:[%s793_s27 + $0xc] sm:$0xf] %vm5364_vm7, %v5363_v17 }
0x13bb   : > { %5365 = vst.msk [vmem:[%s793_s27] sm:$0xf] %vm5364_vm7, %v5360_v41  ;;  %5366 = vst.msk [vmem:[%s793_s27 + $0x4] sm:$0xf] %vm5364_vm7, %v5361_v42 }
0x13bc PF: > { %s7176_s3 = sld [smem:[#allocation2_spill]] }
0x13c2   : > { %s36_s27 = sadd.s32 1, %s7176_s3  }
0x13c3   : > { %p33_p4 = scmp.ge.s32.totalorder %s36_s27, 4  }
0x13c5   :  { %35 = sbr.rel (!%p33_p4) target bundleno = 13 (0xd), region = 154 }

</bundles_post_ra>
